<compile_context>
chip_gen: v7x
topology: tpu7x:2x2x1
jax: 0.10.0
libtpu: 0.0.40
codegen_flags: <defaults>
</compile_context>

<pallas_src>
import functools

import jax
import jax.numpy as jnp
from jax.experimental import pallas as pl
from jax.experimental.pallas import tpu as pltpu

QUAT = 4
HID = 1024
NQ = HID // QUAT  # 256 quaternions


def _round_up(x, m):
    return (x + m - 1) // m * m


def _quat_residual_kernel(x12_ref, wbig_ref, bbig_ref, fw1q_ref,
                          fw2_ref, fb2_ref, fw3_ref, fb3_ref, out_ref):
    # Packed projection: (bt, E1+E2) @ [[dw, 0, fw1_x1], [0, sw, fw1_x2]]
    #   columns [0:1024]=p1, [1024:2048]=p2, [2048:3072]=h_x (fb1 folded in b_big).
    x12 = x12_ref[...].astype(jnp.bfloat16)
    r = jnp.dot(x12, wbig_ref[...], preferred_element_type=jnp.float32) + bbig_ref[...]
    p1 = r[:, 0:HID]
    p2 = r[:, HID:2 * HID]
    h = r[:, 2 * HID:3 * HID]

    # Component-planar slabs (256 lanes each) thanks to the weight permutation.
    a1, b1, c1, d1 = (p1[:, 0:NQ], p1[:, NQ:2 * NQ],
                      p1[:, 2 * NQ:3 * NQ], p1[:, 3 * NQ:4 * NQ])
    a2, b2, c2, d2 = (p2[:, 0:NQ], p2[:, NQ:2 * NQ],
                      p2[:, 2 * NQ:3 * NQ], p2[:, 3 * NQ:4 * NQ])

    # Hamilton product, one component at a time, each feeding a K=256
    # accumulating matmul against its planar fw1_q row slab (no quat concat,
    # no (bt,1024) temp, bounded live values).
    qa = a1 * a2 - b1 * b2 - c1 * c2 - d1 * d2
    h = h + jnp.dot(qa.astype(jnp.bfloat16), fw1q_ref[0:NQ, :],
                    preferred_element_type=jnp.float32)
    qb = a1 * b2 + b1 * a2 + c1 * d2 - d1 * c2
    h = h + jnp.dot(qb.astype(jnp.bfloat16), fw1q_ref[NQ:2 * NQ, :],
                    preferred_element_type=jnp.float32)
    qc = a1 * c2 - b1 * d2 + c1 * a2 + d1 * b2
    h = h + jnp.dot(qc.astype(jnp.bfloat16), fw1q_ref[2 * NQ:3 * NQ, :],
                    preferred_element_type=jnp.float32)
    qd = a1 * d2 + b1 * c2 - c1 * b2 + d1 * a2
    h = h + jnp.dot(qd.astype(jnp.bfloat16), fw1q_ref[3 * NQ:4 * NQ, :],
                    preferred_element_type=jnp.float32)

    # fusion_fc tail (Dropout layers are identity at inference).
    h = jnp.maximum(h, 0.0)
    h2 = jnp.dot(h.astype(jnp.bfloat16), fw2_ref[...],
                 preferred_element_type=jnp.float32) + fb2_ref[...]
    h2 = jnp.maximum(h2, 0.0)
    out = jnp.dot(h2, fw3_ref[...], preferred_element_type=jnp.float32) + fb3_ref[...]
    out_ref[...] = out.astype(out_ref.dtype)


def prepare_params(params, embed_dim1, embed_dim2):
    """One-time weight prep: permute, pack, pad, bf16-cast (hoisted out of the fwd)."""
    E1, E2 = embed_dim1, embed_dim2
    C = params["fw3"].shape[1]

    # planar column p = c*NQ + i  <-  interleaved column 4*i + c
    idx = (jnp.arange(QUAT)[:, None] + QUAT * jnp.arange(NQ)[None, :]).reshape(-1)

    dw_p = params["dw"][:, idx]
    db_p = params["db"][:, idx]
    sw_p = params["sw"][:, idx]
    sb_p = params["sb"][:, idx]

    fw1 = params["fw1"]                        # (E1+E2+1024, 1024)
    fw1_x1 = fw1[:E1]
    fw1_x2 = fw1[E1:E1 + E2]
    fw1_q = fw1[E1 + E2:][idx, :]              # rows permuted to planar layout

    # Block-structured packed weight: [p1 | p2 | h_x] in one K=(E1+E2) matmul.
    top = jnp.concatenate([dw_p, jnp.zeros((E1, HID), jnp.float32), fw1_x1], axis=1)
    bot = jnp.concatenate([jnp.zeros((E2, HID), jnp.float32), sw_p, fw1_x2], axis=1)
    w_big = jnp.concatenate([top, bot], axis=0).astype(jnp.bfloat16)   # (E1+E2, 3072)
    b_big = jnp.concatenate([db_p, sb_p, params["fb1"]], axis=1)       # (1, 3072) f32

    # Pad the tiny class dim to a lane-dense 128-wide store; sliced off outside.
    C_pad = _round_up(max(C, 1), 128)
    fw3 = jnp.pad(params["fw3"], ((0, 0), (0, C_pad - C)))
    fb3 = jnp.pad(params["fb3"], ((0, 0), (0, C_pad - C)))

    return {
        "w_big": w_big,
        "b_big": b_big,
        "fw1_q": fw1_q.astype(jnp.bfloat16),
        "fw2": params["fw2"].astype(jnp.bfloat16),
        "fb2": params["fb2"],
        "fw3": fw3,          # final layer kept f32
        "fb3": fb3,
    }


def two_embedding_quat_residual_forward(x1, x2, prep, *, num_classes, batch_tile=256):
    """Full forward pass in one batch-gridded Pallas kernel (weights VMEM-resident)."""
    B, E1 = x1.shape
    E2 = x2.shape[1]
    C_pad = prep["fw3"].shape[1]

    # Batch tile: sublane-aligned, and (when B allows) at least 2 grid steps so the
    # "parallel" axis really shards across the two v7x TensorCores.
    B8 = _round_up(B, 8)
    bt = min(batch_tile, max(8, _round_up(B8 // 2, 8)))
    Bp = _round_up(B, bt)

    x12 = jnp.concatenate([x1, x2], axis=1)          # single (B, E1+E2) activation
    x12 = jnp.pad(x12, ((0, Bp - B), (0, 0)))

    weights = (prep["w_big"], prep["b_big"], prep["fw1_q"],
               prep["fw2"], prep["fb2"], prep["fw3"], prep["fb3"])

    def resident(w):
        nd = w.ndim
        # Block index never changes -> weights stay VMEM-resident across the grid.
        # (bf16 cast keeps the double-buffered footprint ~3.5 MiB; no need to
        #  force single-buffering for headroom.)
        return pl.BlockSpec(w.shape, lambda i, _nd=nd: (0,) * _nd)

    out = pl.pallas_call(
        _quat_residual_kernel,
        out_shape=jax.ShapeDtypeStruct((Bp, C_pad), jnp.float32),
        grid=(Bp // bt,),
        in_specs=[pl.BlockSpec((bt, E1 + E2), lambda i: (i, 0))]
                 + [resident(w) for w in weights],
        out_specs=pl.BlockSpec((bt, C_pad), lambda i: (i, 0)),
        compiler_params=pltpu.CompilerParams(
            dimension_semantics=("parallel",),
            vmem_limit_bytes=48 << 20,
        ),
    )(x12, *weights)
    return out[:B, :num_classes]


# ---------------- deterministic parameter init (nn.Linear-style) ----------------
def _linear_params(key, fan_in, fan_out):
    kw, kb = jax.random.split(key)
    bound = 1.0 / (fan_in ** 0.5)
    w = jax.random.uniform(kw, (fan_in, fan_out), jnp.float32, -bound, bound)
    b = jax.random.uniform(kb, (1, fan_out), jnp.float32, -bound, bound)
    return w, b


def init_params(key, embed_dim1, embed_dim2, num_classes):
    D = embed_dim1 + embed_dim2 + HID
    k = jax.random.split(key, 5)
    p = {}
    p["dw"], p["db"] = _linear_params(k[0], embed_dim1, HID)     # decrease_embed
    p["sw"], p["sb"] = _linear_params(k[1], embed_dim2, HID)     # smaller_embed
    p["fw1"], p["fb1"] = _linear_params(k[2], D, 1024)           # fusion_fc[0]
    p["fw2"], p["fb2"] = _linear_params(k[3], 1024, 256)         # fusion_fc[3]
    p["fw3"], p["fb3"] = _linear_params(k[4], 256, num_classes)  # fusion_fc[6]
    return p


# ---------------- pure-JAX reference (mirrors the PyTorch module, f32) ----------------
def _quaternion_mul_ref(q1, q2):
    a1, b1, c1, d1 = q1[..., 0], q1[..., 1], q1[..., 2], q1[..., 3]
    a2, b2, c2, d2 = q2[..., 0], q2[..., 1], q2[..., 2], q2[..., 3]
    a = a1 * a2 - b1 * b2 - c1 * c2 - d1 * d2
    b = a1 * b2 + b1 * a2 + c1 * d2 - d1 * c2
    c = a1 * c2 - b1 * d2 + c1 * a2 + d1 * b2
    d = a1 * d2 + b1 * c2 - c1 * b2 + d1 * a2
    return jnp.stack([a, b, c, d], axis=-1)


def reference_forward(x1, x2, p):
    hp = jax.lax.Precision.HIGHEST
    bsz = x1.shape[0]
    h1 = jnp.dot(x1, p["dw"], precision=hp) + p["db"]
    h2 = jnp.dot(x2, p["sw"], precision=hp) + p["sb"]
    q = _quaternion_mul_ref(h1.reshape(bsz, NQ, QUAT), h2.reshape(bsz, NQ, QUAT))
    feats = jnp.concatenate([x1, x2, q.reshape(bsz, -1)], axis=-1)
    h = jax.nn.relu(jnp.dot(feats, p["fw1"], precision=hp) + p["fb1"])
    h = jax.nn.relu(jnp.dot(h, p["fw2"], precision=hp) + p["fb2"])
    return jnp.dot(h, p["fw3"], precision=hp) + p["fb3"]


if __name__ == "__main__":
    B, E1, E2, C = 8, 64, 64, 10
    key = jax.random.PRNGKey(0)
    kx1, kx2, kp = jax.random.split(key, 3)
    x1 = jax.random.normal(kx1, (B, E1), jnp.float32)
    x2 = jax.random.normal(kx2, (B, E2), jnp.float32)
    params = init_params(kp, E1, E2, C)

    prep = prepare_params(params, E1, E2)   # one-time permute/pack/pad/bf16-cast
    fwd = jax.jit(functools.partial(two_embedding_quat_residual_forward, num_classes=C))
    out = jax.block_until_ready(fwd(x1, x2, prep))

    ref = reference_forward(x1, x2, params)
    assert out.shape == (B, C)
    max_err = float(jnp.max(jnp.abs(out - ref)))
    # bf16 operands on the 1024-wide matmuls -> loosened tolerance vs f32 reference.
    assert jnp.allclose(out, ref, atol=1e-2, rtol=1e-2), f"mismatch vs reference, max_err={max_err}"
    print("KERNEL_OK")
</pallas_src>

<mosaic_0001>
module attributes {stable_mosaic.version = 11 : i64} {
  func.func @_quat_residual_kernel(%arg0: i32, %arg1: memref<8x128xf32, #tpu.memory_space<vmem>>, %arg2: memref<128x3072xbf16, #tpu.memory_space<vmem>>, %arg3: memref<1x3072xf32, #tpu.memory_space<vmem>>, %arg4: memref<1024x1024xbf16, #tpu.memory_space<vmem>>, %arg5: memref<1024x256xbf16, #tpu.memory_space<vmem>>, %arg6: memref<1x256xf32, #tpu.memory_space<vmem>>, %arg7: memref<256x128xf32, #tpu.memory_space<vmem>>, %arg8: memref<1x128xf32, #tpu.memory_space<vmem>>, %arg9: memref<8x128xf32, #tpu.memory_space<vmem>>) attributes {dimension_semantics = [#tpu.dimension_semantics<parallel>], iteration_bounds = array<i64: 1>, scalar_prefetch = 0 : i64, scratch_operands = 0 : i64, tpu.core_type = #tpu.core_type<tc>, window_params = [{transform_indices = @transform_0, window_bounds = array<i64: 8, 128>}, {pipeline_mode = #tpu.pipeline_mode<synchronous>, transform_indices = @transform_1, window_bounds = array<i64: 128, 3072>}, {pipeline_mode = #tpu.pipeline_mode<synchronous>, transform_indices = @transform_2, window_bounds = array<i64: 1, 3072>}, {pipeline_mode = #tpu.pipeline_mode<synchronous>, transform_indices = @transform_3, window_bounds = array<i64: 1024, 1024>}, {pipeline_mode = #tpu.pipeline_mode<synchronous>, transform_indices = @transform_4, window_bounds = array<i64: 1024, 256>}, {pipeline_mode = #tpu.pipeline_mode<synchronous>, transform_indices = @transform_5, window_bounds = array<i64: 1, 256>}, {pipeline_mode = #tpu.pipeline_mode<synchronous>, transform_indices = @transform_6, window_bounds = array<i64: 256, 128>}, {pipeline_mode = #tpu.pipeline_mode<synchronous>, transform_indices = @transform_7, window_bounds = array<i64: 1, 128>}, {transform_indices = @transform_8, window_bounds = array<i64: 8, 128>}]} {
    %c0 = arith.constant 0 : index
    %c0_0 = arith.constant 0 : index
    %0 = vector.load %arg1[%c0, %c0_0] : memref<8x128xf32, #tpu.memory_space<vmem>>, vector<8x128xf32>
    %1 = arith.truncf %0 : vector<8x128xf32> to vector<8x128xbf16>
    %c0_1 = arith.constant 0 : index
    %c0_2 = arith.constant 0 : index
    %2 = vector.load %arg2[%c0_1, %c0_2] : memref<128x3072xbf16, #tpu.memory_space<vmem>>, vector<128x3072xbf16>
    %cst = arith.constant dense<0.000000e+00> : vector<8x3072xf32>
    %3 = tpu.matmul %1, %2, %cst {dimension_numbers = #tpu.dot_dimension_numbers<[1], [0], [0], [1], [0, 0, 1, 1], [], []>} : vector<8x128xbf16>, vector<128x3072xbf16>, vector<8x3072xf32> -> vector<8x3072xf32>
    %c0_3 = arith.constant 0 : index
    %c0_4 = arith.constant 0 : index
    %4 = vector.load %arg3[%c0_3, %c0_4] : memref<1x3072xf32, #tpu.memory_space<vmem>>, vector<1x3072xf32>
    %5 = vector.broadcast %4 : vector<1x3072xf32> to vector<8x3072xf32>
    %6 = arith.addf %3, %5 : vector<8x3072xf32>
    %7 = vector.extract_strided_slice %6 {offsets = [0, 0], sizes = [8, 1024], strides = [1, 1]} : vector<8x3072xf32> to vector<8x1024xf32>
    %8 = vector.extract_strided_slice %6 {offsets = [0, 1024], sizes = [8, 1024], strides = [1, 1]} : vector<8x3072xf32> to vector<8x1024xf32>
    %9 = vector.extract_strided_slice %6 {offsets = [0, 2048], sizes = [8, 1024], strides = [1, 1]} : vector<8x3072xf32> to vector<8x1024xf32>
    %10 = vector.extract_strided_slice %7 {offsets = [0, 0], sizes = [8, 256], strides = [1, 1]} : vector<8x1024xf32> to vector<8x256xf32>
    %11 = vector.extract_strided_slice %7 {offsets = [0, 256], sizes = [8, 256], strides = [1, 1]} : vector<8x1024xf32> to vector<8x256xf32>
    %12 = vector.extract_strided_slice %7 {offsets = [0, 512], sizes = [8, 256], strides = [1, 1]} : vector<8x1024xf32> to vector<8x256xf32>
    %13 = vector.extract_strided_slice %7 {offsets = [0, 768], sizes = [8, 256], strides = [1, 1]} : vector<8x1024xf32> to vector<8x256xf32>
    %14 = vector.extract_strided_slice %8 {offsets = [0, 0], sizes = [8, 256], strides = [1, 1]} : vector<8x1024xf32> to vector<8x256xf32>
    %15 = vector.extract_strided_slice %8 {offsets = [0, 256], sizes = [8, 256], strides = [1, 1]} : vector<8x1024xf32> to vector<8x256xf32>
    %16 = vector.extract_strided_slice %8 {offsets = [0, 512], sizes = [8, 256], strides = [1, 1]} : vector<8x1024xf32> to vector<8x256xf32>
    %17 = vector.extract_strided_slice %8 {offsets = [0, 768], sizes = [8, 256], strides = [1, 1]} : vector<8x1024xf32> to vector<8x256xf32>
    %18 = arith.mulf %10, %14 : vector<8x256xf32>
    %19 = arith.mulf %11, %15 : vector<8x256xf32>
    %20 = arith.subf %18, %19 : vector<8x256xf32>
    %21 = arith.mulf %12, %16 : vector<8x256xf32>
    %22 = arith.subf %20, %21 : vector<8x256xf32>
    %23 = arith.mulf %13, %17 : vector<8x256xf32>
    %24 = arith.subf %22, %23 : vector<8x256xf32>
    %25 = arith.truncf %24 : vector<8x256xf32> to vector<8x256xbf16>
    %c0_5 = arith.constant 0 : index
    %c0_6 = arith.constant 0 : index
    %26 = vector.load %arg4[%c0_5, %c0_6] : memref<1024x1024xbf16, #tpu.memory_space<vmem>>, vector<256x1024xbf16>
    %cst_7 = arith.constant dense<0.000000e+00> : vector<8x1024xf32>
    %27 = tpu.matmul %25, %26, %cst_7 {dimension_numbers = #tpu.dot_dimension_numbers<[1], [0], [0], [1], [0, 0, 1, 1], [], []>} : vector<8x256xbf16>, vector<256x1024xbf16>, vector<8x1024xf32> -> vector<8x1024xf32>
    %28 = arith.addf %9, %27 : vector<8x1024xf32>
    %29 = arith.mulf %10, %15 : vector<8x256xf32>
    %30 = arith.mulf %11, %14 : vector<8x256xf32>
    %31 = arith.addf %29, %30 : vector<8x256xf32>
    %32 = arith.mulf %12, %17 : vector<8x256xf32>
    %33 = arith.addf %31, %32 : vector<8x256xf32>
    %34 = arith.mulf %13, %16 : vector<8x256xf32>
    %35 = arith.subf %33, %34 : vector<8x256xf32>
    %36 = arith.truncf %35 : vector<8x256xf32> to vector<8x256xbf16>
    %c256 = arith.constant 256 : index
    %c0_8 = arith.constant 0 : index
    %37 = vector.load %arg4[%c256, %c0_8] : memref<1024x1024xbf16, #tpu.memory_space<vmem>>, vector<256x1024xbf16>
    %cst_9 = arith.constant dense<0.000000e+00> : vector<8x1024xf32>
    %38 = tpu.matmul %36, %37, %cst_9 {dimension_numbers = #tpu.dot_dimension_numbers<[1], [0], [0], [1], [0, 0, 1, 1], [], []>} : vector<8x256xbf16>, vector<256x1024xbf16>, vector<8x1024xf32> -> vector<8x1024xf32>
    %39 = arith.addf %28, %38 : vector<8x1024xf32>
    %40 = arith.mulf %10, %16 : vector<8x256xf32>
    %41 = arith.mulf %11, %17 : vector<8x256xf32>
    %42 = arith.subf %40, %41 : vector<8x256xf32>
    %43 = arith.mulf %12, %14 : vector<8x256xf32>
    %44 = arith.addf %42, %43 : vector<8x256xf32>
    %45 = arith.mulf %13, %15 : vector<8x256xf32>
    %46 = arith.addf %44, %45 : vector<8x256xf32>
    %47 = arith.truncf %46 : vector<8x256xf32> to vector<8x256xbf16>
    %c512 = arith.constant 512 : index
    %c0_10 = arith.constant 0 : index
    %48 = vector.load %arg4[%c512, %c0_10] : memref<1024x1024xbf16, #tpu.memory_space<vmem>>, vector<256x1024xbf16>
    %cst_11 = arith.constant dense<0.000000e+00> : vector<8x1024xf32>
    %49 = tpu.matmul %47, %48, %cst_11 {dimension_numbers = #tpu.dot_dimension_numbers<[1], [0], [0], [1], [0, 0, 1, 1], [], []>} : vector<8x256xbf16>, vector<256x1024xbf16>, vector<8x1024xf32> -> vector<8x1024xf32>
    %50 = arith.addf %39, %49 : vector<8x1024xf32>
    %51 = arith.mulf %10, %17 : vector<8x256xf32>
    %52 = arith.mulf %11, %16 : vector<8x256xf32>
    %53 = arith.addf %51, %52 : vector<8x256xf32>
    %54 = arith.mulf %12, %15 : vector<8x256xf32>
    %55 = arith.subf %53, %54 : vector<8x256xf32>
    %56 = arith.mulf %13, %14 : vector<8x256xf32>
    %57 = arith.addf %55, %56 : vector<8x256xf32>
    %58 = arith.truncf %57 : vector<8x256xf32> to vector<8x256xbf16>
    %c768 = arith.constant 768 : index
    %c0_12 = arith.constant 0 : index
    %59 = vector.load %arg4[%c768, %c0_12] : memref<1024x1024xbf16, #tpu.memory_space<vmem>>, vector<256x1024xbf16>
    %cst_13 = arith.constant dense<0.000000e+00> : vector<8x1024xf32>
    %60 = tpu.matmul %58, %59, %cst_13 {dimension_numbers = #tpu.dot_dimension_numbers<[1], [0], [0], [1], [0, 0, 1, 1], [], []>} : vector<8x256xbf16>, vector<256x1024xbf16>, vector<8x1024xf32> -> vector<8x1024xf32>
    %61 = arith.addf %50, %60 : vector<8x1024xf32>
    %cst_14 = arith.constant 0.000000e+00 : f32
    %62 = vector.broadcast %cst_14 : f32 to vector<8x1024xf32>
    %63 = arith.maximumf %61, %62 : vector<8x1024xf32>
    %64 = arith.truncf %63 : vector<8x1024xf32> to vector<8x1024xbf16>
    %c0_15 = arith.constant 0 : index
    %c0_16 = arith.constant 0 : index
    %65 = vector.load %arg5[%c0_15, %c0_16] : memref<1024x256xbf16, #tpu.memory_space<vmem>>, vector<1024x256xbf16>
    %cst_17 = arith.constant dense<0.000000e+00> : vector<8x256xf32>
    %66 = tpu.matmul %64, %65, %cst_17 {dimension_numbers = #tpu.dot_dimension_numbers<[1], [0], [0], [1], [0, 0, 1, 1], [], []>} : vector<8x1024xbf16>, vector<1024x256xbf16>, vector<8x256xf32> -> vector<8x256xf32>
    %c0_18 = arith.constant 0 : index
    %c0_19 = arith.constant 0 : index
    %67 = vector.load %arg6[%c0_18, %c0_19] : memref<1x256xf32, #tpu.memory_space<vmem>>, vector<1x256xf32>
    %68 = vector.broadcast %67 : vector<1x256xf32> to vector<8x256xf32>
    %69 = arith.addf %66, %68 : vector<8x256xf32>
    %cst_20 = arith.constant 0.000000e+00 : f32
    %70 = vector.broadcast %cst_20 : f32 to vector<8x256xf32>
    %71 = arith.maximumf %69, %70 : vector<8x256xf32>
    %c0_21 = arith.constant 0 : index
    %c0_22 = arith.constant 0 : index
    %72 = vector.load %arg7[%c0_21, %c0_22] : memref<256x128xf32, #tpu.memory_space<vmem>>, vector<256x128xf32>
    %cst_23 = arith.constant dense<0.000000e+00> : vector<8x128xf32>
    %73 = tpu.matmul %71, %72, %cst_23 {dimension_numbers = #tpu.dot_dimension_numbers<[1], [0], [0], [1], [0, 0, 1, 1], [], []>} : vector<8x256xf32>, vector<256x128xf32>, vector<8x128xf32> -> vector<8x128xf32>
    %c0_24 = arith.constant 0 : index
    %c0_25 = arith.constant 0 : index
    %74 = vector.load %arg8[%c0_24, %c0_25] : memref<1x128xf32, #tpu.memory_space<vmem>>, vector<1x128xf32>
    %75 = vector.broadcast %74 : vector<1x128xf32> to vector<8x128xf32>
    %76 = arith.addf %73, %75 : vector<8x128xf32>
    %c0_26 = arith.constant 0 : index
    %c0_27 = arith.constant 0 : index
    %77 = vector.load %arg9[%c0_26, %c0_27] : memref<8x128xf32, #tpu.memory_space<vmem>>, vector<8x128xf32>
    tpu.vector_store %arg9[%c0_26, %c0_27], %76 {strides = array<i32>} : memref<8x128xf32, #tpu.memory_space<vmem>>, vector<8x128xf32>,
    return
  }
  func.func @transform_0(%arg0: i32) -> (i32, i32) {
    %c0_i32 = arith.constant 0 : i32
    %c0_i32_0 = arith.constant 0 : i32
    return %arg0, %c0_i32 : i32, i32
  }
  func.func @transform_1(%arg0: i32) -> (i32, i32) {
    %c0_i32 = arith.constant 0 : i32
    %c0_i32_0 = arith.constant 0 : i32
    %c0_i32_1 = arith.constant 0 : i32
    return %c0_i32, %c0_i32_0 : i32, i32
  }
  func.func @transform_2(%arg0: i32) -> (i32, i32) {
    %c0_i32 = arith.constant 0 : i32
    %c0_i32_0 = arith.constant 0 : i32
    %c0_i32_1 = arith.constant 0 : i32
    return %c0_i32, %c0_i32_0 : i32, i32
  }
  func.func @transform_3(%arg0: i32) -> (i32, i32) {
    %c0_i32 = arith.constant 0 : i32
    %c0_i32_0 = arith.constant 0 : i32
    %c0_i32_1 = arith.constant 0 : i32
    return %c0_i32, %c0_i32_0 : i32, i32
  }
  func.func @transform_4(%arg0: i32) -> (i32, i32) {
    %c0_i32 = arith.constant 0 : i32
    %c0_i32_0 = arith.constant 0 : i32
    %c0_i32_1 = arith.constant 0 : i32
    return %c0_i32, %c0_i32_0 : i32, i32
  }
  func.func @transform_5(%arg0: i32) -> (i32, i32) {
    %c0_i32 = arith.constant 0 : i32
    %c0_i32_0 = arith.constant 0 : i32
    %c0_i32_1 = arith.constant 0 : i32
    return %c0_i32, %c0_i32_0 : i32, i32
  }
  func.func @transform_6(%arg0: i32) -> (i32, i32) {
    %c0_i32 = arith.constant 0 : i32
    %c0_i32_0 = arith.constant 0 : i32
    %c0_i32_1 = arith.constant 0 : i32
    return %c0_i32, %c0_i32_0 : i32, i32
  }
  func.func @transform_7(%arg0: i32) -> (i32, i32) {
    %c0_i32 = arith.constant 0 : i32
    %c0_i32_0 = arith.constant 0 : i32
    %c0_i32_1 = arith.constant 0 : i32
    return %c0_i32, %c0_i32_0 : i32, i32
  }
  func.func @transform_8(%arg0: i32) -> (i32, i32) {
    %c0_i32 = arith.constant 0 : i32
    %c0_i32_0 = arith.constant 0 : i32
    return %arg0, %c0_i32 : i32, i32
  }
}

</mosaic_0001>

<bundles_post_ra>
// kernel: two_embedding_quat_residual_forward.1
= control target key start
LH: loop header
LB: loop body
LE: loop exit
PB: predicated region body
PF: predicated region fallthrough
CT: control target
= control target key end

     0   :  { %13 = vsyncpa [#allocation3], 0  ;;  %s8599_s0 = inlined_call_operand.vmem [shape: f32[8,128], index: 0, kind: input, shape index: {}]   ;;  %s8600_s1 = inlined_call_operand.hbm [shape: bf16[128,3072], index: 1, kind: input, shape index: {}]   ;;  %s8601_s2 = inlined_call_operand.hbm [shape: f32[1,3072], index: 2, kind: input, shape index: {}]   ;;  %s8602_s3 = inlined_call_operand.hbm [shape: bf16[1024,1024], index: 3, kind: input, shape index: {}]   ;;  %s8603_s4 = inlined_call_operand.hbm [shape: bf16[1024,256], index: 4, kind: input, shape index: {}]   ;;  %s8604_s5 = inlined_call_operand.hbm [shape: f32[1,256], index: 5, kind: input, shape index: {}]   ;;  %s8605_s6 = inlined_call_operand.hbm [shape: f32[256,128], index: 6, kind: input, shape index: {}]   ;;  %s8606_s7 = inlined_call_operand.hbm [shape: f32[1,128], index: 7, kind: input, shape index: {}]   ;;  %s8607_s8 = inlined_call_operand.hbm [shape: f32[8,128], index: 8, kind: output, shape index: {}]  }
   0x1   :  { %14 = vsyncpa [#allocation6], 0 }
   0x2   :  { %15 = vsyncpa [#allocation9], 0 }
   0x3   :  { %16 = vsyncpa [#allocation12], 0 }
   0x4   :  { %17 = vsyncpa [#allocation4], 0  ;;  %s8178_s27 = smov [#allocation5]   ;;  %s8179_s29 = smov [#allocation8]  }
   0x5   :  { %s38_s28 = sshll.u32 %s8178_s27, 4  ;;  %s59_s30 = sshll.u32 %s8179_s29, 4  ;;  %s39_s28 = int_to_ptr.vmem [resolvable:$true] %s38_s28  ;;  %s8238_s30 = int_to_ptr.vmem [resolvable:$true] %s59_s30 }
   0x6   :  { %s7992_s11 = scalar_lea.hbm %s8601_s2, 384 }
   0x7   :  { %p7993_p0 = scmp.ne.s32.totalorder %s8601_s2, %s7992_s11  ;;  %p7996_p1 = scmp.lt.u32.totalorder %s7992_s11, %s8601_s2 }
   0x9   :  { %p7998_p2 = pnand %p7996_p1, %p7993_p0 }
   0xb   :  { %8001 = shalt.err (!%p7998_p2)
}
   0xc   :  { %s8002_s16 = scalar_lea.vmem %s39_s28, 384  ;;  %p8007_p4 = scmp.lt.s32.totalorder %s39_s28, %s39_s28 }
   0xd   :  { %p8003_p3 = scmp.ne.s32.totalorder %s39_s28, %s8002_s16  ;;  %p8008_p5 = scmp.lt.s32.totalorder %s8002_s16, %s8002_s16 }
   0xf   :  { %p8009_p6 = por %p8008_p5, %p8007_p4 }
  0x11   :  { %p8010_p7 = pnand %p8009_p6, %p8003_p3 }
  0x13   :  { %8013 = shalt.err (!%p8010_p7)
}
  0x14   :  { %41 = dma.hbm_to_vmem [thread:$0]  %s8601_s2, 384, %s39_s28, [#allocation6]  }
  0x15   :  { %s8014_s21 = scalar_lea.hbm %s8603_s4, 16384 }
  0x16   :  { %p8015_p8 = scmp.ne.s32.totalorder %s8603_s4, %s8014_s21  ;;  %p8018_p9 = scmp.lt.u32.totalorder %s8014_s21, %s8603_s4 }
  0x18   :  { %p8020_p10 = pnand %p8018_p9, %p8015_p8 }
  0x1a   :  { %8023 = shalt.err (!%p8020_p10)
}
  0x1b   :  { %s8024_s26 = scalar_lea.vmem %s8238_s30, 16384  ;;  %p8029_p12 = scmp.lt.s32.totalorder %s8238_s30, %s8238_s30 }
  0x1c   :  { %p8025_p11 = scmp.ne.s32.totalorder %s8238_s30, %s8024_s26  ;;  %p8030_p13 = scmp.lt.s32.totalorder %s8024_s26, %s8024_s26 }
  0x1e   :  { %p8031_p0 = por %p8030_p13, %p8029_p12 }
  0x20   :  { %p8032_p1 = pnand %p8031_p0, %p8025_p11 }
  0x22   :  { %8035 = shalt.err (!%p8032_p1)
}
  0x23   :  { %s8180_s2 = smov 128   ;;  %s8181_s27 = smov 8  }
  0x24   :  { %65 = dma.hbm_to_vmem [thread:$0]  %s8603_s4, 16384, %s8238_s30, [#allocation9], %s8180_s2, %s8180_s2, %s8181_s27  }
  0x25   :  { %s8182_s9 = smov [#allocation11]   ;;  %s8183_s11 = smov [#allocation2]  }
  0x26   :  { %s81_s10 = sshll.u32 %s8182_s9, 4  ;;  %s25_s12 = sshll.u32 %s8183_s11, 4  ;;  %s82_s10 = int_to_ptr.vmem [resolvable:$true] %s81_s10  ;;  %s8269_s12 = int_to_ptr.vmem [resolvable:$true] %s25_s12 }
  0x27   :  { %s8036_s15 = scalar_lea.hbm %s8605_s6, 4096 }
  0x28   :  { %p8037_p2 = scmp.ne.s32.totalorder %s8605_s6, %s8036_s15  ;;  %p8040_p3 = scmp.lt.u32.totalorder %s8036_s15, %s8605_s6 }
  0x2a   :  { %p8042_p4 = pnand %p8040_p3, %p8037_p2 }
  0x2c   :  { %8045 = shalt.err (!%p8042_p4)
}
  0x2d   :  { %s8046_s4 = scalar_lea.vmem %s82_s10, 4096  ;;  %p8051_p6 = scmp.lt.s32.totalorder %s82_s10, %s82_s10 }
  0x2e   :  { %p8047_p5 = scmp.ne.s32.totalorder %s82_s10, %s8046_s4  ;;  %p8052_p7 = scmp.lt.s32.totalorder %s8046_s4, %s8046_s4 }
  0x30   :  { %p8053_p8 = por %p8052_p7, %p8051_p6 }
  0x32   :  { %p8054_p9 = pnand %p8053_p8, %p8047_p5 }
  0x34   :  { %8057 = shalt.err (!%p8054_p9)
}
  0x35   :  { %87 = dma.hbm_to_vmem [thread:$0]  %s8605_s6, 4096, %s82_s10, [#allocation12], %s8180_s2, %s8180_s2, %s8181_s27  }
  0x36   :  { %s8058_s23 = scalar_lea.hbm %s8600_s1, 24576 }
  0x37   :  { %p8059_p10 = scmp.ne.s32.totalorder %s8600_s1, %s8058_s23  ;;  %p8062_p11 = scmp.lt.u32.totalorder %s8058_s23, %s8600_s1 }
  0x39   :  { %p8064_p12 = pnand %p8062_p11, %p8059_p10 }
  0x3b   :  { %8067 = shalt.err (!%p8064_p12)
}
  0x3c   :  { %s8068_s29 = scalar_lea.vmem %s8269_s12, 24576  ;;  %p8073_p0 = scmp.lt.s32.totalorder %s8269_s12, %s8269_s12 }
  0x3d   :  { %p8069_p13 = scmp.ne.s32.totalorder %s8269_s12, %s8068_s29  ;;  %p8074_p1 = scmp.lt.s32.totalorder %s8068_s29, %s8068_s29 }
  0x3f   :  { %p8075_p2 = por %p8074_p1, %p8073_p0 }
  0x41   :  { %p8076_p3 = pnand %p8075_p2, %p8069_p13 }
  0x43   :  { %8079 = shalt.err (!%p8076_p3)
}
  0x44   :  { %s8184_s6 = smov 1536   ;;  %s8185_s2 = smov 96  }
  0x45   :  { %31 = dma.hbm_to_vmem [thread:$0]  %s8600_s1, 24576, %s8269_s12, [#allocation3], %s8184_s6, %s8184_s6, %s8185_s2  }
  0x46   :  { %s8186_s10 = smov [#allocation7]   ;;  %s8080_s15 = scalar_lea.hbm %s8602_s3, 65536 }
  0x47   :  { %s47_s11 = sshll.u32 %s8186_s10, 4  ;;  %p8081_p4 = scmp.ne.s32.totalorder %s8602_s3, %s8080_s15  ;;  %s48_s11 = int_to_ptr.vmem [resolvable:$true] %s47_s11 }
  0x48   :  { %p8084_p5 = scmp.lt.u32.totalorder %s8080_s15, %s8602_s3 }
  0x4a   :  { %p8086_p6 = pnand %p8084_p5, %p8081_p4 }
  0x4c   :  { %8089 = shalt.err (!%p8086_p6)
}
  0x4d   :  { %s8090_s4 = scalar_lea.vmem %s48_s11, 65536  ;;  %p8095_p8 = scmp.lt.s32.totalorder %s48_s11, %s48_s11 }
  0x4e   :  { %p8091_p7 = scmp.ne.s32.totalorder %s48_s11, %s8090_s4  ;;  %p8096_p9 = scmp.lt.s32.totalorder %s8090_s4, %s8090_s4 }
  0x50   :  { %p8097_p10 = por %p8096_p9, %p8095_p8 }
  0x52   :  { %p8098_p11 = pnand %p8097_p10, %p8091_p7 }
  0x54   :  { %8101 = shalt.err (!%p8098_p11)
}
  0x55   :  { %s8187_s1 = smov 512   ;;  %s8188_s12 = smov 32  }
  0x56   :  { %53 = dma.hbm_to_vmem [thread:$0]  %s8602_s3, 65536, %s48_s11, [#allocation6], %s8187_s1, %s8187_s1, %s8188_s12  }
  0x57   :  { %s8189_s21 = smov [#allocation10]   ;;  %s8190_s23 = smov [#allocation13]  }
  0x58   :  { %s72_s22 = sshll.u32 %s8189_s21, 4  ;;  %s94_s24 = sshll.u32 %s8190_s23, 4  ;;  %s73_s22 = int_to_ptr.vmem [resolvable:$true] %s72_s22  ;;  %s95_s24 = int_to_ptr.vmem [resolvable:$true] %s94_s24 }
  0x59   :  { %s8102_s28 = scalar_lea.hbm %s8604_s5, 32 }
  0x5a   :  { %p8103_p12 = scmp.ne.s32.totalorder %s8604_s5, %s8102_s28  ;;  %p8106_p13 = scmp.lt.u32.totalorder %s8102_s28, %s8604_s5 }
  0x5c   :  { %p8108_p0 = pnand %p8106_p13, %p8103_p12 }
  0x5e   :  { %8111 = shalt.err (!%p8108_p0)
}
  0x5f   :  { %s8112_s3 = scalar_lea.vmem %s73_s22, 32  ;;  %p8117_p2 = scmp.lt.s32.totalorder %s73_s22, %s73_s22 }
  0x60   :  { %p8113_p1 = scmp.ne.s32.totalorder %s73_s22, %s8112_s3  ;;  %p8118_p3 = scmp.lt.s32.totalorder %s8112_s3, %s8112_s3 }
  0x62   :  { %p8119_p4 = por %p8118_p3, %p8117_p2 }
  0x64   :  { %p8120_p5 = pnand %p8119_p4, %p8113_p1 }
  0x66   :  { %8123 = shalt.err (!%p8120_p5)
}
  0x67   :  { %75 = dma.hbm_to_vmem [thread:$0]  %s8604_s5, 32, %s73_s22, [#allocation9]  }
  0x68   :  { %s8124_s14 = scalar_lea.hbm %s8606_s7, 16 }
  0x69   :  { %p8125_p6 = scmp.ne.s32.totalorder %s8606_s7, %s8124_s14  ;;  %p8128_p7 = scmp.lt.u32.totalorder %s8124_s14, %s8606_s7 }
  0x6b   :  { %p8130_p8 = pnand %p8128_p7, %p8125_p6 }
  0x6d   :  { %8133 = shalt.err (!%p8130_p8)
}
  0x6e   :  { %s8134_s19 = scalar_lea.vmem %s95_s24, 16  ;;  %s8138_s4 = scalar_lea.vmem %s95_s24, 32 }
  0x6f   :  { %p8135_p9 = scmp.ne.s32.totalorder %s95_s24, %s8134_s19  ;;  %p8139_p10 = scmp.lt.s32.totalorder %s95_s24, %s95_s24 }
  0x70   :  { %p8140_p11 = scmp.lt.s32.totalorder %s8138_s4, %s8134_s19 }
  0x72   :  { %p8141_p12 = por %p8140_p11, %p8139_p10 }
  0x74   :  { %p8142_p13 = pnand %p8141_p12, %p8135_p9 }
  0x76   :  { %8145 = shalt.err (!%p8142_p13)
}
  0x77   :  { %97 = dma.hbm_to_vmem [thread:$0]  %s8606_s7, 16, %s95_s24, [#allocation12]  }
  0x78   :  { %8168 = dma.done.wait [#allocation3], 24576  }
  0x79   :  { %8169 = vsyncadd [#allocation3], 4294942720 }
  0x7a   :  { %8170 = dma.done.wait [#allocation6], 65920  }
  0x7b   :  { %8171 = vsyncadd [#allocation6], 4294901376 }
  0x7c   :  { %8172 = dma.done.wait [#allocation9], 16416  }
  0x7d   :  { %8173 = vsyncadd [#allocation9], 4294950880 }
  0x7e   :  { %8174 = dma.done.wait [#allocation12], 4112  }
  0x7f   :  { %8175 = vsyncadd [#allocation12], 4294963184  ;;  %v8191_v0 = vmov 0   ;;  %v122_v1 = vld [vmem:[#allocation2] sm:$0xff]  ;;  %v123_v3 = vld [vmem:[#allocation2 + $0x8] sm:$0xff] }
  0x80   :  { %1432 = vmatprep.mubr.bf16.mxu0 %v8191_v0  ;;  %1473 = vmatprep.mubr.bf16.mxu1 %v8191_v0  ;;  %v134_v2 = vld [vmem:[#allocation2 + $0x60] sm:$0xff]  ;;  %v135_v5 = vld [vmem:[#allocation2 + $0x68] sm:$0xff]  ;;  %v124_v63 = vld [vmem:[#allocation2 + $0x10] sm:$0xff] }
  0x81   :  { %v6807_v4 = vcombine.high %v122_v1, %v134_v2  ;;  %v6806_v6 = vcombine.low %v122_v1, %v134_v2  ;;  %v146_v7 = vld [vmem:[#allocation2 + $0xc0] sm:$0xff]  ;;  %v6809_v9 = vcombine.high %v123_v3, %v135_v5  ;;  %v6808_v10 = vcombine.low %v123_v3, %v135_v5  ;;  %v147_v12 = vld [vmem:[#allocation2 + $0xc8] sm:$0xff]  ;;  %v136_v1 = vld [vmem:[#allocation2 + $0x70] sm:$0xff] }
  0x82   :  { %v158_v8 = vld [vmem:[#allocation2 + $0x120] sm:$0xff]  ;;  %v159_v13 = vld [vmem:[#allocation2 + $0x128] sm:$0xff]  ;;  %v125_v2 = vld [vmem:[#allocation2 + $0x18] sm:$0xff] }
  0x83   :  { %v6831_v11 = vcombine.high %v146_v7, %v158_v8  ;;  %v170_v14 = vld [vmem:[#allocation2 + $0x180] sm:$0xff]  ;;  %1400 = vmatprep.subr.bf16.mxu0 %v6807_v4  ;;  %v6833_v15 = vcombine.high %v147_v12, %v159_v13  ;;  %v171_v17 = vld [vmem:[#allocation2 + $0x188] sm:$0xff]  ;;  %1441 = vmatprep.subr.bf16.mxu1 %v6809_v9  ;;  %v6830_v19 = vcombine.low %v146_v7, %v158_v8  ;;  %v137_v3 = vld [vmem:[#allocation2 + $0x78] sm:$0xff] }
  0x84   :  { %v182_v16 = vld [vmem:[#allocation2 + $0x1e0] sm:$0xff]  ;;  %v183_v18 = vld [vmem:[#allocation2 + $0x1e8] sm:$0xff]  ;;  %1401 = vmatpush1.bf16.msra.mxu0 %v6806_v6  ;;  %1442 = vmatpush1.bf16.msra.mxu1 %v6808_v10  ;;  %v6832_v20 = vcombine.low %v147_v12, %v159_v13  ;;  %v6811_v7 = vcombine.high %v124_v63, %v136_v1  ;;  %v6813_v8 = vcombine.high %v125_v2, %v137_v3  ;;  %v148_v9 = vld [vmem:[#allocation2 + $0xd0] sm:$0xff] }
  0x85   :  { %1402 = vmatprep.subr.bf16.mxu0 %v6831_v11  ;;  %v6855_v21 = vcombine.high %v170_v14, %v182_v16  ;;  %1443 = vmatprep.subr.bf16.mxu1 %v6833_v15  ;;  %v6857_v22 = vcombine.high %v171_v17, %v183_v18  ;;  %v194_v23 = vld [vmem:[#allocation2 + $0x240] sm:$0xff]  ;;  %v195_v25 = vld [vmem:[#allocation2 + $0x248] sm:$0xff]  ;;  %v6854_v27 = vcombine.low %v170_v14, %v182_v16  ;;  %v160_v10 = vld [vmem:[#allocation2 + $0x130] sm:$0xff] }
  0x86   :  { %v206_v24 = vld [vmem:[#allocation2 + $0x2a0] sm:$0xff]  ;;  %v207_v26 = vld [vmem:[#allocation2 + $0x2a8] sm:$0xff]  ;;  %v6856_v28 = vcombine.low %v171_v17, %v183_v18  ;;  %v149_v12 = vld [vmem:[#allocation2 + $0xd8] sm:$0xff]  ;;  %v6810_v14 = vcombine.low %v124_v63, %v136_v1  ;;  %v6812_v15 = vcombine.low %v125_v2, %v137_v3  ;;  %v6835_v16 = vcombine.high %v148_v9, %v160_v10 }
  0x87   :  { %v6879_v29 = vcombine.high %v194_v23, %v206_v24  ;;  %v6881_v30 = vcombine.high %v195_v25, %v207_v26  ;;  %v218_v31 = vld [vmem:[#allocation2 + $0x300] sm:$0xff]  ;;  %v219_v33 = vld [vmem:[#allocation2 + $0x308] sm:$0xff]  ;;  %v6878_v35 = vcombine.low %v194_v23, %v206_v24  ;;  %v6880_v36 = vcombine.low %v195_v25, %v207_v26  ;;  %v161_v13 = vld [vmem:[#allocation2 + $0x138] sm:$0xff] }
  0x88   :  { %1403 = vmatpush1.bf16.msra.mxu0 %v6830_v19  ;;  %1444 = vmatpush1.bf16.msra.mxu1 %v6832_v20  ;;  %v230_v32 = vld [vmem:[#allocation2 + $0x360] sm:$0xff]  ;;  %v231_v34 = vld [vmem:[#allocation2 + $0x368] sm:$0xff]  ;;  %v6837_v17 = vcombine.high %v149_v12, %v161_v13  ;;  %v172_v18 = vld [vmem:[#allocation2 + $0x190] sm:$0xff]  ;;  %v6836_v23 = vcombine.low %v149_v12, %v161_v13 }
  0x89   :  { %1404 = vmatprep.subr.bf16.mxu0 %v6855_v21  ;;  %1445 = vmatprep.subr.bf16.mxu1 %v6857_v22  ;;  %v6903_v37 = vcombine.high %v218_v31, %v230_v32  ;;  %v6905_v38 = vcombine.high %v219_v33, %v231_v34  ;;  %v242_v39 = vld [vmem:[#allocation2 + $0x3c0] sm:$0xff]  ;;  %v243_v41 = vld [vmem:[#allocation2 + $0x3c8] sm:$0xff]  ;;  %v6902_v43 = vcombine.low %v218_v31, %v230_v32  ;;  %v184_v19 = vld [vmem:[#allocation2 + $0x1f0] sm:$0xff] }
  0x8a   :  { %v254_v40 = vld [vmem:[#allocation2 + $0x420] sm:$0xff]  ;;  %v255_v42 = vld [vmem:[#allocation2 + $0x428] sm:$0xff]  ;;  %v6904_v44 = vcombine.low %v219_v33, %v231_v34  ;;  %v173_v20 = vld [vmem:[#allocation2 + $0x198] sm:$0xff]  ;;  %v6834_v22 = vcombine.low %v148_v9, %v160_v10  ;;  %v6859_v24 = vcombine.high %v172_v18, %v184_v19 }
  0x8b   :  { %v6927_v45 = vcombine.high %v242_v39, %v254_v40  ;;  %v6929_v46 = vcombine.high %v243_v41, %v255_v42  ;;  %v266_v47 = vld [vmem:[#allocation2 + $0x480] sm:$0xff]  ;;  %v267_v49 = vld [vmem:[#allocation2 + $0x488] sm:$0xff]  ;;  %v6926_v51 = vcombine.low %v242_v39, %v254_v40  ;;  %v6928_v52 = vcombine.low %v243_v41, %v255_v42  ;;  %v185_v21 = vld [vmem:[#allocation2 + $0x1f8] sm:$0xff] }
  0x8c   :  { %1405 = vmatpush1.bf16.msra.mxu0 %v6854_v27  ;;  %1446 = vmatpush1.bf16.msra.mxu1 %v6856_v28  ;;  %v278_v48 = vld [vmem:[#allocation2 + $0x4e0] sm:$0xff]  ;;  %v279_v50 = vld [vmem:[#allocation2 + $0x4e8] sm:$0xff]  ;;  %v6861_v25 = vcombine.high %v173_v20, %v185_v21  ;;  %v196_v26 = vld [vmem:[#allocation2 + $0x250] sm:$0xff]  ;;  %v6860_v31 = vcombine.low %v173_v20, %v185_v21 }
  0x8d   :  { %1406 = vmatprep.subr.bf16.mxu0 %v6879_v29  ;;  %1447 = vmatprep.subr.bf16.mxu1 %v6881_v30  ;;  %v6951_v53 = vcombine.high %v266_v47, %v278_v48  ;;  %v6953_v54 = vcombine.high %v267_v49, %v279_v50  ;;  %v290_v55 = vld [vmem:[#allocation2 + $0x540] sm:$0xff]  ;;  %v291_v57 = vld [vmem:[#allocation2 + $0x548] sm:$0xff]  ;;  %v6950_v59 = vcombine.low %v266_v47, %v278_v48  ;;  %v208_v27 = vld [vmem:[#allocation2 + $0x2b0] sm:$0xff] }
  0x8e   :  { %v302_v56 = vld [vmem:[#allocation2 + $0x5a0] sm:$0xff]  ;;  %v303_v58 = vld [vmem:[#allocation2 + $0x5a8] sm:$0xff]  ;;  %v6952_v60 = vcombine.low %v267_v49, %v279_v50  ;;  %v197_v28 = vld [vmem:[#allocation2 + $0x258] sm:$0xff]  ;;  %v6858_v30 = vcombine.low %v172_v18, %v184_v19  ;;  %v6883_v32 = vcombine.high %v196_v26, %v208_v27 }
  0x8f   :  { %v6975_v61 = vcombine.high %v290_v55, %v302_v56  ;;  %v6977_v62 = vcombine.high %v291_v57, %v303_v58  ;;  %v6974_v4 = vcombine.low %v290_v55, %v302_v56  ;;  %v120_v5 = vld [vmem:[%s8599_s0] sm:$0xff]  ;;  %v6976_v6 = vcombine.low %v291_v57, %v303_v58  ;;  %v209_v29 = vld [vmem:[#allocation2 + $0x2b8] sm:$0xff]  ;;  %v220_v34 = vld [vmem:[#allocation2 + $0x310] sm:$0xff]  ;;  %s8192_s0 = smov [#allocation14]  }
  0x90   :  { %1407 = vmatpush1.bf16.msra.mxu0 %v6878_v35  ;;  %1448 = vmatpush1.bf16.msra.mxu1 %v6880_v36  ;;  %v8341_v11 = vpack.c.bf16 %v120_v5, %v120_v5  ;;  %v6885_v33 = vcombine.high %v197_v28, %v209_v29  ;;  %v232_v35 = vld [vmem:[#allocation2 + $0x370] sm:$0xff]  ;;  %v221_v36 = vld [vmem:[#allocation2 + $0x318] sm:$0xff]  ;;  %v6884_v39 = vcombine.low %v197_v28, %v209_v29  ;;  %v126_v63 = vld [vmem:[#allocation2 + $0x20] sm:$0xff]  ;;  %s6794_s30 = sshll.u32 %s8192_s0, 4  ;;  %s6795_s30 = int_to_ptr.vmem [resolvable:$true] %s6794_s30 }
  0x91   :  { %1408 = vmatprep.subr.bf16.mxu0 %v6903_v37  ;;  %1449 = vmatprep.subr.bf16.mxu1 %v6905_v38  ;;  %v233_v37 = vld [vmem:[#allocation2 + $0x378] sm:$0xff]  ;;  %v6882_v38 = vcombine.low %v196_v26, %v208_v27  ;;  %v6907_v40 = vcombine.high %v220_v34, %v232_v35  ;;  %v244_v42 = vld [vmem:[#allocation2 + $0x3d0] sm:$0xff]  ;;  %v138_v1 = vld [vmem:[#allocation2 + $0x80] sm:$0xff]  ;;  %s8146_s20 = scalar_lea.vmem %s6795_s30, 128  ;;  %p8151_p1 = scmp.lt.s32.totalorder %s6795_s30, %s6795_s30 }
  0x92   :  { %v6909_v41 = vcombine.high %v221_v36, %v233_v37  ;;  %v268_v47 = vld [vmem:[#allocation2 + $0x490] sm:$0xff]  ;;  %v6908_v48 = vcombine.low %v221_v36, %v233_v37  ;;  %v139_v5 = vld [vmem:[#allocation2 + $0x88] sm:$0xff]  ;;  %v162_v9 = vld [vmem:[#allocation2 + $0x140] sm:$0xff]  ;;  %v6815_v12 = vcombine.high %v126_v63, %v138_v1  ;;  %p8147_p0 = scmp.ne.s32.totalorder %s6795_s30, %s8146_s20  ;;  %p8152_p2 = scmp.lt.s32.totalorder %s8146_s20, %s8146_s20 }
  0x93   :  { %v280_v50 = vld [vmem:[#allocation2 + $0x4f0] sm:$0xff]  ;;  %v151_v13 = vld [vmem:[#allocation2 + $0xe8] sm:$0xff]  ;;  %v186_v18 = vld [vmem:[#allocation2 + $0x200] sm:$0xff] }
  0x94   :  { %1409 = vmatpush1.bf16.msra.mxu0 %v6902_v43  ;;  %1450 = vmatpush1.bf16.msra.mxu1 %v6904_v44  ;;  %v256_v43 = vld [vmem:[#allocation2 + $0x430] sm:$0xff]  ;;  %v245_v44 = vld [vmem:[#allocation2 + $0x3d8] sm:$0xff]  ;;  %v6955_v58 = vcombine.high %v268_v47, %v280_v50  ;;  %v175_v21 = vld [vmem:[#allocation2 + $0x1a8] sm:$0xff]  ;;  %p8153_p3 = por %p8152_p2, %p8151_p1 }
  0x95   :  { %1410 = vmatprep.subr.bf16.mxu0 %v6927_v45  ;;  %1451 = vmatprep.subr.bf16.mxu1 %v6929_v46  ;;  %v257_v45 = vld [vmem:[#allocation2 + $0x438] sm:$0xff]  ;;  %v6906_v46 = vcombine.low %v220_v34, %v232_v35  ;;  %v6931_v49 = vcombine.high %v244_v42, %v256_v43  ;;  %v292_v55 = vld [vmem:[#allocation2 + $0x550] sm:$0xff]  ;;  %v210_v26 = vld [vmem:[#allocation2 + $0x2c0] sm:$0xff] }
  0x96   :  { %v304_v56 = vld [vmem:[#allocation2 + $0x5b0] sm:$0xff]  ;;  %v6932_v57 = vcombine.low %v245_v44, %v257_v45  ;;  %v199_v29 = vld [vmem:[#allocation2 + $0x268] sm:$0xff]  ;;  %v234_v34 = vld [vmem:[#allocation2 + $0x380] sm:$0xff]  ;;  %p8154_p4 = pnand %p8153_p3, %p8147_p0 }
  0x97   :  { %v6979_v3 = vcombine.high %v292_v55, %v304_v56  ;;  %v223_v37 = vld [vmem:[#allocation2 + $0x328] sm:$0xff] }
  0x98   :  { %1411 = vmatpush1.bf16.msra.mxu0 %v6926_v51  ;;  %1452 = vmatpush1.bf16.msra.mxu1 %v6928_v52  ;;  %v269_v51 = vld [vmem:[#allocation2 + $0x498] sm:$0xff] }
  0x99   :  { %1412 = vmatprep.subr.bf16.mxu0 %v6951_v53  ;;  %1453 = vmatprep.subr.bf16.mxu1 %v6953_v54  ;;  %v281_v52 = vld [vmem:[#allocation2 + $0x4f8] sm:$0xff]  ;;  %v6933_v53 = vcombine.high %v245_v44, %v257_v45  ;;  %v6930_v54 = vcombine.low %v244_v42, %v256_v43  ;;  %v258_v42 = vld [vmem:[#allocation2 + $0x440] sm:$0xff]  ;;  %v247_v45 = vld [vmem:[#allocation2 + $0x3e8] sm:$0xff] }
  0x9a   :  { %v6956_v2 = vcombine.low %v269_v51, %v281_v52 }
  0x9c   :  { %1413 = vmatpush1.bf16.msra.mxu0 %v6950_v59  ;;  %1454 = vmatpush1.bf16.msra.mxu1 %v6952_v60  ;;  %v293_v59 = vld [vmem:[#allocation2 + $0x558] sm:$0xff] }
  0x9d   :  { %1414 = vmatprep.subr.bf16.mxu0 %v6975_v61  ;;  %1455 = vmatprep.subr.bf16.mxu1 %v6977_v62  ;;  %v305_v60 = vld [vmem:[#allocation2 + $0x5b8] sm:$0xff]  ;;  %v6957_v61 = vcombine.high %v269_v51, %v281_v52  ;;  %v6954_v62 = vcombine.low %v268_v47, %v280_v50  ;;  %v282_v50 = vld [vmem:[#allocation2 + $0x500] sm:$0xff] }
  0x9e   :  { %v6980_v10 = vcombine.low %v293_v59, %v305_v60 }
  0xa0   :  { %1415 = vmatpush1.bf16.msra.mxu0 %v6974_v4  ;;  %1456 = vmatpush1.bf16.msra.mxu1 %v6976_v6  ;;  %v127_v4 = vld [vmem:[#allocation2 + $0x28] sm:$0xff]  ;;  %v6981_v6 = vcombine.high %v293_v59, %v305_v60 }
  0xa1   :  { %1482 = vmatprep.subr.bf16.mxu0 %v6811_v7  ;;  %1523 = vmatprep.subr.bf16.mxu1 %v6813_v8  ;;  %v6978_v7 = vcombine.low %v292_v55, %v304_v56  ;;  %v150_v8 = vld [vmem:[#allocation2 + $0xe0] sm:$0xff]  ;;  %v6816_v19 = vcombine.low %v127_v4, %v139_v5 }
  0xa2   :  { %v6839_v20 = vcombine.high %v150_v8, %v162_v9 }
  0xa3   :  { %1433 = vmatmul.mubr.bf16.vlgmr.msra.gmra.mrb[0].mxu0 %v8341_v11  ;;  %1474 = vmatmul.mubr.bf16.vlgmr.msra.gmra.mrb[0].mxu1 %v8341_v11 }
  0xa4   :  { %1483 = vmatpush1.bf16.msra.mxu0 %v6810_v14  ;;  %1524 = vmatpush1.bf16.msra.mxu1 %v6812_v15  ;;  %v163_v14 = vld [vmem:[#allocation2 + $0x148] sm:$0xff]  ;;  %v6817_v15 = vcombine.high %v127_v4, %v139_v5 }
  0xa5   :  { %1484 = vmatprep.subr.bf16.mxu0 %v6835_v16  ;;  %1525 = vmatprep.subr.bf16.mxu1 %v6837_v17  ;;  %v6814_v16 = vcombine.low %v126_v63, %v138_v1  ;;  %v174_v17 = vld [vmem:[#allocation2 + $0x1a0] sm:$0xff]  ;;  %v6840_v27 = vcombine.low %v151_v13, %v163_v14 }
  0xa6   :  { %1514 = vmatprep.mubr.bf16.mxu0 %v8191_v0  ;;  %1555 = vmatprep.mubr.bf16.mxu1 %v8191_v0  ;;  %v6863_v28 = vcombine.high %v174_v17, %v186_v18 }
  0xa8   :  { %1485 = vmatpush1.bf16.msra.mxu0 %v6834_v22  ;;  %1526 = vmatpush1.bf16.msra.mxu1 %v6836_v23  ;;  %v187_v22 = vld [vmem:[#allocation2 + $0x208] sm:$0xff]  ;;  %v6841_v23 = vcombine.high %v151_v13, %v163_v14  ;;  %v152_v14 = vld [vmem:[#allocation2 + $0xf0] sm:$0xff] }
  0xa9   :  { %1486 = vmatprep.subr.bf16.mxu0 %v6859_v24  ;;  %1527 = vmatprep.subr.bf16.mxu1 %v6861_v25  ;;  %v6838_v24 = vcombine.low %v150_v8, %v162_v9  ;;  %v198_v25 = vld [vmem:[#allocation2 + $0x260] sm:$0xff]  ;;  %v6864_v35 = vcombine.low %v175_v21, %v187_v22 }
  0xaa   :  { %v6887_v36 = vcombine.high %v198_v25, %v210_v26 }
  0xac   :  { %1487 = vmatpush1.bf16.msra.mxu0 %v6858_v30  ;;  %1528 = vmatpush1.bf16.msra.mxu1 %v6860_v31  ;;  %v211_v30 = vld [vmem:[#allocation2 + $0x2c8] sm:$0xff]  ;;  %v6865_v31 = vcombine.high %v175_v21, %v187_v22  ;;  %v176_v22 = vld [vmem:[#allocation2 + $0x1b0] sm:$0xff] }
  0xad   :  { %1488 = vmatprep.subr.bf16.mxu0 %v6883_v32  ;;  %1529 = vmatprep.subr.bf16.mxu1 %v6885_v33  ;;  %v6862_v32 = vcombine.low %v174_v17, %v186_v18  ;;  %v222_v33 = vld [vmem:[#allocation2 + $0x320] sm:$0xff]  ;;  %v6888_v43 = vcombine.low %v199_v29, %v211_v30  ;;  %v165_v17 = vld [vmem:[#allocation2 + $0x158] sm:$0xff] }
  0xae   :  { %v6911_v44 = vcombine.high %v222_v33, %v234_v34 }
  0xb0   :  { %1489 = vmatpush1.bf16.msra.mxu0 %v6882_v38  ;;  %1530 = vmatpush1.bf16.msra.mxu1 %v6884_v39  ;;  %v235_v38 = vld [vmem:[#allocation2 + $0x388] sm:$0xff]  ;;  %v6889_v39 = vcombine.high %v199_v29, %v211_v30  ;;  %v200_v30 = vld [vmem:[#allocation2 + $0x270] sm:$0xff] }
  0xb1   :  { %1490 = vmatprep.subr.bf16.mxu0 %v6907_v40  ;;  %1531 = vmatprep.subr.bf16.mxu1 %v6909_v41  ;;  %v6886_v40 = vcombine.low %v198_v25, %v210_v26  ;;  %v246_v41 = vld [vmem:[#allocation2 + $0x3e0] sm:$0xff]  ;;  %v6913_v47 = vcombine.high %v223_v37, %v235_v38  ;;  %v6912_v51 = vcombine.low %v223_v37, %v235_v38  ;;  %v189_v25 = vld [vmem:[#allocation2 + $0x218] sm:$0xff]  ;;  %v224_v38 = vld [vmem:[#allocation2 + $0x330] sm:$0xff] }
  0xb2   :  { %v6935_v52 = vcombine.high %v246_v41, %v258_v42  ;;  %v6934_v56 = vcombine.low %v246_v41, %v258_v42  ;;  %v237_v41 = vld [vmem:[#allocation2 + $0x398] sm:$0xff] }
  0xb4   :  { %1491 = vmatpush1.bf16.msra.mxu0 %v6906_v46  ;;  %1532 = vmatpush1.bf16.msra.mxu1 %v6908_v48  ;;  %v259_v46 = vld [vmem:[#allocation2 + $0x448] sm:$0xff]  ;;  %v6910_v48 = vcombine.low %v222_v33, %v234_v34  ;;  %v213_v33 = vld [vmem:[#allocation2 + $0x2d8] sm:$0xff] }
  0xb5   :  { %1492 = vmatprep.subr.bf16.mxu0 %v6931_v49  ;;  %1533 = vmatprep.subr.bf16.mxu1 %v6933_v53  ;;  %v270_v49 = vld [vmem:[#allocation2 + $0x4a0] sm:$0xff]  ;;  %v271_v53 = vld [vmem:[#allocation2 + $0x4a8] sm:$0xff]  ;;  %v6937_v55 = vcombine.high %v247_v45, %v259_v46  ;;  %v6936_v59 = vcombine.low %v247_v45, %v259_v46  ;;  %v248_v46 = vld [vmem:[#allocation2 + $0x3f0] sm:$0xff] }
  0xb6   :  { %v6959_v60 = vcombine.high %v270_v49, %v282_v50  ;;  %v6958_v1 = vcombine.low %v270_v49, %v282_v50  ;;  %v261_v49 = vld [vmem:[#allocation2 + $0x458] sm:$0xff] }
  0xb8   :  { %1493 = vmatpush1.bf16.msra.mxu0 %v6930_v54  ;;  %1534 = vmatpush1.bf16.msra.mxu1 %v6932_v57  ;;  %v283_v54 = vld [vmem:[#allocation2 + $0x508] sm:$0xff]  ;;  %v294_v57 = vld [vmem:[#allocation2 + $0x560] sm:$0xff] }
  0xb9   :  { %1494 = vmatprep.subr.bf16.mxu0 %v6955_v58  ;;  %1535 = vmatprep.subr.bf16.mxu1 %v6957_v61  ;;  %v306_v58 = vld [vmem:[#allocation2 + $0x5c0] sm:$0xff]  ;;  %v295_v61 = vld [vmem:[#allocation2 + $0x568] sm:$0xff]  ;;  %v6961_v63 = vcombine.high %v271_v53, %v283_v54  ;;  %v6960_v4 = vcombine.low %v271_v53, %v283_v54  ;;  %v272_v54 = vld [vmem:[#allocation2 + $0x4b0] sm:$0xff] }
  0xba   :  { %v6983_v5 = vcombine.high %v294_v57, %v306_v58  ;;  %v6982_v9 = vcombine.low %v294_v57, %v306_v58  ;;  %v285_v57 = vld [vmem:[#allocation2 + $0x518] sm:$0xff] }
  0xbc   :  { %1495 = vmatpush1.bf16.msra.mxu0 %v6954_v62  ;;  %1536 = vmatpush1.bf16.msra.mxu1 %v6956_v2  ;;  %v307_v62 = vld [vmem:[#allocation2 + $0x5c8] sm:$0xff]  ;;  %v128_v2 = vld [vmem:[#allocation2 + $0x30] sm:$0xff] }
  0xbd   :  { %1496 = vmatprep.subr.bf16.mxu0 %v6979_v3  ;;  %1537 = vmatprep.subr.bf16.mxu1 %v6981_v6  ;;  %v140_v3 = vld [vmem:[#allocation2 + $0x90] sm:$0xff]  ;;  %v129_v6 = vld [vmem:[#allocation2 + $0x38] sm:$0xff]  ;;  %v6985_v8 = vcombine.high %v295_v61, %v307_v62 }
  0xbe   :  { %v6818_v18 = vcombine.low %v128_v2, %v140_v3 }
  0xc0   :  { %1497 = vmatpush1.bf16.msra.mxu0 %v6978_v7  ;;  %1538 = vmatpush1.bf16.msra.mxu1 %v6980_v10  ;;  %v141_v7 = vld [vmem:[#allocation2 + $0x98] sm:$0xff]  ;;  %v6984_v10 = vcombine.low %v295_v61, %v307_v62  ;;  %v296_v62 = vld [vmem:[#allocation2 + $0x570] sm:$0xff] }
  0xc1   :  { %1564 = vmatprep.subr.bf16.mxu0 %v6815_v12  ;;  %1605 = vmatprep.subr.bf16.mxu1 %v6817_v15  ;;  %v6819_v12 = vcombine.high %v128_v2, %v140_v3  ;;  %v6821_v13 = vcombine.high %v129_v6, %v141_v7  ;;  %v164_v15 = vld [vmem:[#allocation2 + $0x150] sm:$0xff]  ;;  %v309_v2 = vld [vmem:[#allocation2 + $0x5d8] sm:$0xff] }
  0xc2   :  { %v6842_v26 = vcombine.low %v152_v14, %v164_v15 }
  0xc3   :  { %1515 = vmatmul.mubr.bf16.vlgmr.msra.gmra.mrb[4].mxu0 %v8341_v11  ;;  %1556 = vmatmul.mubr.bf16.vlgmr.msra.gmra.mrb[4].mxu1 %v8341_v11 }
  0xc4   :  { %1565 = vmatpush1.bf16.msra.mxu0 %v6814_v16  ;;  %1606 = vmatpush1.bf16.msra.mxu1 %v6816_v19  ;;  %v153_v16 = vld [vmem:[#allocation2 + $0xf8] sm:$0xff]  ;;  %v6820_v19 = vcombine.low %v129_v6, %v141_v7  ;;  %v130_v7 = vld [vmem:[#allocation2 + $0x40] sm:$0xff] }
  0xc5   :  { %1566 = vmatprep.subr.bf16.mxu0 %v6839_v20  ;;  %1607 = vmatprep.subr.bf16.mxu1 %v6841_v23  ;;  %v6843_v20 = vcombine.high %v152_v14, %v164_v15  ;;  %v6845_v21 = vcombine.high %v153_v16, %v165_v17  ;;  %v188_v23 = vld [vmem:[#allocation2 + $0x210] sm:$0xff] }
  0xc6   :  { %1596 = vmatprep.mubr.bf16.mxu0 %v8191_v0  ;;  %1637 = vmatprep.mubr.bf16.mxu1 %v8191_v0  ;;  %v6866_v34 = vcombine.low %v176_v22, %v188_v23 }
  0xc8   :  { %1567 = vmatpush1.bf16.msra.mxu0 %v6838_v24  ;;  %1608 = vmatpush1.bf16.msra.mxu1 %v6840_v27  ;;  %v177_v24 = vld [vmem:[#allocation2 + $0x1b8] sm:$0xff]  ;;  %v6844_v27 = vcombine.low %v153_v16, %v165_v17  ;;  %v154_v16 = vld [vmem:[#allocation2 + $0x100] sm:$0xff] }
  0xc9   :  { %1568 = vmatprep.subr.bf16.mxu0 %v6863_v28  ;;  %1609 = vmatprep.subr.bf16.mxu1 %v6865_v31  ;;  %v6867_v28 = vcombine.high %v176_v22, %v188_v23  ;;  %v6869_v29 = vcombine.high %v177_v24, %v189_v25  ;;  %v212_v31 = vld [vmem:[#allocation2 + $0x2d0] sm:$0xff]  ;;  %v166_v17 = vld [vmem:[#allocation2 + $0x160] sm:$0xff] }
  0xca   :  { %v6890_v42 = vcombine.low %v200_v30, %v212_v31  ;;  %v6847_v22 = vcombine.high %v154_v16, %v166_v17 }
  0xcc   :  { %1569 = vmatpush1.bf16.msra.mxu0 %v6862_v32  ;;  %1610 = vmatpush1.bf16.msra.mxu1 %v6864_v35  ;;  %v201_v32 = vld [vmem:[#allocation2 + $0x278] sm:$0xff]  ;;  %v6868_v35 = vcombine.low %v177_v24, %v189_v25  ;;  %v178_v24 = vld [vmem:[#allocation2 + $0x1c0] sm:$0xff] }
  0xcd   :  { %1570 = vmatprep.subr.bf16.mxu0 %v6887_v36  ;;  %1611 = vmatprep.subr.bf16.mxu1 %v6889_v39  ;;  %v6891_v36 = vcombine.high %v200_v30, %v212_v31  ;;  %v6893_v37 = vcombine.high %v201_v32, %v213_v33  ;;  %v236_v39 = vld [vmem:[#allocation2 + $0x390] sm:$0xff]  ;;  %v190_v25 = vld [vmem:[#allocation2 + $0x220] sm:$0xff] }
  0xce   :  { %v6914_v50 = vcombine.low %v224_v38, %v236_v39  ;;  %v6871_v30 = vcombine.high %v178_v24, %v190_v25 }
  0xd0   :  { %1571 = vmatpush1.bf16.msra.mxu0 %v6886_v40  ;;  %1612 = vmatpush1.bf16.msra.mxu1 %v6888_v43  ;;  %v225_v40 = vld [vmem:[#allocation2 + $0x338] sm:$0xff]  ;;  %v6892_v43 = vcombine.low %v201_v32, %v213_v33  ;;  %v202_v32 = vld [vmem:[#allocation2 + $0x280] sm:$0xff] }
  0xd1   :  { %1572 = vmatprep.subr.bf16.mxu0 %v6911_v44  ;;  %1613 = vmatprep.subr.bf16.mxu1 %v6913_v47  ;;  %v6915_v44 = vcombine.high %v224_v38, %v236_v39  ;;  %v6917_v45 = vcombine.high %v225_v40, %v237_v41  ;;  %v260_v47 = vld [vmem:[#allocation2 + $0x450] sm:$0xff]  ;;  %v214_v33 = vld [vmem:[#allocation2 + $0x2e0] sm:$0xff] }
  0xd2   :  { %v6938_v58 = vcombine.low %v248_v46, %v260_v47  ;;  %v6895_v38 = vcombine.high %v202_v32, %v214_v33 }
  0xd4   :  { %1573 = vmatpush1.bf16.msra.mxu0 %v6910_v48  ;;  %1614 = vmatpush1.bf16.msra.mxu1 %v6912_v51  ;;  %v249_v48 = vld [vmem:[#allocation2 + $0x3f8] sm:$0xff]  ;;  %v6916_v51 = vcombine.low %v225_v40, %v237_v41  ;;  %v226_v40 = vld [vmem:[#allocation2 + $0x340] sm:$0xff] }
  0xd5   :  { %1574 = vmatprep.subr.bf16.mxu0 %v6935_v52  ;;  %1615 = vmatprep.subr.bf16.mxu1 %v6937_v55  ;;  %v6939_v52 = vcombine.high %v248_v46, %v260_v47  ;;  %v6941_v53 = vcombine.high %v249_v48, %v261_v49  ;;  %v284_v55 = vld [vmem:[#allocation2 + $0x510] sm:$0xff]  ;;  %v238_v41 = vld [vmem:[#allocation2 + $0x3a0] sm:$0xff] }
  0xd6   :  { %v6962_v3 = vcombine.low %v272_v54, %v284_v55  ;;  %v6919_v46 = vcombine.high %v226_v40, %v238_v41 }
  0xd8   :  { %1575 = vmatpush1.bf16.msra.mxu0 %v6934_v56  ;;  %1616 = vmatpush1.bf16.msra.mxu1 %v6936_v59  ;;  %v273_v56 = vld [vmem:[#allocation2 + $0x4b8] sm:$0xff]  ;;  %v6940_v59 = vcombine.low %v249_v48, %v261_v49  ;;  %v250_v48 = vld [vmem:[#allocation2 + $0x400] sm:$0xff] }
  0xd9   :  { %1576 = vmatprep.subr.bf16.mxu0 %v6959_v60  ;;  %1617 = vmatprep.subr.bf16.mxu1 %v6961_v63  ;;  %v6963_v60 = vcombine.high %v272_v54, %v284_v55  ;;  %v6965_v61 = vcombine.high %v273_v56, %v285_v57  ;;  %v308_v63 = vld [vmem:[#allocation2 + $0x5d0] sm:$0xff]  ;;  %v262_v49 = vld [vmem:[#allocation2 + $0x460] sm:$0xff] }
  0xda   :  { %v6943_v54 = vcombine.high %v250_v48, %v262_v49 }
  0xdc   :  { %1577 = vmatpush1.bf16.msra.mxu0 %v6958_v1  ;;  %1618 = vmatpush1.bf16.msra.mxu1 %v6960_v4  ;;  %v297_v1 = vld [vmem:[#allocation2 + $0x578] sm:$0xff]  ;;  %v6964_v4 = vcombine.low %v273_v56, %v285_v57  ;;  %v274_v56 = vld [vmem:[#allocation2 + $0x4c0] sm:$0xff] }
  0xdd   :  { %1578 = vmatprep.subr.bf16.mxu0 %v6983_v5  ;;  %1619 = vmatprep.subr.bf16.mxu1 %v6985_v8  ;;  %v6987_v5 = vcombine.high %v296_v62, %v308_v63  ;;  %v6989_v6 = vcombine.high %v297_v1, %v309_v2  ;;  %v142_v8 = vld [vmem:[#allocation2 + $0xa0] sm:$0xff] }
  0xde   :  { %v6823_v14 = vcombine.high %v130_v7, %v142_v8  ;;  %v286_v57 = vld [vmem:[#allocation2 + $0x520] sm:$0xff] }
  0xe0   :  { %1579 = vmatpush1.bf16.msra.mxu0 %v6982_v9  ;;  %1620 = vmatpush1.bf16.msra.mxu1 %v6984_v10  ;;  %v131_v9 = vld [vmem:[#allocation2 + $0x48] sm:$0xff] }
  0xe1   :  { %1646 = vmatprep.subr.bf16.mxu0 %v6819_v12  ;;  %1687 = vmatprep.subr.bf16.mxu1 %v6821_v13  ;;  %v143_v10 = vld [vmem:[#allocation2 + $0xa8] sm:$0xff]  ;;  %v6986_v12 = vcombine.low %v296_v62, %v308_v63  ;;  %v6988_v13 = vcombine.low %v297_v1, %v309_v2  ;;  %v6967_v62 = vcombine.high %v274_v56, %v286_v57  ;;  %v298_v1 = vld [vmem:[#allocation2 + $0x580] sm:$0xff] }
  0xe2   :  { %v6825_v15 = vcombine.high %v131_v9, %v143_v10  ;;  %v310_v2 = vld [vmem:[#allocation2 + $0x5e0] sm:$0xff] }
  0xe3   :  { %1597 = vmatmul.mubr.bf16.vlgmr.msra.gmra.mrb[8].mxu0 %v8341_v11  ;;  %1638 = vmatmul.mubr.bf16.vlgmr.msra.gmra.mrb[8].mxu1 %v8341_v11 }
  0xe4   :  { %1647 = vmatpush1.bf16.msra.mxu0 %v6818_v18  ;;  %1688 = vmatpush1.bf16.msra.mxu1 %v6820_v19  ;;  %v155_v18 = vld [vmem:[#allocation2 + $0x108] sm:$0xff] }
  0xe5   :  { %1648 = vmatprep.subr.bf16.mxu0 %v6843_v20  ;;  %1689 = vmatprep.subr.bf16.mxu1 %v6845_v21  ;;  %v167_v19 = vld [vmem:[#allocation2 + $0x168] sm:$0xff]  ;;  %v6822_v20 = vcombine.low %v130_v7, %v142_v8  ;;  %v6824_v21 = vcombine.low %v131_v9, %v143_v10  ;;  %v6991_v7 = vcombine.high %v298_v1, %v310_v2  ;;  %v132_v9 = vld [vmem:[#allocation2 + $0x50] sm:$0xff] }
  0xe6   :  { %1678 = vmatprep.mubr.bf16.mxu0 %v8191_v0  ;;  %1719 = vmatprep.mubr.bf16.mxu1 %v8191_v0  ;;  %v6849_v23 = vcombine.high %v155_v18, %v167_v19  ;;  %v144_v10 = vld [vmem:[#allocation2 + $0xb0] sm:$0xff] }
  0xe8   :  { %1649 = vmatpush1.bf16.msra.mxu0 %v6842_v26  ;;  %1690 = vmatpush1.bf16.msra.mxu1 %v6844_v27  ;;  %v179_v26 = vld [vmem:[#allocation2 + $0x1c8] sm:$0xff] }
  0xe9   :  { %1650 = vmatprep.subr.bf16.mxu0 %v6867_v28  ;;  %1691 = vmatprep.subr.bf16.mxu1 %v6869_v29  ;;  %v191_v27 = vld [vmem:[#allocation2 + $0x228] sm:$0xff]  ;;  %v6846_v28 = vcombine.low %v154_v16, %v166_v17  ;;  %v6848_v29 = vcombine.low %v155_v18, %v167_v19  ;;  %v6827_v16 = vcombine.high %v132_v9, %v144_v10  ;;  %v156_v18 = vld [vmem:[#allocation2 + $0x110] sm:$0xff] }
  0xea   :  { %v6873_v31 = vcombine.high %v179_v26, %v191_v27  ;;  %v168_v19 = vld [vmem:[#allocation2 + $0x170] sm:$0xff] }
  0xec   :  { %1651 = vmatpush1.bf16.msra.mxu0 %v6866_v34  ;;  %1692 = vmatpush1.bf16.msra.mxu1 %v6868_v35  ;;  %v203_v34 = vld [vmem:[#allocation2 + $0x288] sm:$0xff] }
  0xed   :  { %1652 = vmatprep.subr.bf16.mxu0 %v6891_v36  ;;  %1693 = vmatprep.subr.bf16.mxu1 %v6893_v37  ;;  %v215_v35 = vld [vmem:[#allocation2 + $0x2e8] sm:$0xff]  ;;  %v6870_v36 = vcombine.low %v178_v24, %v190_v25  ;;  %v6872_v37 = vcombine.low %v179_v26, %v191_v27  ;;  %v6851_v24 = vcombine.high %v156_v18, %v168_v19  ;;  %v180_v26 = vld [vmem:[#allocation2 + $0x1d0] sm:$0xff] }
  0xee   :  { %v6897_v39 = vcombine.high %v203_v34, %v215_v35  ;;  %v192_v27 = vld [vmem:[#allocation2 + $0x230] sm:$0xff] }
  0xf0   :  { %1653 = vmatpush1.bf16.msra.mxu0 %v6890_v42  ;;  %1694 = vmatpush1.bf16.msra.mxu1 %v6892_v43  ;;  %v227_v42 = vld [vmem:[#allocation2 + $0x348] sm:$0xff] }
  0xf1   :  { %1654 = vmatprep.subr.bf16.mxu0 %v6915_v44  ;;  %1695 = vmatprep.subr.bf16.mxu1 %v6917_v45  ;;  %v239_v43 = vld [vmem:[#allocation2 + $0x3a8] sm:$0xff]  ;;  %v6894_v44 = vcombine.low %v202_v32, %v214_v33  ;;  %v6896_v45 = vcombine.low %v203_v34, %v215_v35  ;;  %v6875_v32 = vcombine.high %v180_v26, %v192_v27  ;;  %v204_v34 = vld [vmem:[#allocation2 + $0x290] sm:$0xff] }
  0xf2   :  { %v6921_v47 = vcombine.high %v227_v42, %v239_v43  ;;  %v216_v35 = vld [vmem:[#allocation2 + $0x2f0] sm:$0xff] }
  0xf4   :  { %1655 = vmatpush1.bf16.msra.mxu0 %v6914_v50  ;;  %1696 = vmatpush1.bf16.msra.mxu1 %v6916_v51  ;;  %v251_v50 = vld [vmem:[#allocation2 + $0x408] sm:$0xff] }
  0xf5   :  { %1656 = vmatprep.subr.bf16.mxu0 %v6939_v52  ;;  %1697 = vmatprep.subr.bf16.mxu1 %v6941_v53  ;;  %v263_v51 = vld [vmem:[#allocation2 + $0x468] sm:$0xff]  ;;  %v6918_v52 = vcombine.low %v226_v40, %v238_v41  ;;  %v6920_v53 = vcombine.low %v227_v42, %v239_v43  ;;  %v6899_v40 = vcombine.high %v204_v34, %v216_v35  ;;  %v228_v42 = vld [vmem:[#allocation2 + $0x350] sm:$0xff] }
  0xf6   :  { %v6945_v55 = vcombine.high %v251_v50, %v263_v51  ;;  %v240_v43 = vld [vmem:[#allocation2 + $0x3b0] sm:$0xff] }
  0xf8   :  { %1657 = vmatpush1.bf16.msra.mxu0 %v6938_v58  ;;  %1698 = vmatpush1.bf16.msra.mxu1 %v6940_v59  ;;  %v275_v58 = vld [vmem:[#allocation2 + $0x4c8] sm:$0xff] }
  0xf9   :  { %1658 = vmatprep.subr.bf16.mxu0 %v6963_v60  ;;  %1699 = vmatprep.subr.bf16.mxu1 %v6965_v61  ;;  %v287_v59 = vld [vmem:[#allocation2 + $0x528] sm:$0xff]  ;;  %v6942_v60 = vcombine.low %v250_v48, %v262_v49  ;;  %v6944_v61 = vcombine.low %v251_v50, %v263_v51  ;;  %v6923_v48 = vcombine.high %v228_v42, %v240_v43  ;;  %v252_v49 = vld [vmem:[#allocation2 + $0x410] sm:$0xff]  ;;  %v253_v51 = vld [vmem:[#allocation2 + $0x418] sm:$0xff] }
  0xfa   :  { %v6969_v63 = vcombine.high %v275_v58, %v287_v59  ;;  %v264_v50 = vld [vmem:[#allocation2 + $0x470] sm:$0xff] }
  0xfc   :  { %1659 = vmatpush1.bf16.msra.mxu0 %v6962_v3  ;;  %1700 = vmatpush1.bf16.msra.mxu1 %v6964_v4  ;;  %v299_v3 = vld [vmem:[#allocation2 + $0x588] sm:$0xff] }
  0xfd   :  { %1660 = vmatprep.subr.bf16.mxu0 %v6987_v5  ;;  %1701 = vmatprep.subr.bf16.mxu1 %v6989_v6  ;;  %v311_v4 = vld [vmem:[#allocation2 + $0x5e8] sm:$0xff]  ;;  %v6966_v5 = vcombine.low %v274_v56, %v286_v57  ;;  %v6968_v6 = vcombine.low %v275_v58, %v287_v59  ;;  %v276_v57 = vld [vmem:[#allocation2 + $0x4d0] sm:$0xff]  ;;  %v277_v59 = vld [vmem:[#allocation2 + $0x4d8] sm:$0xff] }
  0xfe   :  { %v6993_v8 = vcombine.high %v299_v3, %v311_v4  ;;  %v288_v58 = vld [vmem:[#allocation2 + $0x530] sm:$0xff] }
 0x100   :  { %1661 = vmatpush1.bf16.msra.mxu0 %v6986_v12  ;;  %1702 = vmatpush1.bf16.msra.mxu1 %v6988_v13  ;;  %v133_v12 = vld [vmem:[#allocation2 + $0x58] sm:$0xff] }
 0x101   :  { %1728 = vmatprep.subr.bf16.mxu0 %v6823_v14  ;;  %1769 = vmatprep.subr.bf16.mxu1 %v6825_v15  ;;  %v145_v13 = vld [vmem:[#allocation2 + $0xb8] sm:$0xff]  ;;  %v6990_v14 = vcombine.low %v298_v1, %v310_v2  ;;  %v6992_v15 = vcombine.low %v299_v3, %v311_v4  ;;  %v300_v2 = vld [vmem:[#allocation2 + $0x590] sm:$0xff] }
 0x102   :  { %v6829_v17 = vcombine.high %v133_v12, %v145_v13  ;;  %v312_v3 = vld [vmem:[#allocation2 + $0x5f0] sm:$0xff]  ;;  %v301_v4 = vld [vmem:[#allocation2 + $0x598] sm:$0xff] }
 0x103   :  { %1679 = vmatmul.mubr.bf16.vlgmr.msra.gmra.mrb[12].mxu0 %v8341_v11  ;;  %1720 = vmatmul.mubr.bf16.vlgmr.msra.gmra.mrb[12].mxu1 %v8341_v11 }
 0x104   :  { %1729 = vmatpush1.bf16.msra.mxu0 %v6822_v20  ;;  %1770 = vmatpush1.bf16.msra.mxu1 %v6824_v21  ;;  %v157_v20 = vld [vmem:[#allocation2 + $0x118] sm:$0xff] }
 0x105   :  { %1730 = vmatprep.subr.bf16.mxu0 %v6847_v22  ;;  %1771 = vmatprep.subr.bf16.mxu1 %v6849_v23  ;;  %v169_v21 = vld [vmem:[#allocation2 + $0x178] sm:$0xff]  ;;  %v6826_v22 = vcombine.low %v132_v9, %v144_v10  ;;  %v6828_v23 = vcombine.low %v133_v12, %v145_v13 }
 0x106   :  { %1760 = vmatprep.mubr.bf16.mxu0 %v8191_v0  ;;  %1801 = vmatprep.mubr.bf16.mxu1 %v8191_v0  ;;  %v6853_v25 = vcombine.high %v157_v20, %v169_v21  ;;  %v2864_v10 = vld [vmem:[#allocation7 + $0x400] sm:$0xff] }
 0x107   :  { %v2868_v12 = vld [vmem:[#allocation7 + $0x420] sm:$0xff] }
 0x108   :  { %1731 = vmatpush1.bf16.msra.mxu0 %v6846_v28  ;;  %1772 = vmatpush1.bf16.msra.mxu1 %v6848_v29  ;;  %v181_v28 = vld [vmem:[#allocation2 + $0x1d8] sm:$0xff] }
 0x109   :  { %1732 = vmatprep.subr.bf16.mxu0 %v6871_v30  ;;  %1773 = vmatprep.subr.bf16.mxu1 %v6873_v31  ;;  %v193_v29 = vld [vmem:[#allocation2 + $0x238] sm:$0xff]  ;;  %v6850_v30 = vcombine.low %v156_v18, %v168_v19  ;;  %v6852_v31 = vcombine.low %v157_v20, %v169_v21 }
 0x10a   :  { %v6877_v33 = vcombine.high %v181_v28, %v193_v29  ;;  %v1908_v13 = vld [vmem:[#allocation7] sm:$0xff] }
 0x10b   :  { %v2872_v19 = vld [vmem:[#allocation7 + $0x440] sm:$0xff] }
 0x10c   :  { %1733 = vmatpush1.bf16.msra.mxu0 %v6870_v36  ;;  %1774 = vmatpush1.bf16.msra.mxu1 %v6872_v37  ;;  %v205_v36 = vld [vmem:[#allocation2 + $0x298] sm:$0xff] }
 0x10d   :  { %1734 = vmatprep.subr.bf16.mxu0 %v6895_v38  ;;  %1775 = vmatprep.subr.bf16.mxu1 %v6897_v39  ;;  %v217_v37 = vld [vmem:[#allocation2 + $0x2f8] sm:$0xff]  ;;  %v6874_v38 = vcombine.low %v180_v26, %v192_v27  ;;  %v6876_v39 = vcombine.low %v181_v28, %v193_v29 }
 0x10e   :  { %v6901_v41 = vcombine.high %v205_v36, %v217_v37  ;;  %v2876_v20 = vld [vmem:[#allocation7 + $0x460] sm:$0xff] }
 0x10f   :  { %v1916_v21 = vld [vmem:[#allocation7 + $0x40] sm:$0xff] }
 0x110   :  { %1735 = vmatpush1.bf16.msra.mxu0 %v6894_v44  ;;  %1776 = vmatpush1.bf16.msra.mxu1 %v6896_v45  ;;  %v229_v44 = vld [vmem:[#allocation2 + $0x358] sm:$0xff] }
 0x111   :  { %1736 = vmatprep.subr.bf16.mxu0 %v6919_v46  ;;  %1777 = vmatprep.subr.bf16.mxu1 %v6921_v47  ;;  %v241_v45 = vld [vmem:[#allocation2 + $0x3b8] sm:$0xff]  ;;  %v6898_v46 = vcombine.low %v204_v34, %v216_v35  ;;  %v6900_v47 = vcombine.low %v205_v36, %v217_v37 }
 0x112   :  { %v2880_v27 = vld [vmem:[#allocation7 + $0x480] sm:$0xff] }
 0x113   :  { %v2884_v28 = vld [vmem:[#allocation7 + $0x4a0] sm:$0xff] }
 0x114   :  { %1737 = vmatpush1.bf16.msra.mxu0 %v6918_v52  ;;  %1778 = vmatpush1.bf16.msra.mxu1 %v6920_v53  ;;  %v265_v52 = vld [vmem:[#allocation2 + $0x478] sm:$0xff]  ;;  %v6922_v53 = vcombine.low %v228_v42, %v240_v43 }
 0x115   :  { %1738 = vmatprep.subr.bf16.mxu0 %v6943_v54  ;;  %1779 = vmatprep.subr.bf16.mxu1 %v6945_v55  ;;  %v6924_v54 = vcombine.low %v229_v44, %v241_v45  ;;  %v6947_v55 = vcombine.high %v252_v49, %v264_v50  ;;  %v6949_v56 = vcombine.high %v253_v51, %v265_v52  ;;  %v1924_v29 = vld [vmem:[#allocation7 + $0x80] sm:$0xff] }
 0x116   :  { %v2888_v35 = vld [vmem:[#allocation7 + $0x4c0] sm:$0xff] }
 0x117   :  { %v2892_v36 = vld [vmem:[#allocation7 + $0x4e0] sm:$0xff] }
 0x118   :  { %1739 = vmatpush1.bf16.msra.mxu0 %v6942_v60  ;;  %1780 = vmatpush1.bf16.msra.mxu1 %v6944_v61  ;;  %v289_v60 = vld [vmem:[#allocation2 + $0x538] sm:$0xff]  ;;  %v6946_v61 = vcombine.low %v252_v49, %v264_v50 }
 0x119   :  { %1740 = vmatprep.subr.bf16.mxu0 %v6967_v62  ;;  %1781 = vmatprep.subr.bf16.mxu1 %v6969_v63  ;;  %v6948_v62 = vcombine.low %v253_v51, %v265_v52  ;;  %v6971_v63 = vcombine.high %v276_v57, %v288_v58  ;;  %v6973_v1 = vcombine.high %v277_v59, %v289_v60  ;;  %v1932_v37 = vld [vmem:[#allocation7 + $0xc0] sm:$0xff] }
 0x11a   :  { %v2896_v42 = vld [vmem:[#allocation7 + $0x500] sm:$0xff] }
 0x11b   :  { %v2900_v43 = vld [vmem:[#allocation7 + $0x520] sm:$0xff] }
 0x11c   :  { %1741 = vmatpush1.bf16.msra.mxu0 %v6966_v5  ;;  %1782 = vmatpush1.bf16.msra.mxu1 %v6968_v6  ;;  %v313_v5 = vld [vmem:[#allocation2 + $0x5f8] sm:$0xff]  ;;  %v6970_v6 = vcombine.low %v276_v57, %v288_v58 }
 0x11d   :  { %1742 = vmatprep.subr.bf16.mxu0 %v6991_v7  ;;  %1783 = vmatprep.subr.bf16.mxu1 %v6993_v8  ;;  %v6972_v7 = vcombine.low %v277_v59, %v289_v60  ;;  %v6995_v8 = vcombine.high %v300_v2, %v312_v3  ;;  %v6997_v9 = vcombine.high %v301_v4, %v313_v5  ;;  %v2904_v49 = vld [vmem:[#allocation7 + $0x540] sm:$0xff] }
 0x11e   :  { %v2908_v50 = vld [vmem:[#allocation7 + $0x560] sm:$0xff] }
 0x11f   :  { %v1948_v51 = vld [vmem:[#allocation7 + $0x140] sm:$0xff] }
 0x120   :  { %1743 = vmatpush1.bf16.msra.mxu0 %v6990_v14  ;;  %1784 = vmatpush1.bf16.msra.mxu1 %v6992_v15  ;;  %v1912_v14 = vld [vmem:[#allocation7 + $0x20] sm:$0xff]  ;;  %v6994_v15 = vcombine.low %v300_v2, %v312_v3 }
 0x121   :  { %1810 = vmatprep.subr.bf16.mxu0 %v6827_v16  ;;  %1851 = vmatprep.subr.bf16.mxu1 %v6829_v17  ;;  %v6996_v16 = vcombine.low %v301_v4, %v313_v5  ;;  %v7127_v17 = vcombine.high %v2864_v10, %v2868_v12  ;;  %v6999_v18 = vcombine.high %v1908_v13, %v1912_v14  ;;  %v1952_v52 = vld [vmem:[#allocation7 + $0x160] sm:$0xff] }
 0x122   :  { %v2912_v57 = vld [vmem:[#allocation7 + $0x580] sm:$0xff] }
 0x123   :  { %1761 = vmatmul.mubr.bf16.vlgmr.msra.gmra.mrb[16].mxu0 %v8341_v11  ;;  %1802 = vmatmul.mubr.bf16.vlgmr.msra.gmra.mrb[16].mxu1 %v8341_v11  ;;  %v2916_v58 = vld [vmem:[#allocation7 + $0x5a0] sm:$0xff] }
 0x124   :  { %1811 = vmatpush1.bf16.msra.mxu0 %v6826_v22  ;;  %1852 = vmatpush1.bf16.msra.mxu1 %v6828_v23  ;;  %v1920_v22 = vld [vmem:[#allocation7 + $0x60] sm:$0xff]  ;;  %v7126_v23 = vcombine.low %v2864_v10, %v2868_v12 }
 0x125   :  { %1812 = vmatprep.subr.bf16.mxu0 %v6851_v24  ;;  %1853 = vmatprep.subr.bf16.mxu1 %v6853_v25  ;;  %v6998_v24 = vcombine.low %v1908_v13, %v1912_v14  ;;  %v7135_v25 = vcombine.high %v2872_v19, %v2876_v20  ;;  %v7007_v26 = vcombine.high %v1916_v21, %v1920_v22  ;;  %v1956_v59 = vld [vmem:[#allocation7 + $0x180] sm:$0xff] }
 0x126   :  { %1842 = vmatprep.mubr.bf16.mxu0 %v8191_v0  ;;  %1883 = vmatprep.mubr.bf16.mxu1 %v8191_v0  ;;  %v6925_v0 = vcombine.high %v229_v44, %v241_v45  ;;  %v1940_v44 = vld [vmem:[#allocation7 + $0x100] sm:$0xff] }
 0x127   :  { %v1944_v45 = vld [vmem:[#allocation7 + $0x120] sm:$0xff] }
 0x128   :  { %1813 = vmatpush1.bf16.msra.mxu0 %v6850_v30  ;;  %1854 = vmatpush1.bf16.msra.mxu1 %v6852_v31  ;;  %v1928_v30 = vld [vmem:[#allocation7 + $0xa0] sm:$0xff]  ;;  %v7134_v31 = vcombine.low %v2872_v19, %v2876_v20 }
 0x129   :  { %1814 = vmatprep.subr.bf16.mxu0 %v6875_v32  ;;  %1855 = vmatprep.subr.bf16.mxu1 %v6877_v33  ;;  %v7006_v32 = vcombine.low %v1916_v21, %v1920_v22  ;;  %v7143_v33 = vcombine.high %v2880_v27, %v2884_v28  ;;  %v7015_v34 = vcombine.high %v1924_v29, %v1928_v30  ;;  %v1960_v60 = vld [vmem:[#allocation7 + $0x1a0] sm:$0xff] }
 0x12a   :  { %v2920_v2 = vld [vmem:[#allocation7 + $0x5c0] sm:$0xff] }
 0x12b   :  { %v2924_v3 = vld [vmem:[#allocation7 + $0x5e0] sm:$0xff] }
 0x12c   :  { %1815 = vmatpush1.bf16.msra.mxu0 %v6874_v38  ;;  %1856 = vmatpush1.bf16.msra.mxu1 %v6876_v39  ;;  %v1936_v38 = vld [vmem:[#allocation7 + $0xe0] sm:$0xff]  ;;  %v7142_v39 = vcombine.low %v2880_v27, %v2884_v28 }
 0x12d   :  { %1816 = vmatprep.subr.bf16.mxu0 %v6899_v40  ;;  %1857 = vmatprep.subr.bf16.mxu1 %v6901_v41  ;;  %v7014_v40 = vcombine.low %v1924_v29, %v1928_v30  ;;  %v7151_v41 = vcombine.high %v2888_v35, %v2892_v36  ;;  %v1964_v4 = vld [vmem:[#allocation7 + $0x1c0] sm:$0xff] }
 0x12e   :  { %v1968_v5 = vld [vmem:[#allocation7 + $0x1e0] sm:$0xff] }
 0x12f   :  { %v2928_v10 = vld [vmem:[#allocation7 + $0x600] sm:$0xff] }
 0x130   :  { %1817 = vmatpush1.bf16.msra.mxu0 %v6898_v46  ;;  %1858 = vmatpush1.bf16.msra.mxu1 %v6900_v47  ;;  %v7150_v46 = vcombine.low %v2888_v35, %v2892_v36  ;;  %v7022_v47 = vcombine.low %v1932_v37, %v1936_v38  ;;  %v2932_v12 = vld [vmem:[#allocation7 + $0x620] sm:$0xff]  ;;  %v8373_v36 = vld [vmem:[#allocation7 + $0x430] sm:$0xff] }
 0x131   :  { %1818 = vmatprep.subr.bf16.mxu0 %v6923_v48  ;;  %1859 = vmatprep.subr.bf16.mxu1 %v6925_v0  ;;  %v7159_v48 = vcombine.high %v2896_v42, %v2900_v43  ;;  %v7031_v0 = vcombine.high %v1940_v44, %v1944_v45  ;;  %v1972_v13 = vld [vmem:[#allocation7 + $0x200] sm:$0xff] }
 0x132   :  { %v1976_v14 = vld [vmem:[#allocation7 + $0x220] sm:$0xff] }
 0x133   :  { %v2936_v19 = vld [vmem:[#allocation7 + $0x640] sm:$0xff] }
 0x134   :  { %1819 = vmatpush1.bf16.msra.mxu0 %v6922_v53  ;;  %1860 = vmatpush1.bf16.msra.mxu1 %v6924_v54  ;;  %v7158_v53 = vcombine.low %v2896_v42, %v2900_v43  ;;  %v7030_v54 = vcombine.low %v1940_v44, %v1944_v45  ;;  %v2940_v20 = vld [vmem:[#allocation7 + $0x660] sm:$0xff] }
 0x135   :  { %1820 = vmatprep.subr.bf16.mxu0 %v6947_v55  ;;  %1861 = vmatprep.subr.bf16.mxu1 %v6949_v56  ;;  %v7167_v55 = vcombine.high %v2904_v49, %v2908_v50  ;;  %v7039_v56 = vcombine.high %v1948_v51, %v1952_v52  ;;  %v1980_v21 = vld [vmem:[#allocation7 + $0x240] sm:$0xff] }
 0x136   :  { %v1984_v22 = vld [vmem:[#allocation7 + $0x260] sm:$0xff] }
 0x137   :  { %v7071_v27 = vcombine.high %v1980_v21, %v1984_v22  ;;  %v1992_v28 = vld [vmem:[#allocation7 + $0x2a0] sm:$0xff] }
 0x138   :  { %1821 = vmatpush1.bf16.msra.mxu0 %v6946_v61  ;;  %1862 = vmatpush1.bf16.msra.mxu1 %v6948_v62  ;;  %v7166_v61 = vcombine.low %v2904_v49, %v2908_v50  ;;  %v7038_v62 = vcombine.low %v1948_v51, %v1952_v52  ;;  %v2944_v29 = vld [vmem:[#allocation7 + $0x680] sm:$0xff] }
 0x139   :  { %1822 = vmatprep.subr.bf16.mxu0 %v6971_v63  ;;  %1863 = vmatprep.subr.bf16.mxu1 %v6973_v1  ;;  %v7175_v63 = vcombine.high %v2912_v57, %v2916_v58  ;;  %v7047_v1 = vcombine.high %v1956_v59, %v1960_v60  ;;  %v2948_v30 = vld [vmem:[#allocation7 + $0x6a0] sm:$0xff] }
 0x13a   :  { %v1996_v42 = vld [vmem:[#allocation7 + $0x2c0] sm:$0xff]  ;;  %v7206_v44 = vcombine.low %v2944_v29, %v2948_v30 }
 0x13b   :  { %v2000_v43 = vld [vmem:[#allocation7 + $0x2e0] sm:$0xff] }
 0x13c   :  { %1823 = vmatpush1.bf16.msra.mxu0 %v6970_v6  ;;  %1864 = vmatpush1.bf16.msra.mxu1 %v6972_v7  ;;  %v7174_v6 = vcombine.low %v2912_v57, %v2916_v58  ;;  %v7046_v7 = vcombine.low %v1956_v59, %v1960_v60  ;;  %v2004_v49 = vld [vmem:[#allocation7 + $0x300] sm:$0xff]  ;;  %v7086_v52 = vcombine.low %v1996_v42, %v2000_v43 }
 0x13d   :  { %1824 = vmatprep.subr.bf16.mxu0 %v6995_v8  ;;  %1865 = vmatprep.subr.bf16.mxu1 %v6997_v9  ;;  %v7183_v8 = vcombine.high %v2920_v2, %v2924_v3  ;;  %v7055_v9 = vcombine.high %v1964_v4, %v1968_v5  ;;  %v2008_v50 = vld [vmem:[#allocation7 + $0x320] sm:$0xff] }
 0x13e   :  { %v2012_v57 = vld [vmem:[#allocation7 + $0x340] sm:$0xff]  ;;  %v7094_v60 = vcombine.low %v2004_v49, %v2008_v50 }
 0x13f   :  { %v2016_v58 = vld [vmem:[#allocation7 + $0x360] sm:$0xff] }
 0x140   :  { %1825 = vmatpush1.bf16.msra.mxu0 %v6994_v15  ;;  %1866 = vmatpush1.bf16.msra.mxu1 %v6996_v16  ;;  %v7182_v15 = vcombine.low %v2920_v2, %v2924_v3  ;;  %v7054_v16 = vcombine.low %v1964_v4, %v1968_v5  ;;  %v2020_v2 = vld [vmem:[#allocation7 + $0x380] sm:$0xff]  ;;  %v7102_v5 = vcombine.low %v2012_v57, %v2016_v58 }
 0x141   :  { %3632 = vmatprep.subr.bf16.mxu0 %v7127_v17  ;;  %2676 = vmatprep.subr.bf16.mxu1 %v6999_v18  ;;  %v7191_v17 = vcombine.high %v2928_v10, %v2932_v12  ;;  %v7063_v18 = vcombine.high %v1972_v13, %v1976_v14  ;;  %v2024_v3 = vld [vmem:[#allocation7 + $0x3a0] sm:$0xff] }
 0x143   :  { %1843 = vmatmul.mubr.bf16.vlgmr.msra.gmra.mrb[20].mxu0 %v8341_v11  ;;  %1884 = vmatmul.mubr.bf16.vlgmr.msra.gmra.mrb[20].mxu1 %v8341_v11  ;;  %v7023_v11 = vcombine.high %v1932_v37, %v1936_v38  ;;  %v7070_v37 = vcombine.low %v1980_v21, %v1984_v22  ;;  %v7207_v38 = vcombine.high %v2944_v29, %v2948_v30 }
 0x144   :  { %3633 = vmatpush1.bf16.msra.mxu0 %v7126_v23  ;;  %2677 = vmatpush1.bf16.msra.mxu1 %v6998_v24  ;;  %v7190_v23 = vcombine.low %v2928_v10, %v2932_v12  ;;  %v7062_v24 = vcombine.low %v1972_v13, %v1976_v14  ;;  %v2988_v10 = vld [vmem:[#allocation7 + $0x7e0] sm:$0xff]  ;;  %v7110_v21 = vcombine.low %v2020_v2, %v2024_v3 }
 0x145   :  { %3634 = vmatprep.subr.bf16.mxu0 %v7135_v25  ;;  %2678 = vmatprep.subr.bf16.mxu1 %v7007_v26  ;;  %v7199_v25 = vcombine.high %v2936_v19, %v2940_v20  ;;  %v1988_v26 = vld [vmem:[#allocation7 + $0x280] sm:$0xff] }
 0x146   :  { %v7078_v45 = vcombine.low %v1988_v26, %v1992_v28  ;;  %v2028_v14 = vld [vmem:[#allocation7 + $0x3c0] sm:$0xff] }
 0x148   :  { %3635 = vmatpush1.bf16.msra.mxu0 %v7134_v31  ;;  %2679 = vmatpush1.bf16.msra.mxu1 %v7006_v32  ;;  %v8365_v31 = vld [vmem:[#allocation7 + $0x8] sm:$0xff] }
 0x149   :  { %3636 = vmatprep.subr.bf16.mxu0 %v7143_v33  ;;  %2680 = vmatprep.subr.bf16.mxu1 %v7015_v34  ;;  %v8367_v32 = vld [vmem:[#allocation7 + $0x28] sm:$0xff]  ;;  %v8369_v33 = vld [vmem:[#allocation7 + $0x410] sm:$0xff]  ;;  %v7198_v34 = vcombine.low %v2936_v19, %v2940_v20 }
 0x14a   :  { %v7000_v35 = vcombine.low %v8365_v31, %v8367_v32 }
 0x14c   :  { %3637 = vmatpush1.bf16.msra.mxu0 %v7142_v39  ;;  %2681 = vmatpush1.bf16.msra.mxu1 %v7014_v40  ;;  %v7130_v39 = vcombine.low %v8369_v33, %v8373_v36  ;;  %v7079_v40 = vcombine.high %v1988_v26, %v1992_v28  ;;  %v7001_v28 = vcombine.high %v8365_v31, %v8367_v32  ;;  %v1933_v32 = vld [vmem:[#allocation7 + $0xc8] sm:$0xff] }
 0x14d   :  { %3638 = vmatprep.subr.bf16.mxu0 %v7151_v41  ;;  %2682 = vmatprep.subr.bf16.mxu1 %v7023_v11  ;;  %v2952_v41 = vld [vmem:[#allocation7 + $0x6c0] sm:$0xff] }
 0x14e   :  { %v2956_v11 = vld [vmem:[#allocation7 + $0x6e0] sm:$0xff] }
 0x14f   :  { %v7214_v51 = vcombine.low %v2952_v41, %v2956_v11 }
 0x150   :  { %3639 = vmatpush1.bf16.msra.mxu0 %v7150_v46  ;;  %2683 = vmatpush1.bf16.msra.mxu1 %v7022_v47  ;;  %v7215_v46 = vcombine.high %v2952_v41, %v2956_v11  ;;  %v7087_v47 = vcombine.high %v1996_v42, %v2000_v43  ;;  %v320_v42 = vlaneseq }
 0x151   :  { %3640 = vmatprep.subr.bf16.mxu0 %v7159_v48  ;;  %2684 = vmatprep.subr.bf16.mxu1 %v7031_v0  ;;  %v2960_v48 = vld [vmem:[#allocation7 + $0x700] sm:$0xff] }
 0x152   :  { %v2964_v0 = vld [vmem:[#allocation7 + $0x720] sm:$0xff]  ;;  %v321_v43 = vshrl.u32 %v320_v42, 7 }
 0x153   :  { %v7222_v59 = vcombine.low %v2960_v48, %v2964_v0 }
 0x154   :  { %3641 = vmatpush1.bf16.msra.mxu0 %v7158_v53  ;;  %2685 = vmatpush1.bf16.msra.mxu1 %v7030_v54  ;;  %v7223_v53 = vcombine.high %v2960_v48, %v2964_v0  ;;  %v7095_v54 = vcombine.high %v2004_v49, %v2008_v50  ;;  %v8389_v48 = vsub.s32 3, %v321_v43  ;;  %v8391_v0 = vsub.s32 4, %v321_v43 }
 0x155   :  { %3642 = vmatprep.subr.bf16.mxu0 %v7167_v55  ;;  %2686 = vmatprep.subr.bf16.mxu1 %v7039_v56  ;;  %v2968_v55 = vld [vmem:[#allocation7 + $0x740] sm:$0xff]  ;;  %v8393_v49 = vsub.s32 6, %v321_v43  ;;  %v8395_v50 = vsub.s32 5, %v321_v43 }
 0x156   :  { %v2972_v56 = vld [vmem:[#allocation7 + $0x760] sm:$0xff] }
 0x157   :  { %v7230_v4 = vcombine.low %v2968_v55, %v2972_v56 }
 0x158   :  { %3643 = vmatpush1.bf16.msra.mxu0 %v7166_v61  ;;  %2687 = vmatpush1.bf16.msra.mxu1 %v7038_v62  ;;  %v7231_v61 = vcombine.high %v2968_v55, %v2972_v56  ;;  %v7103_v62 = vcombine.high %v2012_v57, %v2016_v58 }
 0x159   :  { %3644 = vmatprep.subr.bf16.mxu0 %v7175_v63  ;;  %2688 = vmatprep.subr.bf16.mxu1 %v7047_v1  ;;  %v2976_v63 = vld [vmem:[#allocation7 + $0x780] sm:$0xff] }
 0x15a   :  { %v2980_v1 = vld [vmem:[#allocation7 + $0x7a0] sm:$0xff] }
 0x15c   :  { %3645 = vmatpush1.bf16.msra.mxu0 %v7174_v6  ;;  %2689 = vmatpush1.bf16.msra.mxu1 %v7046_v7  ;;  %v7239_v6 = vcombine.high %v2976_v63, %v2980_v1 }
 0x15d   :  { %3646 = vmatprep.subr.bf16.mxu0 %v7183_v8  ;;  %2690 = vmatprep.subr.bf16.mxu1 %v7055_v9  ;;  %v7111_v8 = vcombine.high %v2020_v2, %v2024_v3  ;;  %v2984_v9 = vld [vmem:[#allocation7 + $0x7c0] sm:$0xff] }
 0x15e   :  { %v7247_v22 = vcombine.high %v2984_v9, %v2988_v10 }
 0x160   :  { %3647 = vmatpush1.bf16.msra.mxu0 %v7182_v15  ;;  %2691 = vmatpush1.bf16.msra.mxu1 %v7054_v16  ;;  %v2032_v15 = vld [vmem:[#allocation7 + $0x3e0] sm:$0xff] }
 0x161   :  { %3648 = vmatprep.subr.bf16.mxu0 %v7191_v17  ;;  %2692 = vmatprep.subr.bf16.mxu1 %v7063_v18  ;;  %v7238_v18 = vcombine.low %v2976_v63, %v2980_v1  ;;  %v7118_v26 = vcombine.low %v2028_v14, %v2032_v15 }
 0x164   :  { %3649 = vmatpush1.bf16.msra.mxu0 %v7190_v23  ;;  %2693 = vmatpush1.bf16.msra.mxu1 %v7062_v24  ;;  %v7119_v24 = vcombine.high %v2028_v14, %v2032_v15 }
 0x165   :  { %3650 = vmatprep.subr.bf16.mxu0 %v7199_v25  ;;  %2694 = vmatprep.subr.bf16.mxu1 %v7071_v27  ;;  %v7246_v25 = vcombine.low %v2984_v9, %v2988_v10  ;;  %v7131_v27 = vcombine.high %v8369_v33, %v8373_v36  ;;  %v1941_v36 = vld [vmem:[#allocation7 + $0x108] sm:$0xff] }
 0x168   :  { %3651 = vmatpush1.bf16.msra.mxu0 %v7198_v34  ;;  %2695 = vmatpush1.bf16.msra.mxu1 %v7070_v37 }
 0x169   :  { %3652 = vmatprep.subr.bf16.mxu0 %v7207_v38  ;;  %2696 = vmatprep.subr.bf16.mxu1 %v7079_v40 }
 0x16c   :  { %3653 = vmatpush1.bf16.msra.mxu0 %v7206_v44  ;;  %2697 = vmatpush1.bf16.msra.mxu1 %v7078_v45  ;;  %v8383_v44 = vsub.s32 0, %v321_v43  ;;  %v8385_v45 = vsub.s32 2, %v321_v43 }
 0x16d   :  { %3654 = vmatprep.subr.bf16.mxu0 %v7215_v46  ;;  %2698 = vmatprep.subr.bf16.mxu1 %v7087_v47  ;;  %v8387_v46 = vsub.s32 1, %v321_v43  ;;  %v314_v47 = vld [vmem:[#allocation5] sm:$0xff] }
 0x16e   :  { %v335_v56 = vrot.slane %v314_v47, %v8389_v48  ;;  %v339_v57 = vrot.slane %v314_v47, %v8391_v0  ;;  %v347_v58 = vrot.slane %v314_v47, %v8393_v49 }
 0x16f   :  { %v327_v55 = vrot.slane %v314_v47, %v8387_v46 }
 0x170   :  { %3655 = vmatpush1.bf16.msra.mxu0 %v7214_v51  ;;  %2699 = vmatpush1.bf16.msra.mxu1 %v7086_v52  ;;  %v8397_v51 = vsub.s32 7, %v321_v43  ;;  %v8399_v52 = vld [vmem:[#allocation5 + $0x8] sm:$0xff] }
 0x171   :  { %3656 = vmatprep.subr.bf16.mxu0 %v7223_v53  ;;  %2700 = vmatprep.subr.bf16.mxu1 %v7095_v54  ;;  %v323_v53 = vrot.slane %v314_v47, %v8383_v44  ;;  %v331_v54 = vrot.slane %v314_v47, %v8385_v45  ;;  %v359_v63 = vrot.slane %v8399_v52, %v8387_v46 }
 0x174   :  { %3657 = vmatpush1.bf16.msra.mxu0 %v7222_v59  ;;  %2701 = vmatpush1.bf16.msra.mxu1 %v7094_v60  ;;  %v355_v59 = vrot.slane %v8399_v52, %v8383_v44  ;;  %v343_v60 = vrot.slane %v314_v47, %v8395_v50 }
 0x175   :  { %3658 = vmatprep.subr.bf16.mxu0 %v7231_v61  ;;  %2702 = vmatprep.subr.bf16.mxu1 %v7103_v62  ;;  %v351_v61 = vrot.slane %v314_v47, %v8397_v51  ;;  %v363_v62 = vrot.slane %v8399_v52, %v8385_v45 }
 0x176   :  { %v8377_v7 = vpop.f32.mrb[0].mxu0  ;;  %v1475_v12 = vpop.f32.mrb[0].mxu1 }
 0x177   :  { %v1436_v13 = vpop.f32.mrb[1].mxu0  ;;  %v1477_v16 = vpop.f32.mrb[1].mxu1  ;;  %v1435_v1 = vadd.f32 %v8377_v7, %v323_v53  ;;  %v1476_v2 = vadd.f32 %v1475_v12, %v331_v54 }
 0x178   :  { %v1438_v17 = vpop.f32.mrb[2].mxu0  ;;  %3659 = vmatpush1.bf16.msra.mxu0 %v7230_v4  ;;  %v1479_v19 = vpop.f32.mrb[2].mxu1  ;;  %2703 = vmatpush1.bf16.msra.mxu1 %v7102_v5  ;;  %v8416_v3 = vadd.f32 %v1436_v13, %v327_v55  ;;  %v367_v5 = vrot.slane %v8399_v52, %v8389_v48 }
 0x179   :  { %v1439_v20 = vpop.f32.mrb[3].mxu0  ;;  %3660 = vmatprep.subr.bf16.mxu0 %v7239_v6  ;;  %v1480_v23 = vpop.f32.mrb[3].mxu1  ;;  %2704 = vmatprep.subr.bf16.mxu1 %v7111_v8  ;;  %v8420_v6 = vadd.f32 %v1477_v16, %v335_v56  ;;  %v371_v56 = vrot.slane %v8399_v52, %v8391_v0 }
 0x17c   :  { %3661 = vmatpush1.bf16.msra.mxu0 %v7238_v18  ;;  %2705 = vmatpush1.bf16.msra.mxu1 %v7110_v21 }
 0x17d   :  { %3662 = vmatprep.subr.bf16.mxu0 %v7247_v22  ;;  %2706 = vmatprep.subr.bf16.mxu1 %v7119_v24 }
 0x180   :  { %3663 = vmatpush1.bf16.msra.mxu0 %v7246_v25  ;;  %2707 = vmatpush1.bf16.msra.mxu1 %v7118_v26 }
 0x181   :  { %3714 = vmatprep.subr.bf16.mxu0 %v7131_v27  ;;  %2717 = vmatprep.subr.bf16.mxu1 %v7001_v28 }
 0x196   :  { %v1516_v29 = vpop.f32.mrb[4].mxu0  ;;  %v1557_v30 = vpop.f32.mrb[4].mxu1 }
 0x197   :  { %v1518_v34 = vpop.f32.mrb[5].mxu0  ;;  %v1559_v37 = vpop.f32.mrb[5].mxu1  ;;  %v1517_v8 = vadd.f32 %v1516_v29, %v339_v57  ;;  %v1558_v9 = vadd.f32 %v1557_v30, %v347_v58  ;;  %v379_v57 = vrot.slane %v8399_v52, %v8393_v49  ;;  %v375_v58 = vrot.slane %v8399_v52, %v8395_v50 }
 0x198   :  { %v1520_v38 = vpop.f32.mrb[6].mxu0  ;;  %v1561_v40 = vpop.f32.mrb[6].mxu1  ;;  %v8422_v17 = vadd.f32 %v1518_v34, %v343_v60  ;;  %v1560_v18 = vadd.f32 %v1559_v37, %v351_v61 }
 0x199   :  { %v1521_v41 = vpop.f32.mrb[7].mxu0  ;;  %v1562_v11 = vpop.f32.mrb[7].mxu1 }
 0x1b6   :  { %v1598_v4 = vpop.f32.mrb[8].mxu0  ;;  %v1639_v14 = vpop.f32.mrb[8].mxu1 }
 0x1b7   :  { %v1599_v10 = vadd.f32 %v1598_v4, %v355_v59  ;;  %v1600_v15 = vpop.f32.mrb[9].mxu0  ;;  %v1640_v19 = vadd.f32 %v1639_v14, %v363_v62  ;;  %v1641_v7 = vpop.f32.mrb[9].mxu1 }
 0x1b8   :  { %v1601_v20 = vadd.f32 %v1600_v15, %v359_v63  ;;  %v1602_v12 = vpop.f32.mrb[10].mxu0  ;;  %v1643_v16 = vpop.f32.mrb[10].mxu1  ;;  %v1642_v11 = vadd.f32 %v1641_v7, %v367_v5  ;;  %v383_v5 = vrot.slane %v8399_v52, %v8397_v51 }
 0x1b9   :  { %v1892_v13 = vmul.f32 %v1599_v10, %v1435_v1  ;;  %v2850_v21 = vmul.f32 %v1599_v10, %v1476_v2  ;;  %v8424_v22 = vmul.f32 %v1599_v10, %v1517_v8  ;;  %v8426_v23 = vmul.f32 %v1599_v10, %v1558_v9  ;;  %v1603_v24 = vpop.f32.mrb[11].mxu0  ;;  %v1644_v29 = vpop.f32.mrb[11].mxu1 }
 0x1ba   :  { %v1894_v25 = vmul.f32 %v1640_v19, %v1476_v2  ;;  %v2848_v26 = vmul.f32 %v1640_v19, %v1435_v1  ;;  %v8428_v27 = vmul.f32 %v1640_v19, %v1558_v9  ;;  %v8430_v28 = vmul.f32 %v1640_v19, %v1517_v8 }
 0x1bb   :  { %v1893_v30 = vmul.f32 %v1601_v20, %v8416_v3  ;;  %v2851_v34 = vmul.f32 %v1601_v20, %v8420_v6  ;;  %v3811_v37 = vmul.f32 %v1601_v20, %v8422_v17  ;;  %v8435_v38 = vmul.f32 %v1601_v20, %v1560_v18 }
 0x1bc   :  { %v1896_v40 = vsub.f32 %v1892_v13, %v1894_v25  ;;  %v2852_v41 = vadd.f32 %v2850_v21, %v2848_v26  ;;  %v1895_v42 = vmul.f32 %v1642_v11, %v8420_v6  ;;  %v2849_v43 = vmul.f32 %v1642_v11, %v8416_v3 }
 0x1bd   :  { %v3815_v47 = vmul.f32 %v1642_v11, %v1560_v18  ;;  %v8440_v53 = vmul.f32 %v1642_v11, %v8422_v17 }
 0x1be   :  { %v1897_v54 = vsub.f32 %v1893_v30, %v1895_v42  ;;  %v2853_v55 = vadd.f32 %v2851_v34, %v2849_v43 }
 0x1d6   :  { %v1680_v59 = vpop.f32.mrb[12].mxu0  ;;  %v1721_v61 = vpop.f32.mrb[12].mxu1 }
 0x1d7   :  { %v1681_v60 = vadd.f32 %v1680_v59, %v371_v56  ;;  %v1682_v62 = vpop.f32.mrb[13].mxu0  ;;  %v1722_v63 = vadd.f32 %v1721_v61, %v379_v57  ;;  %v1723_v10 = vpop.f32.mrb[13].mxu1 }
 0x1d8   :  { %v1683_v4 = vadd.f32 %v1682_v62, %v375_v58  ;;  %v1684_v14 = vpop.f32.mrb[14].mxu0  ;;  %v1725_v12 = vpop.f32.mrb[14].mxu1  ;;  %v1724_v43 = vadd.f32 %v1723_v10, %v383_v5  ;;  %v1929_v10 = vld [vmem:[#allocation7 + $0xa8] sm:$0xff] }
 0x1d9   :  { %v1898_v15 = vmul.f32 %v1681_v60, %v1517_v8  ;;  %v2858_v19 = vmul.f32 %v1681_v60, %v1558_v9  ;;  %v3804_v20 = vmul.f32 %v1681_v60, %v1435_v1  ;;  %v4762_v7 = vmul.f32 %v1681_v60, %v1476_v2  ;;  %v1685_v13 = vpop.f32.mrb[15].mxu0  ;;  %v1726_v26 = vpop.f32.mrb[15].mxu1 }
 0x1da   :  { %v1902_v21 = vmul.f32 %v1722_v63, %v1558_v9  ;;  %v2854_v16 = vmul.f32 %v1722_v63, %v1517_v8  ;;  %v3806_v24 = vmul.f32 %v1722_v63, %v1476_v2  ;;  %v4760_v25 = vmul.f32 %v1722_v63, %v1435_v1  ;;  %v2890_v26 = vld [vmem:[#allocation7 + $0x4d0] sm:$0xff] }
 0x1db   :  { %v1899_v29 = vmul.f32 %v1683_v4, %v8422_v17  ;;  %v2859_v30 = vmul.f32 %v1683_v4, %v1560_v18  ;;  %v3805_v34 = vmul.f32 %v1683_v4, %v8416_v3  ;;  %v4763_v52 = vmul.f32 %v1683_v4, %v8420_v6  ;;  %v1917_v4 = vld [vmem:[#allocation7 + $0x48] sm:$0xff] }
 0x1dc   :  { %v3808_v11 = vsub.f32 %v3804_v20, %v3806_v24  ;;  %v4764_v42 = vadd.f32 %v4762_v7, %v4760_v25  ;;  %v1900_v56 = vsub.f32 %v1896_v40, %v1898_v15  ;;  %v2856_v58 = vadd.f32 %v2854_v16, %v2852_v41  ;;  %v1921_v20 = vld [vmem:[#allocation7 + $0x68] sm:$0xff]  ;;  %v2878_v41 = vld [vmem:[#allocation7 + $0x470] sm:$0xff] }
 0x1dd   :  { %v1901_v57 = vsub.f32 %v1897_v54, %v1899_v29  ;;  %v1903_v59 = vmul.f32 %v1724_v43, %v1560_v18  ;;  %v2855_v9 = vmul.f32 %v1724_v43, %v8422_v17  ;;  %v3807_v2 = vmul.f32 %v1724_v43, %v8420_v6  ;;  %v2874_v54 = vld [vmem:[#allocation7 + $0x450] sm:$0xff]  ;;  %v1925_v17 = vld [vmem:[#allocation7 + $0x88] sm:$0xff] }
 0x1de   :  { %v4761_v1 = vmul.f32 %v1724_v43, %v8416_v3  ;;  %v1904_v8 = vsub.f32 %v1900_v56, %v1902_v21  ;;  %v2860_v60 = vsub.f32 %v2856_v58, %v2858_v19  ;;  %v7009_v3 = vcombine.high %v1917_v4, %v1921_v20  ;;  %v2886_v16 = vld [vmem:[#allocation7 + $0x4b0] sm:$0xff]  ;;  %v1949_v43 = vld [vmem:[#allocation7 + $0x148] sm:$0xff] }
 0x1df   :  { %v3809_v61 = vsub.f32 %v3805_v34, %v3807_v2  ;;  %v1905_v63 = vsub.f32 %v1901_v57, %v1903_v59  ;;  %v2857_v14 = vadd.f32 %v2855_v9, %v2853_v55  ;;  %v3812_v55 = vadd.f32 %v8424_v22, %v3808_v11  ;;  %v1953_v56 = vld [vmem:[#allocation7 + $0x168] sm:$0xff]  ;;  %v2906_v59 = vld [vmem:[#allocation7 + $0x550] sm:$0xff] }
 0x1e0   :  { %v4765_v62 = vadd.f32 %v4763_v52, %v4761_v1  ;;  %v8458_v5 = vpack.c.bf16 %v1904_v8, %v1904_v8  ;;  %v8467_v19 = vpack.c.bf16 %v2860_v60, %v2860_v60  ;;  %v7139_v12 = vcombine.high %v2874_v54, %v2878_v41  ;;  %v2898_v52 = vld [vmem:[#allocation7 + $0x510] sm:$0xff]  ;;  %v1957_v8 = vld [vmem:[#allocation7 + $0x188] sm:$0xff] }
 0x1e1   :  { %v8456_v7 = vpack.c.bf16 %v1905_v63, %v1905_v63  ;;  %v2861_v40 = vsub.f32 %v2857_v14, %v2859_v30  ;;  %v3813_v18 = vadd.f32 %v3811_v37, %v3809_v61  ;;  %v4768_v13 = vsub.f32 %v4764_v42, %v8430_v28  ;;  %v2910_v9 = vld [vmem:[#allocation7 + $0x570] sm:$0xff]  ;;  %v1961_v60 = vld [vmem:[#allocation7 + $0x1a8] sm:$0xff] }
 0x1e2   :  { %v4769_v37 = vsub.f32 %v4765_v62, %v8440_v53  ;;  %v7008_v21 = vcombine.low %v1917_v4, %v1921_v20  ;;  %v8476_v22 = vadd.f32 %v8428_v27, %v3812_v55  ;;  %v7017_v24 = vcombine.high %v1925_v17, %v1929_v10  ;;  %v2914_v63 = vld [vmem:[#allocation7 + $0x590] sm:$0xff] }
 0x1e3   :  { %2708 = vmatprep.mubr.bf16.mxu1 %v8456_v7  ;;  %v8461_v6 = vpack.c.bf16 %v2861_v40, %v2861_v40  ;;  %v8463_v15 = vadd.f32 %v3815_v47, %v3813_v18  ;;  %v2882_v47 = vld [vmem:[#allocation7 + $0x490] sm:$0xff]  ;;  %v7138_v31 = vcombine.low %v2874_v54, %v2878_v41  ;;  %v8488_v27 = vadd.f32 %v8426_v23, %v4768_v13  ;;  %v1965_v40 = vld [vmem:[#allocation7 + $0x1c8] sm:$0xff] }
 0x1e4   :  { %2709 = vmatmul.mubr.bf16.vlgmr.msra.gmra.mrb[24].mxu1 %v8458_v5  ;;  %v8481_v53 = vadd.f32 %v8435_v38, %v4769_v37  ;;  %v7147_v28 = vcombine.high %v2882_v47, %v2886_v16  ;;  %v7016_v25 = vcombine.low %v1925_v17, %v1929_v10  ;;  %v2894_v38 = vld [vmem:[#allocation7 + $0x4f0] sm:$0xff]  ;;  %v7146_v33 = vcombine.low %v2882_v47, %v2886_v16  ;;  %v1969_v54 = vld [vmem:[#allocation7 + $0x1e8] sm:$0xff] }
 0x1e5   :  { %3664 = vmatprep.mubr.bf16.mxu0 %v8461_v6  ;;  %2718 = vmatpush1.bf16.msra.mxu1 %v7000_v35  ;;  %v1937_v35 = vld [vmem:[#allocation7 + $0xe8] sm:$0xff]  ;;  %v7155_v30 = vcombine.high %v2890_v26, %v2894_v38  ;;  %v2902_v23 = vld [vmem:[#allocation7 + $0x530] sm:$0xff]  ;;  %v7154_v42 = vcombine.low %v2890_v26, %v2894_v38  ;;  %v7041_v2 = vcombine.high %v1949_v43, %v1953_v56 }
 0x1e6   :  { %3665 = vmatmul.mubr.bf16.vlgmr.msra.gmra.mrb[24].mxu0 %v8467_v19  ;;  %2749 = vmatprep.mubr.bf16.mxu1 %v8456_v7  ;;  %v7025_v29 = vcombine.high %v1933_v32, %v1937_v35  ;;  %v7024_v34 = vcombine.low %v1933_v32, %v1937_v35  ;;  %v7163_v57 = vcombine.high %v2898_v52, %v2902_v23  ;;  %v2918_v14 = vld [vmem:[#allocation7 + $0x5b0] sm:$0xff]  ;;  %v1977_v37 = vld [vmem:[#allocation7 + $0x228] sm:$0xff] }
 0x1e7   :  { %3715 = vmatpush1.bf16.msra.mxu0 %v7130_v39  ;;  %3746 = vmatprep.mubr.bf16.mxu0 %v8461_v6  ;;  %v1945_v39 = vld [vmem:[#allocation7 + $0x128] sm:$0xff]  ;;  %v7162_v1 = vcombine.low %v2898_v52, %v2902_v23  ;;  %v7171_v61 = vcombine.high %v2906_v59, %v2910_v9  ;;  %v7040_v62 = vcombine.low %v1949_v43, %v1953_v56  ;;  %v2926_v17 = vld [vmem:[#allocation7 + $0x5f0] sm:$0xff] }
 0x1e8   :  { %2719 = vmatprep.subr.bf16.mxu1 %v7009_v3  ;;  %3716 = vmatprep.subr.bf16.mxu0 %v7139_v12  ;;  %v7033_v11 = vcombine.high %v1941_v36, %v1945_v39  ;;  %v7032_v58 = vcombine.low %v1941_v36, %v1945_v39  ;;  %v7049_v4 = vcombine.high %v1957_v8, %v1961_v60  ;;  %v2922_v3 = vld [vmem:[#allocation7 + $0x5d0] sm:$0xff]  ;;  %v1973_v12 = vld [vmem:[#allocation7 + $0x208] sm:$0xff] }
 0x1e9   :  { %2720 = vmatpush1.bf16.msra.mxu1 %v7008_v21  ;;  %v7170_v20 = vcombine.low %v2906_v59, %v2910_v9  ;;  %v7179_v41 = vcombine.high %v2914_v63, %v2918_v14  ;;  %v7048_v18 = vcombine.low %v1957_v8, %v1961_v60  ;;  %v7057_v10 = vcombine.high %v1965_v40, %v1969_v54  ;;  %v2930_v47 = vld [vmem:[#allocation7 + $0x610] sm:$0xff]  ;;  %v1981_v32 = vld [vmem:[#allocation7 + $0x248] sm:$0xff] }
 0x1ea   :  { %2721 = vmatprep.subr.bf16.mxu1 %v7017_v24  ;;  %v7178_v55 = vcombine.low %v2914_v63, %v2918_v14  ;;  %v7187_v13 = vcombine.high %v2922_v3, %v2926_v17  ;;  %v7056_v21 = vcombine.low %v1965_v40, %v1969_v54  ;;  %v2934_v16 = vld [vmem:[#allocation7 + $0x630] sm:$0xff]  ;;  %v7065_v24 = vcombine.high %v1973_v12, %v1977_v37  ;;  %v1985_v35 = vld [vmem:[#allocation7 + $0x268] sm:$0xff] }
 0x1eb   :  { %3717 = vmatpush1.bf16.msra.mxu0 %v7138_v31  ;;  %v7186_v31 = vcombine.low %v2922_v3, %v2926_v17  ;;  %v2938_v26 = vld [vmem:[#allocation7 + $0x650] sm:$0xff]  ;;  %v1989_v36 = vld [vmem:[#allocation7 + $0x288] sm:$0xff] }
 0x1ec   :  { %3718 = vmatprep.subr.bf16.mxu0 %v7147_v28  ;;  %v7195_v28 = vcombine.high %v2930_v47, %v2934_v16  ;;  %v2942_v38 = vld [vmem:[#allocation7 + $0x670] sm:$0xff]  ;;  %v1993_v39 = vld [vmem:[#allocation7 + $0x2a8] sm:$0xff] }
 0x1ed   :  { %2722 = vmatpush1.bf16.msra.mxu1 %v7016_v25  ;;  %v7064_v25 = vcombine.low %v1973_v12, %v1977_v37  ;;  %v2946_v52 = vld [vmem:[#allocation7 + $0x690] sm:$0xff]  ;;  %v1997_v43 = vld [vmem:[#allocation7 + $0x2c8] sm:$0xff] }
 0x1ee   :  { %2723 = vmatprep.subr.bf16.mxu1 %v7025_v29  ;;  %v7073_v29 = vcombine.high %v1981_v32, %v1985_v35  ;;  %v2950_v23 = vld [vmem:[#allocation7 + $0x6b0] sm:$0xff]  ;;  %v2001_v56 = vld [vmem:[#allocation7 + $0x2e8] sm:$0xff] }
 0x1ef   :  { %3719 = vmatpush1.bf16.msra.mxu0 %v7146_v33  ;;  %v7194_v33 = vcombine.low %v2930_v47, %v2934_v16  ;;  %v2954_v59 = vld [vmem:[#allocation7 + $0x6d0] sm:$0xff]  ;;  %v2005_v8 = vld [vmem:[#allocation7 + $0x308] sm:$0xff] }
 0x1f0   :  { %3720 = vmatprep.subr.bf16.mxu0 %v7155_v30  ;;  %v7203_v30 = vcombine.high %v2938_v26, %v2942_v38  ;;  %v2958_v9 = vld [vmem:[#allocation7 + $0x6f0] sm:$0xff]  ;;  %v2009_v60 = vld [vmem:[#allocation7 + $0x328] sm:$0xff] }
 0x1f1   :  { %2724 = vmatpush1.bf16.msra.mxu1 %v7024_v34  ;;  %v7072_v34 = vcombine.low %v1981_v32, %v1985_v35  ;;  %v2962_v63 = vld [vmem:[#allocation7 + $0x710] sm:$0xff]  ;;  %v2013_v40 = vld [vmem:[#allocation7 + $0x348] sm:$0xff] }
 0x1f2   :  { %2725 = vmatprep.subr.bf16.mxu1 %v7033_v11  ;;  %v7081_v11 = vcombine.high %v1989_v36, %v1993_v39  ;;  %v2966_v14 = vld [vmem:[#allocation7 + $0x730] sm:$0xff]  ;;  %v2017_v54 = vld [vmem:[#allocation7 + $0x368] sm:$0xff] }
 0x1f3   :  { %3721 = vmatpush1.bf16.msra.mxu0 %v7154_v42  ;;  %v7202_v42 = vcombine.low %v2938_v26, %v2942_v38  ;;  %v2970_v3 = vld [vmem:[#allocation7 + $0x750] sm:$0xff]  ;;  %v2021_v12 = vld [vmem:[#allocation7 + $0x388] sm:$0xff] }
 0x1f4   :  { %3722 = vmatprep.subr.bf16.mxu0 %v7163_v57  ;;  %v7211_v57 = vcombine.high %v2946_v52, %v2950_v23  ;;  %v2974_v17 = vld [vmem:[#allocation7 + $0x770] sm:$0xff]  ;;  %v2025_v37 = vld [vmem:[#allocation7 + $0x3a8] sm:$0xff] }
 0x1f5   :  { %2726 = vmatpush1.bf16.msra.mxu1 %v7032_v58  ;;  %v7080_v58 = vcombine.low %v1989_v36, %v1993_v39  ;;  %v2978_v47 = vld [vmem:[#allocation7 + $0x790] sm:$0xff]  ;;  %v2029_v32 = vld [vmem:[#allocation7 + $0x3c8] sm:$0xff] }
 0x1f6   :  { %2727 = vmatprep.subr.bf16.mxu1 %v7041_v2  ;;  %v7089_v2 = vcombine.high %v1997_v43, %v2001_v56  ;;  %v2982_v16 = vld [vmem:[#allocation7 + $0x7b0] sm:$0xff]  ;;  %v2033_v35 = vld [vmem:[#allocation7 + $0x3e8] sm:$0xff] }
 0x1f7   :  { %3723 = vmatpush1.bf16.msra.mxu0 %v7162_v1  ;;  %v7210_v1 = vcombine.low %v2946_v52, %v2950_v23  ;;  %v2986_v26 = vld [vmem:[#allocation7 + $0x7d0] sm:$0xff]  ;;  %v3820_v52 = vld [vmem:[#allocation7 + $0x800] sm:$0xff] }
 0x1f8   :  { %3724 = vmatprep.subr.bf16.mxu0 %v7171_v61  ;;  %v7219_v61 = vcombine.high %v2954_v59, %v2958_v9  ;;  %v2990_v38 = vld [vmem:[#allocation7 + $0x7f0] sm:$0xff]  ;;  %v3824_v23 = vld [vmem:[#allocation7 + $0x820] sm:$0xff] }
 0x1f9   :  { %2728 = vmatpush1.bf16.msra.mxu1 %v7040_v62  ;;  %v7088_v62 = vcombine.low %v1997_v43, %v2001_v56  ;;  %v1910_v36 = vld [vmem:[#allocation7 + $0x10] sm:$0xff] }
 0x1fa   :  { %2729 = vmatprep.subr.bf16.mxu1 %v7049_v4  ;;  %v7097_v4 = vcombine.high %v2005_v8, %v2009_v60  ;;  %v1914_v39 = vld [vmem:[#allocation7 + $0x30] sm:$0xff] }
 0x1fb   :  { %3725 = vmatpush1.bf16.msra.mxu0 %v7170_v20  ;;  %v7218_v20 = vcombine.low %v2954_v59, %v2958_v9  ;;  %v1918_v43 = vld [vmem:[#allocation7 + $0x50] sm:$0xff]  ;;  %v3828_v59 = vld [vmem:[#allocation7 + $0x840] sm:$0xff] }
 0x1fc   :  { %3726 = vmatprep.subr.bf16.mxu0 %v7179_v41  ;;  %v7227_v41 = vcombine.high %v2962_v63, %v2966_v14  ;;  %v1922_v56 = vld [vmem:[#allocation7 + $0x70] sm:$0xff]  ;;  %v3832_v9 = vld [vmem:[#allocation7 + $0x860] sm:$0xff] }
 0x1fd   :  { %2730 = vmatpush1.bf16.msra.mxu1 %v7048_v18  ;;  %v7096_v18 = vcombine.low %v2005_v8, %v2009_v60  ;;  %v1926_v8 = vld [vmem:[#allocation7 + $0x90] sm:$0xff] }
 0x1fe   :  { %2731 = vmatprep.subr.bf16.mxu1 %v7057_v10  ;;  %v7105_v10 = vcombine.high %v2013_v40, %v2017_v54  ;;  %v1930_v60 = vld [vmem:[#allocation7 + $0xb0] sm:$0xff] }
 0x1ff   :  { %3727 = vmatpush1.bf16.msra.mxu0 %v7178_v55  ;;  %v7226_v55 = vcombine.low %v2962_v63, %v2966_v14  ;;  %v7010_v63 = vcombine.low %v1918_v43, %v1922_v56  ;;  %v3836_v14 = vld [vmem:[#allocation7 + $0x880] sm:$0xff] }
 0x200   :  { %3728 = vmatprep.subr.bf16.mxu0 %v7187_v13  ;;  %v7235_v13 = vcombine.high %v2970_v3, %v2974_v17 }
 0x201   :  { %2732 = vmatpush1.bf16.msra.mxu1 %v7056_v21  ;;  %v7104_v21 = vcombine.low %v2013_v40, %v2017_v54  ;;  %v7262_v40 = vcombine.low %v3828_v59, %v3832_v9  ;;  %v1934_v54 = vld [vmem:[#allocation7 + $0xd0] sm:$0xff] }
 0x202   :  { %2733 = vmatprep.subr.bf16.mxu1 %v7065_v24  ;;  %v7113_v24 = vcombine.high %v2021_v12, %v2025_v37 }
 0x203   :  { %3729 = vmatpush1.bf16.msra.mxu0 %v7186_v31  ;;  %v7234_v31 = vcombine.low %v2970_v3, %v2974_v17  ;;  %v7018_v3 = vcombine.low %v1926_v8, %v1930_v60  ;;  %v3844_v17 = vld [vmem:[#allocation7 + $0x8c0] sm:$0xff] }
 0x204   :  { %3730 = vmatprep.subr.bf16.mxu0 %v7195_v28  ;;  %v7243_v28 = vcombine.high %v2978_v47, %v2982_v16 }
 0x205   :  { %2734 = vmatpush1.bf16.msra.mxu1 %v7064_v25  ;;  %v7112_v25 = vcombine.low %v2021_v12, %v2025_v37  ;;  %v1942_v12 = vld [vmem:[#allocation7 + $0x110] sm:$0xff] }
 0x206   :  { %2735 = vmatprep.subr.bf16.mxu1 %v7073_v29  ;;  %v7121_v29 = vcombine.high %v2029_v32, %v2033_v35  ;;  %v1946_v37 = vld [vmem:[#allocation7 + $0x130] sm:$0xff] }
 0x207   :  { %3731 = vmatpush1.bf16.msra.mxu0 %v7194_v33  ;;  %v7242_v33 = vcombine.low %v2978_v47, %v2982_v16  ;;  %v3852_v47 = vld [vmem:[#allocation7 + $0x900] sm:$0xff] }
 0x208   :  { %3732 = vmatprep.subr.bf16.mxu0 %v7203_v30  ;;  %v7251_v30 = vcombine.high %v2986_v26, %v2990_v38  ;;  %v3856_v16 = vld [vmem:[#allocation7 + $0x920] sm:$0xff] }
 0x209   :  { %2736 = vmatpush1.bf16.msra.mxu1 %v7072_v34  ;;  %v7120_v34 = vcombine.low %v2029_v32, %v2033_v35  ;;  %v1950_v32 = vld [vmem:[#allocation7 + $0x150] sm:$0xff] }
 0x20a   :  { %2737 = vmatprep.subr.bf16.mxu1 %v7081_v11  ;;  %v7003_v11 = vcombine.high %v1910_v36, %v1914_v39  ;;  %v1954_v35 = vld [vmem:[#allocation7 + $0x170] sm:$0xff] }
 0x20b   :  { %3733 = vmatpush1.bf16.msra.mxu0 %v7202_v42  ;;  %v7250_v42 = vcombine.low %v2986_v26, %v2990_v38  ;;  %v3860_v26 = vld [vmem:[#allocation7 + $0x940] sm:$0xff] }
 0x20c   :  { %3734 = vmatprep.subr.bf16.mxu0 %v7211_v57  ;;  %v7255_v57 = vcombine.high %v3820_v52, %v3824_v23  ;;  %v3864_v38 = vld [vmem:[#allocation7 + $0x960] sm:$0xff] }
 0x20d   :  { %2738 = vmatpush1.bf16.msra.mxu1 %v7080_v58  ;;  %v7002_v58 = vcombine.low %v1910_v36, %v1914_v39  ;;  %v1958_v36 = vld [vmem:[#allocation7 + $0x190] sm:$0xff] }
 0x20e   :  { %2739 = vmatprep.subr.bf16.mxu1 %v7089_v2  ;;  %v7011_v2 = vcombine.high %v1918_v43, %v1922_v56  ;;  %v1962_v39 = vld [vmem:[#allocation7 + $0x1b0] sm:$0xff] }
 0x20f   :  { %3735 = vmatpush1.bf16.msra.mxu0 %v7210_v1  ;;  %v7254_v1 = vcombine.low %v3820_v52, %v3824_v23  ;;  %v3868_v52 = vld [vmem:[#allocation7 + $0x980] sm:$0xff]  ;;  %v1966_v43 = vld [vmem:[#allocation7 + $0x1d0] sm:$0xff] }
 0x210   :  { %3736 = vmatprep.subr.bf16.mxu0 %v7219_v61  ;;  %v7263_v61 = vcombine.high %v3828_v59, %v3832_v9  ;;  %v3872_v23 = vld [vmem:[#allocation7 + $0x9a0] sm:$0xff]  ;;  %v1970_v56 = vld [vmem:[#allocation7 + $0x1f0] sm:$0xff]  ;;  %v7050_v9 = vcombine.low %v1958_v36, %v1962_v39 }
 0x211   :  { %2740 = vmatpush1.bf16.msra.mxu1 %v7088_v62  ;;  %v8494_v62 = vpack.c.bf16 %v8463_v15, %v8463_v15  ;;  %v3848_v15 = vld [vmem:[#allocation7 + $0x8e0] sm:$0xff] }
 0x212   :  { %2741 = vmatprep.subr.bf16.mxu1 %v7097_v4  ;;  %v3840_v4 = vld [vmem:[#allocation7 + $0x8a0] sm:$0xff] }
 0x213   :  { %3737 = vmatpush1.bf16.msra.mxu0 %v7218_v20  ;;  %v7019_v20 = vcombine.high %v1926_v8, %v1930_v60  ;;  %v7059_v60 = vcombine.high %v1966_v43, %v1970_v56 }
 0x214   :  { %3738 = vmatprep.subr.bf16.mxu0 %v7227_v41  ;;  %v1938_v41 = vld [vmem:[#allocation7 + $0xf0] sm:$0xff] }
 0x215   :  { %2742 = vmatpush1.bf16.msra.mxu1 %v7096_v18  ;;  %v7271_v18 = vcombine.high %v3836_v14, %v3840_v4 }
 0x216   :  { %2743 = vmatprep.subr.bf16.mxu1 %v7105_v10  ;;  %v7027_v10 = vcombine.high %v1934_v54, %v1938_v41 }
 0x217   :  { %3739 = vmatpush1.bf16.msra.mxu0 %v7226_v55  ;;  %v7270_v55 = vcombine.low %v3836_v14, %v3840_v4  ;;  %v1974_v14 = vld [vmem:[#allocation7 + $0x210] sm:$0xff] }
 0x218   :  { %3740 = vmatprep.subr.bf16.mxu0 %v7235_v13  ;;  %v7279_v13 = vcombine.high %v3844_v17, %v3848_v15  ;;  %v1978_v4 = vld [vmem:[#allocation7 + $0x230] sm:$0xff] }
 0x219   :  { %2744 = vmatpush1.bf16.msra.mxu1 %v7104_v21  ;;  %v7026_v21 = vcombine.low %v1934_v54, %v1938_v41  ;;  %v3884_v54 = vld [vmem:[#allocation7 + $0xa00] sm:$0xff] }
 0x21a   :  { %2745 = vmatprep.subr.bf16.mxu1 %v7113_v24  ;;  %v7035_v24 = vcombine.high %v1942_v12, %v1946_v37  ;;  %v3888_v41 = vld [vmem:[#allocation7 + $0xa20] sm:$0xff] }
 0x21b   :  { %3741 = vmatpush1.bf16.msra.mxu0 %v7234_v31  ;;  %v7278_v31 = vcombine.low %v3844_v17, %v3848_v15  ;;  %v1982_v17 = vld [vmem:[#allocation7 + $0x250] sm:$0xff] }
 0x21c   :  { %3742 = vmatprep.subr.bf16.mxu0 %v7243_v28  ;;  %v7287_v28 = vcombine.high %v3852_v47, %v3856_v16  ;;  %v1986_v15 = vld [vmem:[#allocation7 + $0x270] sm:$0xff] }
 0x21d   :  { %2746 = vmatpush1.bf16.msra.mxu1 %v7112_v25  ;;  %v7034_v25 = vcombine.low %v1942_v12, %v1946_v37  ;;  %v3892_v12 = vld [vmem:[#allocation7 + $0xa40] sm:$0xff] }
 0x21e   :  { %2747 = vmatprep.subr.bf16.mxu1 %v7121_v29  ;;  %v7043_v29 = vcombine.high %v1950_v32, %v1954_v35  ;;  %v3896_v37 = vld [vmem:[#allocation7 + $0xa60] sm:$0xff] }
 0x21f   :  { %3743 = vmatpush1.bf16.msra.mxu0 %v7242_v33  ;;  %v7286_v33 = vcombine.low %v3852_v47, %v3856_v16  ;;  %v1990_v47 = vld [vmem:[#allocation7 + $0x290] sm:$0xff] }
 0x220   :  { %3744 = vmatprep.subr.bf16.mxu0 %v7251_v30  ;;  %v7295_v30 = vcombine.high %v3860_v26, %v3864_v38  ;;  %v1994_v16 = vld [vmem:[#allocation7 + $0x2b0] sm:$0xff] }
 0x221   :  { %2748 = vmatpush1.bf16.msra.mxu1 %v7120_v34  ;;  %v7042_v34 = vcombine.low %v1950_v32, %v1954_v35  ;;  %v3900_v32 = vld [vmem:[#allocation7 + $0xa80] sm:$0xff] }
 0x222   :  { %2758 = vmatprep.subr.bf16.mxu1 %v7003_v11  ;;  %v7051_v11 = vcombine.high %v1958_v36, %v1962_v39  ;;  %v3904_v35 = vld [vmem:[#allocation7 + $0xaa0] sm:$0xff] }
 0x223   :  { %3745 = vmatpush1.bf16.msra.mxu0 %v7250_v42  ;;  %v7294_v42 = vcombine.low %v3860_v26, %v3864_v38  ;;  %v1998_v26 = vld [vmem:[#allocation7 + $0x2d0] sm:$0xff]  ;;  %v3908_v36 = vld [vmem:[#allocation7 + $0xac0] sm:$0xff] }
 0x224   :  { %2750 = vmatmul.mubr.bf16.vlgmr.msra.gmra.mrb[16].mxu1 %v8458_v5  ;;  %4588 = vmatprep.subr.bf16.mxu0 %v7255_v57  ;;  %v8498_v57 = vpop.f32.mrb[16].mxu0  ;;  %v2002_v38 = vld [vmem:[#allocation7 + $0x2f0] sm:$0xff]  ;;  %v3912_v39 = vld [vmem:[#allocation7 + $0xae0] sm:$0xff] }
 0x225   :  { %2759 = vmatpush1.bf16.msra.mxu1 %v7002_v58  ;;  %2790 = vmatprep.mubr.bf16.mxu1 %v8456_v7  ;;  %v7303_v58 = vcombine.high %v3868_v52, %v3872_v23  ;;  %v8500_v59 = vpop.f32.mrb[17].mxu0 }
 0x226   :  { %3747 = vmatmul.mubr.bf16.vlgmr.msra.gmra.mrb[28].mxu0 %v8467_v19  ;;  %2760 = vmatprep.subr.bf16.mxu1 %v7011_v2  ;;  %v3876_v2 = vld [vmem:[#allocation7 + $0x9c0] sm:$0xff]  ;;  %v1766_v8 = vpop.f32.mrb[18].mxu0 }
 0x227   :  { %4589 = vmatpush1.bf16.msra.mxu0 %v7254_v1  ;;  %4620 = vmatprep.mubr.bf16.mxu0 %v8494_v62  ;;  %v3880_v1 = vld [vmem:[#allocation7 + $0x9e0] sm:$0xff] }
 0x228   :  { %4590 = vmatprep.subr.bf16.mxu0 %v7263_v61  ;;  %v1767_v61 = vpop.f32.mrb[19].mxu0 }
 0x229   :  { %2761 = vmatpush1.bf16.msra.mxu1 %v7010_v63  ;;  %v7302_v63 = vcombine.low %v3868_v52, %v3872_v23  ;;  %v2006_v52 = vld [vmem:[#allocation7 + $0x310] sm:$0xff]  ;;  %v3924_v61 = vld [vmem:[#allocation7 + $0xb40] sm:$0xff] }
 0x22a   :  { %2762 = vmatprep.subr.bf16.mxu1 %v7019_v20  ;;  %v7311_v20 = vcombine.high %v3876_v2, %v3880_v1  ;;  %v2010_v23 = vld [vmem:[#allocation7 + $0x330] sm:$0xff] }
 0x22b   :  { %4591 = vmatpush1.bf16.msra.mxu0 %v7262_v40  ;;  %v7058_v40 = vcombine.low %v1966_v43, %v1970_v56  ;;  %v3916_v43 = vld [vmem:[#allocation7 + $0xb00] sm:$0xff] }
 0x22c   :  { %4592 = vmatprep.subr.bf16.mxu0 %v7271_v18  ;;  %v7067_v18 = vcombine.high %v1974_v14, %v1978_v4  ;;  %v3920_v56 = vld [vmem:[#allocation7 + $0xb20] sm:$0xff] }
 0x22d   :  { %2763 = vmatpush1.bf16.msra.mxu1 %v7018_v3  ;;  %v7310_v3 = vcombine.low %v3876_v2, %v3880_v1  ;;  %v2014_v2 = vld [vmem:[#allocation7 + $0x350] sm:$0xff]  ;;  %v7351_v8 = vcombine.high %v3916_v43, %v3920_v56 }
 0x22e   :  { %2764 = vmatprep.subr.bf16.mxu1 %v7027_v10  ;;  %v7319_v10 = vcombine.high %v3884_v54, %v3888_v41  ;;  %v2018_v1 = vld [vmem:[#allocation7 + $0x370] sm:$0xff] }
 0x22f   :  { %4593 = vmatpush1.bf16.msra.mxu0 %v7270_v55  ;;  %v7066_v55 = vcombine.low %v1974_v14, %v1978_v4  ;;  %v7107_v14 = vcombine.high %v2014_v2, %v2018_v1  ;;  %v7350_v4 = vcombine.low %v3916_v43, %v3920_v56  ;;  %v8505_v43 = vpack.c.bf16 %v8476_v22, %v8476_v22 }
 0x230   :  { %4594 = vmatprep.subr.bf16.mxu0 %v7279_v13  ;;  %v7075_v13 = vcombine.high %v1982_v17, %v1986_v15 }
 0x231   :  { %2765 = vmatpush1.bf16.msra.mxu1 %v7026_v21  ;;  %v7318_v21 = vcombine.low %v3884_v54, %v3888_v41  ;;  %v7106_v41 = vcombine.low %v2014_v2, %v2018_v1  ;;  %v3842_v2 = vld [vmem:[#allocation7 + $0x8b0] sm:$0xff] }
 0x232   :  { %2766 = vmatprep.subr.bf16.mxu1 %v7035_v24  ;;  %v7327_v24 = vcombine.high %v3892_v12, %v3896_v37 }
 0x233   :  { %4595 = vmatpush1.bf16.msra.mxu0 %v7278_v31  ;;  %v7074_v31 = vcombine.low %v1982_v17, %v1986_v15 }
 0x234   :  { %4596 = vmatprep.subr.bf16.mxu0 %v7287_v28  ;;  %v7083_v28 = vcombine.high %v1990_v47, %v1994_v16 }
 0x235   :  { %2767 = vmatpush1.bf16.msra.mxu1 %v7034_v25  ;;  %v7326_v25 = vcombine.low %v3892_v12, %v3896_v37 }
 0x236   :  { %2768 = vmatprep.subr.bf16.mxu1 %v7043_v29  ;;  %v7335_v29 = vcombine.high %v3900_v32, %v3904_v35 }
 0x237   :  { %4597 = vmatpush1.bf16.msra.mxu0 %v7286_v33  ;;  %v7082_v33 = vcombine.low %v1990_v47, %v1994_v16 }
 0x238   :  { %4598 = vmatprep.subr.bf16.mxu0 %v7295_v30  ;;  %v7091_v30 = vcombine.high %v1998_v26, %v2002_v38 }
 0x239   :  { %2769 = vmatpush1.bf16.msra.mxu1 %v7042_v34  ;;  %v7334_v34 = vcombine.low %v3900_v32, %v3904_v35 }
 0x23a   :  { %2770 = vmatprep.subr.bf16.mxu1 %v7051_v11  ;;  %v7343_v11 = vcombine.high %v3908_v36, %v3912_v39 }
 0x23b   :  { %4599 = vmatpush1.bf16.msra.mxu0 %v7294_v42  ;;  %v7090_v42 = vcombine.low %v1998_v26, %v2002_v38 }
 0x23c   :  { %4600 = vmatprep.subr.bf16.mxu0 %v7303_v58  ;;  %v7099_v58 = vcombine.high %v2006_v52, %v2010_v23 }
 0x23d   :  { %2771 = vmatpush1.bf16.msra.mxu1 %v7050_v9  ;;  %v7342_v9 = vcombine.low %v3908_v36, %v3912_v39 }
 0x23e   :  { %2772 = vmatprep.subr.bf16.mxu1 %v7059_v60  ;;  %v7098_v60 = vcombine.low %v2006_v52, %v2010_v23 }
 0x23f   :  { %4601 = vmatpush1.bf16.msra.mxu0 %v7302_v63  ;;  %v3928_v63 = vld [vmem:[#allocation7 + $0xb60] sm:$0xff] }
 0x240   :  { %4602 = vmatprep.subr.bf16.mxu0 %v7311_v20  ;;  %v2022_v20 = vld [vmem:[#allocation7 + $0x390] sm:$0xff]  ;;  %v7359_v54 = vcombine.high %v3924_v61, %v3928_v63  ;;  %v7358_v15 = vcombine.low %v3924_v61, %v3928_v63  ;;  %v1939_v61 = vld [vmem:[#allocation7 + $0xf8] sm:$0xff] }
 0x241   :  { %2773 = vmatpush1.bf16.msra.mxu1 %v7058_v40  ;;  %v2026_v40 = vld [vmem:[#allocation7 + $0x3b0] sm:$0xff] }
 0x242   :  { %2774 = vmatprep.subr.bf16.mxu1 %v7067_v18  ;;  %v3932_v18 = vld [vmem:[#allocation7 + $0xb80] sm:$0xff]  ;;  %v7115_v17 = vcombine.high %v2022_v20, %v2026_v40  ;;  %v7114_v37 = vcombine.low %v2022_v20, %v2026_v40  ;;  %v1943_v40 = vld [vmem:[#allocation7 + $0x118] sm:$0xff] }
 0x243   :  { %4603 = vmatpush1.bf16.msra.mxu0 %v7310_v3  ;;  %v3936_v3 = vld [vmem:[#allocation7 + $0xba0] sm:$0xff] }
 0x244   :  { %4604 = vmatprep.subr.bf16.mxu0 %v7319_v10  ;;  %v2030_v10 = vld [vmem:[#allocation7 + $0x3d0] sm:$0xff]  ;;  %v7367_v12 = vcombine.high %v3932_v18, %v3936_v3  ;;  %v7366_v16 = vcombine.low %v3932_v18, %v3936_v3 }
 0x245   :  { %2775 = vmatpush1.bf16.msra.mxu1 %v7066_v55  ;;  %v2034_v55 = vld [vmem:[#allocation7 + $0x3f0] sm:$0xff] }
 0x246   :  { %2776 = vmatprep.subr.bf16.mxu1 %v7075_v13  ;;  %v3940_v13 = vld [vmem:[#allocation7 + $0xbc0] sm:$0xff]  ;;  %v7123_v47 = vcombine.high %v2030_v10, %v2034_v55  ;;  %v7122_v35 = vcombine.low %v2030_v10, %v2034_v55  ;;  %v3854_v3 = vld [vmem:[#allocation7 + $0x910] sm:$0xff]  ;;  %v1951_v55 = vld [vmem:[#allocation7 + $0x158] sm:$0xff] }
 0x247   :  { %4605 = vmatpush1.bf16.msra.mxu0 %v7318_v21  ;;  %v3944_v21 = vld [vmem:[#allocation7 + $0xbe0] sm:$0xff] }
 0x248   :  { %4606 = vmatprep.subr.bf16.mxu0 %v7327_v24  ;;  %v1911_v24 = vld [vmem:[#allocation7 + $0x18] sm:$0xff]  ;;  %v7375_v32 = vcombine.high %v3940_v13, %v3944_v21  ;;  %v7374_v38 = vcombine.low %v3940_v13, %v3944_v21  ;;  %v3862_v21 = vld [vmem:[#allocation7 + $0x950] sm:$0xff] }
 0x249   :  { %2777 = vmatpush1.bf16.msra.mxu1 %v7074_v31  ;;  %v1915_v31 = vld [vmem:[#allocation7 + $0x38] sm:$0xff] }
 0x24a   :  { %2778 = vmatprep.subr.bf16.mxu1 %v7083_v28  ;;  %v3822_v28 = vld [vmem:[#allocation7 + $0x810] sm:$0xff]  ;;  %v7005_v26 = vcombine.high %v1911_v24, %v1915_v31  ;;  %v7004_v39 = vcombine.low %v1911_v24, %v1915_v31  ;;  %v1959_v31 = vld [vmem:[#allocation7 + $0x198] sm:$0xff] }
 0x24b   :  { %4607 = vmatpush1.bf16.msra.mxu0 %v7326_v25  ;;  %v3826_v25 = vld [vmem:[#allocation7 + $0x830] sm:$0xff] }
 0x24c   :  { %4608 = vmatprep.subr.bf16.mxu0 %v7335_v29  ;;  %v1919_v29 = vld [vmem:[#allocation7 + $0x58] sm:$0xff]  ;;  %v7259_v36 = vcombine.high %v3822_v28, %v3826_v25  ;;  %v7258_v23 = vcombine.low %v3822_v28, %v3826_v25  ;;  %v3870_v25 = vld [vmem:[#allocation7 + $0x990] sm:$0xff] }
 0x24d   :  { %2779 = vmatpush1.bf16.msra.mxu1 %v7082_v33  ;;  %v1923_v33 = vld [vmem:[#allocation7 + $0x78] sm:$0xff] }
 0x24e   :  { %2780 = vmatprep.subr.bf16.mxu1 %v7091_v30  ;;  %v3830_v30 = vld [vmem:[#allocation7 + $0x850] sm:$0xff]  ;;  %v7013_v52 = vcombine.high %v1919_v29, %v1923_v33 }
 0x24f   :  { %4609 = vmatpush1.bf16.msra.mxu0 %v7334_v34  ;;  %v3834_v34 = vld [vmem:[#allocation7 + $0x870] sm:$0xff] }
 0x250   :  { %4610 = vmatprep.subr.bf16.mxu0 %v7343_v11  ;;  %v1927_v11 = vld [vmem:[#allocation7 + $0x98] sm:$0xff]  ;;  %v7267_v56 = vcombine.high %v3830_v30, %v3834_v34 }
 0x251   :  { %2781 = vmatpush1.bf16.msra.mxu1 %v7090_v42  ;;  %v1931_v42 = vld [vmem:[#allocation7 + $0xb8] sm:$0xff] }
 0x252   :  { %2782 = vmatprep.subr.bf16.mxu1 %v7099_v58  ;;  %v7012_v58 = vcombine.low %v1919_v29, %v1923_v33  ;;  %v7021_v1 = vcombine.high %v1927_v11, %v1931_v42  ;;  %v7020_v63 = vcombine.low %v1927_v11, %v1931_v42  ;;  %v1967_v33 = vld [vmem:[#allocation7 + $0x1d8] sm:$0xff] }
 0x253   :  { %4611 = vmatpush1.bf16.msra.mxu0 %v7342_v9  ;;  %v3838_v9 = vld [vmem:[#allocation7 + $0x890] sm:$0xff]  ;;  %v1975_v42 = vld [vmem:[#allocation7 + $0x218] sm:$0xff] }
 0x254   :  { %4612 = vmatprep.subr.bf16.mxu0 %v7351_v8  ;;  %v7266_v8 = vcombine.low %v3830_v30, %v3834_v34  ;;  %v7275_v22 = vcombine.high %v3838_v9, %v3842_v2  ;;  %v7274_v20 = vcombine.low %v3838_v9, %v3842_v2  ;;  %v3878_v34 = vld [vmem:[#allocation7 + $0x9d0] sm:$0xff] }
 0x255   :  { %2783 = vmatpush1.bf16.msra.mxu1 %v7098_v60  ;;  %v1935_v60 = vld [vmem:[#allocation7 + $0xd8] sm:$0xff]  ;;  %v3886_v2 = vld [vmem:[#allocation7 + $0xa10] sm:$0xff] }
 0x256   :  { %2784 = vmatprep.subr.bf16.mxu1 %v7107_v14  ;;  %v3846_v14 = vld [vmem:[#allocation7 + $0x8d0] sm:$0xff]  ;;  %v7028_v18 = vcombine.low %v1935_v60, %v1939_v61 }
 0x257   :  { %4613 = vmatpush1.bf16.msra.mxu0 %v7350_v4  ;;  %v3850_v4 = vld [vmem:[#allocation7 + $0x8f0] sm:$0xff] }
 0x258   :  { %4614 = vmatprep.subr.bf16.mxu0 %v7359_v54  ;;  %v1947_v54 = vld [vmem:[#allocation7 + $0x138] sm:$0xff]  ;;  %v7282_v10 = vcombine.low %v3846_v14, %v3850_v4 }
 0x259   :  { %2785 = vmatpush1.bf16.msra.mxu1 %v7106_v41  ;;  %v7283_v41 = vcombine.high %v3846_v14, %v3850_v4  ;;  %v7036_v13 = vcombine.low %v1943_v40, %v1947_v54  ;;  %v3894_v4 = vld [vmem:[#allocation7 + $0xa50] sm:$0xff] }
 0x25a   :  { %2786 = vmatprep.subr.bf16.mxu1 %v7115_v17  ;;  %v3858_v17 = vld [vmem:[#allocation7 + $0x930] sm:$0xff] }
 0x25b   :  { %4615 = vmatpush1.bf16.msra.mxu0 %v7358_v15  ;;  %v7037_v15 = vcombine.high %v1943_v40, %v1947_v54  ;;  %v7290_v24 = vcombine.low %v3854_v3, %v3858_v17  ;;  %v1991_v54 = vld [vmem:[#allocation7 + $0x298] sm:$0xff] }
 0x25c   :  { %4616 = vmatprep.subr.bf16.mxu0 %v7367_v12  ;;  %v1955_v12 = vld [vmem:[#allocation7 + $0x178] sm:$0xff] }
 0x25d   :  { %2787 = vmatpush1.bf16.msra.mxu1 %v7114_v37  ;;  %v7291_v37 = vcombine.high %v3854_v3, %v3858_v17  ;;  %v7044_v28 = vcombine.low %v1951_v55, %v1955_v12  ;;  %v3902_v17 = vld [vmem:[#allocation7 + $0xa90] sm:$0xff] }
 0x25e   :  { %2788 = vmatprep.subr.bf16.mxu1 %v7123_v47  ;;  %v3866_v47 = vld [vmem:[#allocation7 + $0x970] sm:$0xff] }
 0x25f   :  { %4617 = vmatpush1.bf16.msra.mxu0 %v7366_v16  ;;  %v7045_v16 = vcombine.high %v1951_v55, %v1955_v12  ;;  %v7298_v29 = vcombine.low %v3862_v21, %v3866_v47  ;;  %v1999_v12 = vld [vmem:[#allocation7 + $0x2d8] sm:$0xff] }
 0x260   :  { %4618 = vmatprep.subr.bf16.mxu0 %v7375_v32  ;;  %v1963_v32 = vld [vmem:[#allocation7 + $0x1b8] sm:$0xff] }
 0x261   :  { %2789 = vmatpush1.bf16.msra.mxu1 %v7122_v35  ;;  %v7299_v35 = vcombine.high %v3862_v21, %v3866_v47  ;;  %v7052_v30 = vcombine.low %v1959_v31, %v1963_v32  ;;  %v3910_v47 = vld [vmem:[#allocation7 + $0xad0] sm:$0xff] }
 0x262   :  { %2799 = vmatprep.subr.bf16.mxu1 %v7005_v26  ;;  %v3874_v26 = vld [vmem:[#allocation7 + $0x9b0] sm:$0xff] }
 0x263   :  { %4619 = vmatpush1.bf16.msra.mxu0 %v7374_v38  ;;  %v7053_v38 = vcombine.high %v1959_v31, %v1963_v32  ;;  %v7306_v11 = vcombine.low %v3870_v25, %v3874_v26  ;;  %v2007_v32 = vld [vmem:[#allocation7 + $0x318] sm:$0xff] }
 0x264   :  { %2791 = vmatmul.mubr.bf16.vlgmr.msra.gmra.mrb[28].mxu1 %v8458_v5  ;;  %4670 = vmatprep.subr.bf16.mxu0 %v7259_v36  ;;  %v1971_v36 = vld [vmem:[#allocation7 + $0x1f8] sm:$0xff] }
 0x265   :  { %2800 = vmatpush1.bf16.msra.mxu1 %v7004_v39  ;;  %2831 = vmatprep.mubr.bf16.mxu1 %v8456_v7  ;;  %v7029_v7 = vcombine.high %v1935_v60, %v1939_v61  ;;  %v7307_v39 = vcombine.high %v3870_v25, %v3874_v26  ;;  %v7060_v9 = vcombine.low %v1967_v33, %v1971_v36  ;;  %v1983_v61 = vld [vmem:[#allocation7 + $0x258] sm:$0xff]  ;;  %v3918_v26 = vld [vmem:[#allocation7 + $0xb10] sm:$0xff] }
 0x266   :  { %4621 = vmatmul.mubr.bf16.vlgmr.msra.gmra.mrb[24].mxu0 %v8505_v43  ;;  %2801 = vmatprep.subr.bf16.mxu1 %v7013_v52  ;;  %v3882_v52 = vld [vmem:[#allocation7 + $0x9f0] sm:$0xff] }
 0x267   :  { %4671 = vmatpush1.bf16.msra.mxu0 %v7258_v23  ;;  %4702 = vmatprep.mubr.bf16.mxu0 %v8494_v62  ;;  %v7061_v23 = vcombine.high %v1967_v33, %v1971_v36  ;;  %v7314_v60 = vcombine.low %v3878_v34, %v3882_v52  ;;  %v2015_v36 = vld [vmem:[#allocation7 + $0x358] sm:$0xff] }
 0x268   :  { %4672 = vmatprep.subr.bf16.mxu0 %v7267_v56  ;;  %v1979_v56 = vld [vmem:[#allocation7 + $0x238] sm:$0xff] }
 0x269   :  { %2802 = vmatpush1.bf16.msra.mxu1 %v7012_v58  ;;  %v7315_v58 = vcombine.high %v3878_v34, %v3882_v52  ;;  %v7068_v14 = vcombine.low %v1975_v42, %v1979_v56  ;;  %v3926_v52 = vld [vmem:[#allocation7 + $0xb50] sm:$0xff] }
 0x26a   :  { %2803 = vmatprep.subr.bf16.mxu1 %v7021_v1  ;;  %v3890_v1 = vld [vmem:[#allocation7 + $0xa30] sm:$0xff] }
 0x26b   :  { %4673 = vmatpush1.bf16.msra.mxu0 %v7266_v8  ;;  %v7069_v8 = vcombine.high %v1975_v42, %v1979_v56  ;;  %v7322_v40 = vcombine.low %v3886_v2, %v3890_v1  ;;  %v2023_v56 = vld [vmem:[#allocation7 + $0x398] sm:$0xff] }
 0x26c   :  { %4674 = vmatprep.subr.bf16.mxu0 %v7275_v22  ;;  %v1987_v22 = vld [vmem:[#allocation7 + $0x278] sm:$0xff] }
 0x26d   :  { %2804 = vmatpush1.bf16.msra.mxu1 %v7020_v63  ;;  %v7323_v63 = vcombine.high %v3886_v2, %v3890_v1  ;;  %v7076_v3 = vcombine.low %v1983_v61, %v1987_v22  ;;  %v3934_v1 = vld [vmem:[#allocation7 + $0xb90] sm:$0xff] }
 0x26e   :  { %2805 = vmatprep.subr.bf16.mxu1 %v7029_v7  ;;  %v3898_v7 = vld [vmem:[#allocation7 + $0xa70] sm:$0xff] }
 0x26f   :  { %4675 = vmatpush1.bf16.msra.mxu0 %v7274_v20  ;;  %v7077_v20 = vcombine.high %v1983_v61, %v1987_v22  ;;  %v7330_v55 = vcombine.low %v3894_v4, %v3898_v7  ;;  %v2031_v22 = vld [vmem:[#allocation7 + $0x3d8] sm:$0xff] }
 0x270   :  { %4676 = vmatprep.subr.bf16.mxu0 %v7283_v41  ;;  %v1995_v41 = vld [vmem:[#allocation7 + $0x2b8] sm:$0xff] }
 0x271   :  { %2806 = vmatpush1.bf16.msra.mxu1 %v7028_v18  ;;  %v7331_v18 = vcombine.high %v3894_v4, %v3898_v7  ;;  %v7084_v21 = vcombine.low %v1991_v54, %v1995_v41  ;;  %v3942_v7 = vld [vmem:[#allocation7 + $0xbd0] sm:$0xff] }
 0x272   :  { %2807 = vmatprep.subr.bf16.mxu1 %v7037_v15  ;;  %v3906_v15 = vld [vmem:[#allocation7 + $0xab0] sm:$0xff] }
 0x273   :  { %4677 = vmatpush1.bf16.msra.mxu0 %v7282_v10  ;;  %v7085_v10 = vcombine.high %v1991_v54, %v1995_v41  ;;  %v7338_v31 = vcombine.low %v3902_v17, %v3906_v15  ;;  %v2865_v41 = vld [vmem:[#allocation7 + $0x408] sm:$0xff] }
 0x274   :  { %4678 = vmatprep.subr.bf16.mxu0 %v7291_v37  ;;  %v2003_v37 = vld [vmem:[#allocation7 + $0x2f8] sm:$0xff] }
 0x275   :  { %2808 = vmatpush1.bf16.msra.mxu1 %v7036_v13  ;;  %v7339_v13 = vcombine.high %v3902_v17, %v3906_v15  ;;  %v7092_v25 = vcombine.low %v1999_v12, %v2003_v37  ;;  %v4776_v15 = vld [vmem:[#allocation7 + $0xc00] sm:$0xff] }
 0x276   :  { %2809 = vmatprep.subr.bf16.mxu1 %v7045_v16  ;;  %v3914_v16 = vld [vmem:[#allocation7 + $0xaf0] sm:$0xff] }
 0x277   :  { %4679 = vmatpush1.bf16.msra.mxu0 %v7290_v24  ;;  %v7093_v24 = vcombine.high %v1999_v12, %v2003_v37  ;;  %v7346_v33 = vcombine.low %v3910_v47, %v3914_v16  ;;  %v2873_v37 = vld [vmem:[#allocation7 + $0x448] sm:$0xff] }
 0x278   :  { %4680 = vmatprep.subr.bf16.mxu0 %v7299_v35  ;;  %v2011_v35 = vld [vmem:[#allocation7 + $0x338] sm:$0xff] }
 0x279   :  { %2810 = vmatpush1.bf16.msra.mxu1 %v7044_v28  ;;  %v7347_v28 = vcombine.high %v3910_v47, %v3914_v16  ;;  %v7100_v34 = vcombine.low %v2007_v32, %v2011_v35  ;;  %v4784_v16 = vld [vmem:[#allocation7 + $0xc40] sm:$0xff] }
 0x27a   :  { %2811 = vmatprep.subr.bf16.mxu1 %v7053_v38  ;;  %v3922_v38 = vld [vmem:[#allocation7 + $0xb30] sm:$0xff] }
 0x27b   :  { %4681 = vmatpush1.bf16.msra.mxu0 %v7298_v29  ;;  %v7101_v29 = vcombine.high %v2007_v32, %v2011_v35  ;;  %v7354_v42 = vcombine.low %v3918_v26, %v3922_v38  ;;  %v2881_v35 = vld [vmem:[#allocation7 + $0x488] sm:$0xff] }
 0x27c   :  { %4682 = vmatprep.subr.bf16.mxu0 %v7307_v39  ;;  %v2019_v39 = vld [vmem:[#allocation7 + $0x378] sm:$0xff] }
 0x27d   :  { %2812 = vmatpush1.bf16.msra.mxu1 %v7052_v30  ;;  %v7355_v30 = vcombine.high %v3918_v26, %v3922_v38  ;;  %v7108_v2 = vcombine.low %v2015_v36, %v2019_v39  ;;  %v8514_v26 = vpack.c.bf16 %v8481_v53, %v8481_v53  ;;  %v4804_v53 = vld [vmem:[#allocation7 + $0xce0] sm:$0xff] }
 0x27e   :  { %2813 = vmatprep.subr.bf16.mxu1 %v7061_v23  ;;  %v3930_v23 = vld [vmem:[#allocation7 + $0xb70] sm:$0xff] }
 0x27f   :  { %4683 = vmatpush1.bf16.msra.mxu0 %v7306_v11  ;;  %v7109_v11 = vcombine.high %v2015_v36, %v2019_v39  ;;  %v7362_v61 = vcombine.low %v3926_v52, %v3930_v23  ;;  %v2889_v39 = vld [vmem:[#allocation7 + $0x4c8] sm:$0xff] }
 0x280   :  { %4684 = vmatprep.subr.bf16.mxu0 %v7315_v58  ;;  %v2027_v58 = vld [vmem:[#allocation7 + $0x3b8] sm:$0xff] }
 0x281   :  { %2814 = vmatpush1.bf16.msra.mxu1 %v7060_v9  ;;  %v7363_v9 = vcombine.high %v3926_v52, %v3930_v23  ;;  %v7116_v4 = vcombine.low %v2023_v56, %v2027_v58  ;;  %v4800_v23 = vld [vmem:[#allocation7 + $0xcc0] sm:$0xff] }
 0x282   :  { %2815 = vmatprep.subr.bf16.mxu1 %v7069_v8  ;;  %v3938_v8 = vld [vmem:[#allocation7 + $0xbb0] sm:$0xff] }
 0x283   :  { %4685 = vmatpush1.bf16.msra.mxu0 %v7314_v60  ;;  %v7117_v60 = vcombine.high %v2023_v56, %v2027_v58  ;;  %v7370_v54 = vcombine.low %v3934_v1, %v3938_v8  ;;  %v2897_v56 = vld [vmem:[#allocation7 + $0x508] sm:$0xff] }
 0x284   :  { %4686 = vmatprep.subr.bf16.mxu0 %v7323_v63  ;;  %v2035_v63 = vld [vmem:[#allocation7 + $0x3f8] sm:$0xff]  ;;  %v2901_v58 = vld [vmem:[#allocation7 + $0x528] sm:$0xff] }
 0x285   :  { %2816 = vmatpush1.bf16.msra.mxu1 %v7068_v14  ;;  %v7371_v14 = vcombine.high %v3934_v1, %v3938_v8  ;;  %v7124_v17 = vcombine.low %v2031_v22, %v2035_v63  ;;  %v4808_v1 = vld [vmem:[#allocation7 + $0xd00] sm:$0xff] }
 0x286   :  { %2817 = vmatprep.subr.bf16.mxu1 %v7077_v20  ;;  %v3946_v20 = vld [vmem:[#allocation7 + $0xbf0] sm:$0xff]  ;;  %v4812_v8 = vld [vmem:[#allocation7 + $0xd20] sm:$0xff] }
 0x287   :  { %4687 = vmatpush1.bf16.msra.mxu0 %v7322_v40  ;;  %v7125_v40 = vcombine.high %v2031_v22, %v2035_v63  ;;  %v7378_v12 = vcombine.low %v3942_v7, %v3946_v20  ;;  %v7406_v22 = vcombine.low %v4800_v23, %v4804_v53  ;;  %v2905_v63 = vld [vmem:[#allocation7 + $0x548] sm:$0xff] }
 0x288   :  { %4688 = vmatprep.subr.bf16.mxu0 %v7331_v18  ;;  %v2869_v18 = vld [vmem:[#allocation7 + $0x428] sm:$0xff] }
 0x289   :  { %2818 = vmatpush1.bf16.msra.mxu1 %v7076_v3  ;;  %v7379_v3 = vcombine.high %v3942_v7, %v3946_v20  ;;  %v7128_v47 = vcombine.low %v2865_v41, %v2869_v18  ;;  %v7160_v20 = vcombine.low %v2897_v56, %v2901_v58 }
 0x28a   :  { %2819 = vmatprep.subr.bf16.mxu1 %v7085_v10  ;;  %v4780_v10 = vld [vmem:[#allocation7 + $0xc20] sm:$0xff] }
 0x28b   :  { %4689 = vmatpush1.bf16.msra.mxu0 %v7330_v55  ;;  %v7129_v55 = vcombine.high %v2865_v41, %v2869_v18  ;;  %v7382_v32 = vcombine.low %v4776_v15, %v4780_v10  ;;  %v4820_v41 = vld [vmem:[#allocation7 + $0xd60] sm:$0xff] }
 0x28c   :  { %4690 = vmatprep.subr.bf16.mxu0 %v7339_v13  ;;  %v2877_v13 = vld [vmem:[#allocation7 + $0x468] sm:$0xff] }
 0x28d   :  { %2820 = vmatpush1.bf16.msra.mxu1 %v7084_v21  ;;  %v7383_v21 = vcombine.high %v4776_v15, %v4780_v10  ;;  %v7136_v38 = vcombine.low %v2873_v37, %v2877_v13  ;;  %v2913_v15 = vld [vmem:[#allocation7 + $0x588] sm:$0xff] }
 0x28e   :  { %2821 = vmatprep.subr.bf16.mxu1 %v7093_v24  ;;  %v4788_v24 = vld [vmem:[#allocation7 + $0xc60] sm:$0xff]  ;;  %v2917_v10 = vld [vmem:[#allocation7 + $0x5a8] sm:$0xff] }
 0x28f   :  { %4691 = vmatpush1.bf16.msra.mxu0 %v7338_v31  ;;  %v7137_v31 = vcombine.high %v2873_v37, %v2877_v13 }
 0x290   :  { %4692 = vmatprep.subr.bf16.mxu0 %v7347_v28  ;;  %v2885_v28 = vld [vmem:[#allocation7 + $0x4a8] sm:$0xff] }
 0x291   :  { %2822 = vmatpush1.bf16.msra.mxu1 %v7092_v25  ;;  %v7391_v25 = vcombine.high %v4784_v16, %v4788_v24  ;;  %v7145_v36 = vcombine.high %v2881_v35, %v2885_v28  ;;  %v7144_v52 = vcombine.low %v2881_v35, %v2885_v28  ;;  %v2921_v28 = vld [vmem:[#allocation7 + $0x5c8] sm:$0xff] }
 0x292   :  { %2823 = vmatprep.subr.bf16.mxu1 %v7101_v29  ;;  %v4792_v29 = vld [vmem:[#allocation7 + $0xc80] sm:$0xff] }
 0x293   :  { %4693 = vmatpush1.bf16.msra.mxu0 %v7346_v33  ;;  %v4796_v33 = vld [vmem:[#allocation7 + $0xca0] sm:$0xff] }
 0x294   :  { %4694 = vmatprep.subr.bf16.mxu0 %v7355_v30  ;;  %v2893_v30 = vld [vmem:[#allocation7 + $0x4e8] sm:$0xff] }
 0x295   :  { %2824 = vmatpush1.bf16.msra.mxu1 %v7100_v34  ;;  %v7399_v34 = vcombine.high %v4792_v29, %v4796_v33 }
 0x296   :  { %2825 = vmatprep.subr.bf16.mxu1 %v7109_v11  ;;  %v7153_v11 = vcombine.high %v2889_v39, %v2893_v30 }
 0x297   :  { %4695 = vmatpush1.bf16.msra.mxu0 %v7354_v42  ;;  %v7398_v42 = vcombine.low %v4792_v29, %v4796_v33 }
 0x298   :  { %4696 = vmatprep.subr.bf16.mxu0 %v7363_v9  ;;  %v7407_v9 = vcombine.high %v4800_v23, %v4804_v53  ;;  %v2929_v53 = vld [vmem:[#allocation7 + $0x608] sm:$0xff] }
 0x299   :  { %2826 = vmatpush1.bf16.msra.mxu1 %v7108_v2  ;;  %v7152_v2 = vcombine.low %v2889_v39, %v2893_v30  ;;  %v4832_v39 = vld [vmem:[#allocation7 + $0xdc0] sm:$0xff] }
 0x29a   :  { %2827 = vmatprep.subr.bf16.mxu1 %v7117_v60  ;;  %v8518_v60 = vld [vmem:[#allocation5 + $0x10] sm:$0xff]  ;;  %v4836_v30 = vld [vmem:[#allocation7 + $0xde0] sm:$0xff] }
 0x29b   :  { %4697 = vmatpush1.bf16.msra.mxu0 %v7362_v61  ;;  %v7161_v61 = vcombine.high %v2897_v56, %v2901_v58  ;;  %v387_v7 = vrot.slane %v8518_v60, %v8383_v44  ;;  %v4840_v58 = vld [vmem:[#allocation7 + $0xe00] sm:$0xff] }
 0x29c   :  { %4698 = vmatprep.subr.bf16.mxu0 %v7371_v14  ;;  %v2909_v14 = vld [vmem:[#allocation7 + $0x568] sm:$0xff] }
 0x29d   :  { %2828 = vmatpush1.bf16.msra.mxu1 %v7116_v4  ;;  %v7415_v4 = vcombine.high %v4808_v1, %v4812_v8  ;;  %v7169_v18 = vcombine.high %v2905_v63, %v2909_v14  ;;  %v7168_v13 = vcombine.low %v2905_v63, %v2909_v14  ;;  %v4848_v14 = vld [vmem:[#allocation7 + $0xe40] sm:$0xff] }
 0x29e   :  { %2829 = vmatprep.subr.bf16.mxu1 %v7125_v40  ;;  %v391_v40 = vrot.slane %v8518_v60, %v8387_v46 }
 0x29f   :  { %4699 = vmatpush1.bf16.msra.mxu0 %v7370_v54  ;;  %v4816_v54 = vld [vmem:[#allocation7 + $0xd40] sm:$0xff] }
 0x2a0   :  { %4700 = vmatprep.subr.bf16.mxu0 %v7379_v3  ;;  %v8524_v3 = vpop.f32.mrb[20].mxu0  ;;  %v1765_v37 = vadd.f32 %v8500_v59, %v391_v40  ;;  %v7422_v35 = vcombine.low %v4816_v54, %v4820_v41  ;;  %v2945_v40 = vld [vmem:[#allocation7 + $0x688] sm:$0xff] }
 0x2a1   :  { %2830 = vmatpush1.bf16.msra.mxu1 %v7124_v17  ;;  %v7414_v17 = vcombine.low %v4808_v1, %v4812_v8  ;;  %v7438_v1 = vcombine.low %v4832_v39, %v4836_v30  ;;  %v2937_v8 = vld [vmem:[#allocation7 + $0x648] sm:$0xff] }
 0x2a2   :  { %3673 = vmatprep.subr.bf16.mxu1 %v7129_v55  ;;  %v1763_v55 = vadd.f32 %v8498_v57, %v387_v7 }
 0x2a3   :  { %4701 = vmatpush1.bf16.msra.mxu0 %v7378_v12  ;;  %v7423_v12 = vcombine.high %v4816_v54, %v4820_v41  ;;  %v2949_v54 = vld [vmem:[#allocation7 + $0x6a8] sm:$0xff] }
 0x2a4   :  { %2832 = vmatmul.mubr.bf16.vlgmr.msra.gmra.mrb[20].mxu1 %v8458_v5  ;;  %5544 = vmatprep.subr.bf16.mxu0 %v7383_v21  ;;  %v7390_v5 = vcombine.low %v4784_v16, %v4788_v24  ;;  %v4824_v21 = vld [vmem:[#allocation7 + $0xd80] sm:$0xff]  ;;  %v8528_v16 = vpop.f32.mrb[21].mxu0  ;;  %v7177_v24 = vcombine.high %v2913_v15, %v2917_v10 }
 0x2a5   :  { %3674 = vmatpush1.bf16.msra.mxu1 %v7128_v47  ;;  %3705 = vmatprep.mubr.bf16.mxu1 %v8461_v6  ;;  %v4828_v47 = vld [vmem:[#allocation7 + $0xda0] sm:$0xff] }
 0x2a6   :  { %4703 = vmatmul.mubr.bf16.vlgmr.msra.gmra.mrb[28].mxu0 %v8505_v43  ;;  %3675 = vmatprep.subr.bf16.mxu1 %v7137_v31  ;;  %v1848_v31 = vpop.f32.mrb[22].mxu0  ;;  %v7431_v33 = vcombine.high %v4824_v21, %v4828_v47  ;;  %v7430_v23 = vcombine.low %v4824_v21, %v4828_v47  ;;  %v7208_v21 = vcombine.low %v2945_v40, %v2949_v54  ;;  %v4864_v47 = vld [vmem:[#allocation7 + $0xec0] sm:$0xff] }
 0x2a7   :  { %5545 = vmatpush1.bf16.msra.mxu0 %v7382_v32  ;;  %5576 = vmatprep.mubr.bf16.mxu0 %v8514_v26 }
 0x2a8   :  { %5546 = vmatprep.subr.bf16.mxu0 %v7391_v25  ;;  %v2925_v25 = vld [vmem:[#allocation7 + $0x5e8] sm:$0xff] }
 0x2a9   :  { %3676 = vmatpush1.bf16.msra.mxu1 %v7136_v38  ;;  %v1849_v38 = vpop.f32.mrb[23].mxu0  ;;  %v7184_v56 = vcombine.low %v2921_v28, %v2925_v25 }
 0x2aa   :  { %3677 = vmatprep.subr.bf16.mxu1 %v7145_v36 }
 0x2ab   :  { %5547 = vmatpush1.bf16.msra.mxu0 %v7390_v5  ;;  %v7176_v5 = vcombine.low %v2913_v15, %v2917_v10  ;;  %v4860_v15 = vld [vmem:[#allocation7 + $0xea0] sm:$0xff]  ;;  %v7209_v10 = vcombine.high %v2945_v40, %v2949_v54 }
 0x2ac   :  { %5548 = vmatprep.subr.bf16.mxu0 %v7399_v34  ;;  %v4900_v40 = vld [vmem:[#allocation7 + $0xfe0] sm:$0xff] }
 0x2ad   :  { %3678 = vmatpush1.bf16.msra.mxu1 %v7144_v52  ;;  %v7185_v52 = vcombine.high %v2921_v28, %v2925_v25  ;;  %v2965_v28 = vld [vmem:[#allocation7 + $0x728] sm:$0xff] }
 0x2ae   :  { %3679 = vmatprep.subr.bf16.mxu1 %v7153_v11  ;;  %v2933_v11 = vld [vmem:[#allocation7 + $0x628] sm:$0xff] }
 0x2af   :  { %5549 = vmatpush1.bf16.msra.mxu0 %v7398_v42  ;;  %v7439_v42 = vcombine.high %v4832_v39, %v4836_v30  ;;  %v7192_v63 = vcombine.low %v2929_v53, %v2933_v11  ;;  %v2969_v39 = vld [vmem:[#allocation7 + $0x748] sm:$0xff] }
 0x2b0   :  { %5550 = vmatprep.subr.bf16.mxu0 %v7407_v9  ;;  %v4844_v9 = vld [vmem:[#allocation7 + $0xe20] sm:$0xff]  ;;  %v2973_v30 = vld [vmem:[#allocation7 + $0x768] sm:$0xff] }
 0x2b1   :  { %3680 = vmatpush1.bf16.msra.mxu1 %v7152_v2  ;;  %v7193_v2 = vcombine.high %v2929_v53, %v2933_v11  ;;  %v4884_v53 = vld [vmem:[#allocation7 + $0xf60] sm:$0xff]  ;;  %v7233_v11 = vcombine.high %v2969_v39, %v2973_v30 }
 0x2b2   :  { %3681 = vmatprep.subr.bf16.mxu1 %v7161_v61  ;;  %v2941_v61 = vld [vmem:[#allocation7 + $0x668] sm:$0xff] }
 0x2b3   :  { %5551 = vmatpush1.bf16.msra.mxu0 %v7406_v22  ;;  %v7447_v22 = vcombine.high %v4840_v58, %v4844_v9  ;;  %v7201_v7 = vcombine.high %v2937_v8, %v2941_v61 }
 0x2b4   :  { %5552 = vmatprep.subr.bf16.mxu0 %v7415_v4  ;;  %v4852_v4 = vld [vmem:[#allocation7 + $0xe60] sm:$0xff] }
 0x2b5   :  { %3682 = vmatpush1.bf16.msra.mxu1 %v7160_v20  ;;  %v7446_v20 = vcombine.low %v4840_v58, %v4844_v9  ;;  %v7455_v41 = vcombine.high %v4848_v14, %v4852_v4  ;;  %v2981_v58 = vld [vmem:[#allocation7 + $0x7a8] sm:$0xff] }
 0x2b6   :  { %3683 = vmatprep.subr.bf16.mxu1 %v7169_v18  ;;  %v7200_v18 = vcombine.low %v2937_v8, %v2941_v61  ;;  %v4892_v8 = vld [vmem:[#allocation7 + $0xfa0] sm:$0xff] }
 0x2b7   :  { %5553 = vmatpush1.bf16.msra.mxu0 %v7414_v17  ;;  %v2710_v32 = vpop.f32.mrb[24].mxu1  ;;  %v4856_v17 = vld [vmem:[#allocation7 + $0xe80] sm:$0xff] }
 0x2b8   :  { %v8530_v29 = vadd.f32 %v2710_v32, %v1763_v55  ;;  %5554 = vmatprep.subr.bf16.mxu0 %v7423_v12  ;;  %v2712_v57 = vpop.f32.mrb[25].mxu1  ;;  %v7454_v55 = vcombine.low %v4848_v14, %v4852_v4  ;;  %v2953_v12 = vld [vmem:[#allocation7 + $0x6c8] sm:$0xff]  ;;  %v7462_v32 = vcombine.low %v4856_v17, %v4860_v15 }
 0x2b9   :  { %v8532_v59 = vadd.f32 %v2712_v57, %v1765_v37  ;;  %3684 = vmatpush1.bf16.msra.mxu1 %v7168_v13  ;;  %v2714_v36 = vpop.f32.mrb[26].mxu1  ;;  %v2957_v37 = vld [vmem:[#allocation7 + $0x6e8] sm:$0xff]  ;;  %v7463_v13 = vcombine.high %v4856_v17, %v4860_v15  ;;  %v4872_v57 = vld [vmem:[#allocation7 + $0xf00] sm:$0xff]  ;;  %v2871_v17 = vld [vmem:[#allocation7 + $0x438] sm:$0xff] }
 0x2ba   :  { %v2715_v34 = vpop.f32.mrb[27].mxu1  ;;  %3685 = vmatprep.subr.bf16.mxu1 %v7177_v24  ;;  %v4868_v24 = vld [vmem:[#allocation7 + $0xee0] sm:$0xff]  ;;  %v7217_v31 = vcombine.high %v2953_v12, %v2957_v37  ;;  %v7216_v38 = vcombine.low %v2953_v12, %v2957_v37  ;;  %v2989_v14 = vld [vmem:[#allocation7 + $0x7e8] sm:$0xff]  ;;  %v4782_v12 = vld [vmem:[#allocation7 + $0xc30] sm:$0xff] }
 0x2bb   :  { %5555 = vmatpush1.bf16.msra.mxu0 %v7422_v35  ;;  %v2961_v35 = vld [vmem:[#allocation7 + $0x708] sm:$0xff]  ;;  %v7471_v25 = vcombine.high %v4864_v47, %v4868_v24 }
 0x2bc   :  { %5556 = vmatprep.subr.bf16.mxu0 %v7431_v33  ;;  %v4876_v33 = vld [vmem:[#allocation7 + $0xf20] sm:$0xff]  ;;  %v7225_v36 = vcombine.high %v2961_v35, %v2965_v28 }
 0x2bd   :  { %3686 = vmatpush1.bf16.msra.mxu1 %v7176_v5  ;;  %v7470_v5 = vcombine.low %v4864_v47, %v4868_v24  ;;  %v7479_v34 = vcombine.high %v4872_v57, %v4876_v33  ;;  %v2879_v47 = vld [vmem:[#allocation7 + $0x478] sm:$0xff] }
 0x2be   :  { %3687 = vmatprep.subr.bf16.mxu1 %v7185_v52  ;;  %v7224_v52 = vcombine.low %v2961_v35, %v2965_v28  ;;  %v4790_v35 = vld [vmem:[#allocation7 + $0xc70] sm:$0xff] }
 0x2bf   :  { %5557 = vmatpush1.bf16.msra.mxu0 %v7430_v23  ;;  %v4880_v23 = vld [vmem:[#allocation7 + $0xf40] sm:$0xff] }
 0x2c0   :  { %5558 = vmatprep.subr.bf16.mxu0 %v7439_v42  ;;  %v7478_v42 = vcombine.low %v4872_v57, %v4876_v33  ;;  %v7487_v9 = vcombine.high %v4880_v23, %v4884_v53  ;;  %v2887_v57 = vld [vmem:[#allocation7 + $0x4b8] sm:$0xff]  ;;  %v8537_v33 = vpack.c.bf16 %v8488_v27, %v8488_v27 }
 0x2c1   :  { %3688 = vmatpush1.bf16.msra.mxu1 %v7184_v56  ;;  %v2977_v56 = vld [vmem:[#allocation7 + $0x788] sm:$0xff] }
 0x2c2   :  { %3689 = vmatprep.subr.bf16.mxu1 %v7193_v2  ;;  %v7232_v2 = vcombine.low %v2969_v39, %v2973_v30  ;;  %v7241_v61 = vcombine.high %v2977_v56, %v2981_v58  ;;  %v4794_v39 = vld [vmem:[#allocation7 + $0xc90] sm:$0xff] }
 0x2c3   :  { %5559 = vmatpush1.bf16.msra.mxu0 %v7438_v1  ;;  %v4888_v1 = vld [vmem:[#allocation7 + $0xf80] sm:$0xff]  ;;  %v4798_v30 = vld [vmem:[#allocation7 + $0xcb0] sm:$0xff] }
 0x2c4   :  { %5560 = vmatprep.subr.bf16.mxu0 %v7447_v22  ;;  %v7486_v22 = vcombine.low %v4880_v23, %v4884_v53  ;;  %v7495_v4 = vcombine.high %v4888_v1, %v4892_v8  ;;  %v2891_v23 = vld [vmem:[#allocation7 + $0x4d8] sm:$0xff]  ;;  %v7403_v27 = vcombine.high %v4794_v39, %v4798_v30 }
 0x2c5   :  { %3690 = vmatpush1.bf16.msra.mxu1 %v7192_v63  ;;  %v2985_v63 = vld [vmem:[#allocation7 + $0x7c8] sm:$0xff]  ;;  %v2895_v53 = vld [vmem:[#allocation7 + $0x4f8] sm:$0xff] }
 0x2c6   :  { %3691 = vmatprep.subr.bf16.mxu1 %v7201_v7  ;;  %v7240_v7 = vcombine.low %v2977_v56, %v2981_v58  ;;  %v7249_v54 = vcombine.high %v2985_v63, %v2989_v14  ;;  %v4806_v56 = vld [vmem:[#allocation7 + $0xcf0] sm:$0xff]  ;;  %v7402_v58 = vcombine.low %v4794_v39, %v4798_v30 }
 0x2c7   :  { %5561 = vmatpush1.bf16.msra.mxu0 %v7446_v20  ;;  %v4896_v20 = vld [vmem:[#allocation7 + $0xfc0] sm:$0xff] }
 0x2c8   :  { %5562 = vmatprep.subr.bf16.mxu0 %v7455_v41  ;;  %v7494_v41 = vcombine.low %v4888_v1, %v4892_v8  ;;  %v7503_v15 = vcombine.high %v4896_v20, %v4900_v40  ;;  %v7156_v8 = vcombine.low %v2891_v23, %v2895_v53 }
 0x2c9   :  { %3692 = vmatpush1.bf16.msra.mxu1 %v7200_v18  ;;  %v2867_v18 = vld [vmem:[#allocation7 + $0x418] sm:$0xff] }
 0x2ca   :  { %3693 = vmatprep.subr.bf16.mxu1 %v7209_v10  ;;  %v7248_v10 = vcombine.low %v2985_v63, %v2989_v14  ;;  %v7133_v37 = vcombine.high %v2867_v18, %v2871_v17 }
 0x2cb   :  { %5563 = vmatpush1.bf16.msra.mxu0 %v7454_v55  ;;  %v4778_v55 = vld [vmem:[#allocation7 + $0xc10] sm:$0xff] }
 0x2cc   :  { %5564 = vmatprep.subr.bf16.mxu0 %v7463_v13  ;;  %v7502_v13 = vcombine.low %v4896_v20, %v4900_v40  ;;  %v7387_v24 = vcombine.high %v4778_v55, %v4782_v12 }
 0x2cd   :  { %3694 = vmatpush1.bf16.msra.mxu1 %v7208_v21  ;;  %v2875_v21 = vld [vmem:[#allocation7 + $0x458] sm:$0xff] }
 0x2ce   :  { %3695 = vmatprep.subr.bf16.mxu1 %v7217_v31  ;;  %v7132_v31 = vcombine.low %v2867_v18, %v2871_v17  ;;  %v7141_v28 = vcombine.high %v2875_v21, %v2879_v47 }
 0x2cf   :  { %5565 = vmatpush1.bf16.msra.mxu0 %v7462_v32  ;;  %v4786_v32 = vld [vmem:[#allocation7 + $0xc50] sm:$0xff] }
 0x2d0   :  { %5566 = vmatprep.subr.bf16.mxu0 %v7471_v25  ;;  %v7386_v25 = vcombine.low %v4778_v55, %v4782_v12 }
 0x2d1   :  { %3696 = vmatpush1.bf16.msra.mxu1 %v7216_v38  ;;  %v2883_v38 = vld [vmem:[#allocation7 + $0x498] sm:$0xff] }
 0x2d2   :  { %3697 = vmatprep.subr.bf16.mxu1 %v7225_v36  ;;  %v7395_v36 = vcombine.high %v4786_v32, %v4790_v35 }
 0x2d3   :  { %5567 = vmatpush1.bf16.msra.mxu0 %v7470_v5  ;;  %v7140_v5 = vcombine.low %v2875_v21, %v2879_v47 }
 0x2d4   :  { %5568 = vmatprep.subr.bf16.mxu0 %v7479_v34  ;;  %v7149_v34 = vcombine.high %v2883_v38, %v2887_v57 }
 0x2d5   :  { %3698 = vmatpush1.bf16.msra.mxu1 %v7224_v52  ;;  %v7394_v52 = vcombine.low %v4786_v32, %v4790_v35 }
 0x2d6   :  { %3699 = vmatprep.subr.bf16.mxu1 %v7233_v11  ;;  %v7148_v11 = vcombine.low %v2883_v38, %v2887_v57 }
 0x2d7   :  { %5569 = vmatpush1.bf16.msra.mxu0 %v7478_v42  ;;  %v4802_v42 = vld [vmem:[#allocation7 + $0xcd0] sm:$0xff] }
 0x2d8   :  { %5570 = vmatprep.subr.bf16.mxu0 %v7487_v9  ;;  %v2899_v9 = vld [vmem:[#allocation7 + $0x518] sm:$0xff]  ;;  %v7411_v1 = vcombine.high %v4802_v42, %v4806_v56  ;;  %v7410_v14 = vcombine.low %v4802_v42, %v4806_v56 }
 0x2d9   :  { %3700 = vmatpush1.bf16.msra.mxu1 %v7232_v2  ;;  %v2903_v2 = vld [vmem:[#allocation7 + $0x538] sm:$0xff] }
 0x2da   :  { %3701 = vmatprep.subr.bf16.mxu1 %v7241_v61  ;;  %v4810_v61 = vld [vmem:[#allocation7 + $0xd10] sm:$0xff]  ;;  %v7165_v63 = vcombine.high %v2899_v9, %v2903_v2  ;;  %v7164_v40 = vcombine.low %v2899_v9, %v2903_v2 }
 0x2db   :  { %5571 = vmatpush1.bf16.msra.mxu0 %v7486_v22  ;;  %v4814_v22 = vld [vmem:[#allocation7 + $0xd30] sm:$0xff] }
 0x2dc   :  { %5572 = vmatprep.subr.bf16.mxu0 %v7495_v4  ;;  %v2907_v4 = vld [vmem:[#allocation7 + $0x558] sm:$0xff]  ;;  %v7419_v20 = vcombine.high %v4810_v61, %v4814_v22  ;;  %v7418_v17 = vcombine.low %v4810_v61, %v4814_v22 }
 0x2dd   :  { %3702 = vmatpush1.bf16.msra.mxu1 %v7240_v7  ;;  %v2911_v7 = vld [vmem:[#allocation7 + $0x578] sm:$0xff] }
 0x2de   :  { %3703 = vmatprep.subr.bf16.mxu1 %v7249_v54  ;;  %v4818_v54 = vld [vmem:[#allocation7 + $0xd50] sm:$0xff]  ;;  %v7173_v18 = vcombine.high %v2907_v4, %v2911_v7  ;;  %v7172_v12 = vcombine.low %v2907_v4, %v2911_v7 }
 0x2df   :  { %5573 = vmatpush1.bf16.msra.mxu0 %v7494_v41  ;;  %v4822_v41 = vld [vmem:[#allocation7 + $0xd70] sm:$0xff] }
 0x2e0   :  { %5574 = vmatprep.subr.bf16.mxu0 %v7503_v15  ;;  %v2915_v15 = vld [vmem:[#allocation7 + $0x598] sm:$0xff]  ;;  %v7427_v55 = vcombine.high %v4818_v54, %v4822_v41  ;;  %v7426_v47 = vcombine.low %v4818_v54, %v4822_v41 }
 0x2e1   :  { %3704 = vmatpush1.bf16.msra.mxu1 %v7248_v10  ;;  %v2919_v10 = vld [vmem:[#allocation7 + $0x5b8] sm:$0xff] }
 0x2e2   :  { %3755 = vmatprep.subr.bf16.mxu1 %v7133_v37  ;;  %v4826_v37 = vld [vmem:[#allocation7 + $0xd90] sm:$0xff]  ;;  %v7181_v21 = vcombine.high %v2915_v15, %v2919_v10  ;;  %v7180_v35 = vcombine.low %v2915_v15, %v2919_v10 }
 0x2e3   :  { %5575 = vmatpush1.bf16.msra.mxu0 %v7502_v13  ;;  %v4830_v13 = vld [vmem:[#allocation7 + $0xdb0] sm:$0xff] }
 0x2e4   :  { %3706 = vmatmul.mubr.bf16.vlgmr.msra.gmra.mrb[16].mxu1 %v8467_v19  ;;  %5626 = vmatprep.subr.bf16.mxu0 %v7387_v24  ;;  %v2923_v24 = vld [vmem:[#allocation7 + $0x5d8] sm:$0xff]  ;;  %v7435_v32 = vcombine.high %v4826_v37, %v4830_v13  ;;  %v7434_v57 = vcombine.low %v4826_v37, %v4830_v13 }
 0x2e5   :  { %3756 = vmatpush1.bf16.msra.mxu1 %v7132_v31  ;;  %3787 = vmatprep.mubr.bf16.mxu1 %v8461_v6  ;;  %v7157_v6 = vcombine.high %v2891_v23, %v2895_v53  ;;  %v2927_v31 = vld [vmem:[#allocation7 + $0x5f8] sm:$0xff] }
 0x2e6   :  { %5577 = vmatmul.mubr.bf16.vlgmr.msra.gmra.mrb[24].mxu0 %v8537_v33  ;;  %3757 = vmatprep.subr.bf16.mxu1 %v7141_v28  ;;  %v4834_v28 = vld [vmem:[#allocation7 + $0xdd0] sm:$0xff]  ;;  %v7189_v38 = vcombine.high %v2923_v24, %v2927_v31  ;;  %v7188_v30 = vcombine.low %v2923_v24, %v2927_v31 }
 0x2e7   :  { %5627 = vmatpush1.bf16.msra.mxu0 %v7386_v25  ;;  %5658 = vmatprep.mubr.bf16.mxu0 %v8514_v26  ;;  %v4838_v25 = vld [vmem:[#allocation7 + $0xdf0] sm:$0xff] }
 0x2e8   :  { %5628 = vmatprep.subr.bf16.mxu0 %v7395_v36  ;;  %v2931_v36 = vld [vmem:[#allocation7 + $0x618] sm:$0xff]  ;;  %v7443_v39 = vcombine.high %v4834_v28, %v4838_v25  ;;  %v7442_v53 = vcombine.low %v4834_v28, %v4838_v25 }
 0x2e9   :  { %3758 = vmatpush1.bf16.msra.mxu1 %v7140_v5  ;;  %v2935_v5 = vld [vmem:[#allocation7 + $0x638] sm:$0xff] }
 0x2ea   :  { %3759 = vmatprep.subr.bf16.mxu1 %v7149_v34  ;;  %v4842_v34 = vld [vmem:[#allocation7 + $0xe10] sm:$0xff]  ;;  %v7197_v23 = vcombine.high %v2931_v36, %v2935_v5  ;;  %v7196_v56 = vcombine.low %v2931_v36, %v2935_v5 }
 0x2eb   :  { %5629 = vmatpush1.bf16.msra.mxu0 %v7394_v52  ;;  %v4846_v52 = vld [vmem:[#allocation7 + $0xe30] sm:$0xff] }
 0x2ec   :  { %5630 = vmatprep.subr.bf16.mxu0 %v7403_v27  ;;  %v2939_v27 = vld [vmem:[#allocation7 + $0x658] sm:$0xff]  ;;  %v7451_v42 = vcombine.high %v4842_v34, %v4846_v52  ;;  %v7450_v2 = vcombine.low %v4842_v34, %v4846_v52 }
 0x2ed   :  { %3760 = vmatpush1.bf16.msra.mxu1 %v7148_v11  ;;  %v2943_v11 = vld [vmem:[#allocation7 + $0x678] sm:$0xff] }
 0x2ee   :  { %3761 = vmatprep.subr.bf16.mxu1 %v7157_v6  ;;  %v4850_v6 = vld [vmem:[#allocation7 + $0xe50] sm:$0xff]  ;;  %v7205_v9 = vcombine.high %v2939_v27, %v2943_v11  ;;  %v7204_v22 = vcombine.low %v2939_v27, %v2943_v11 }
 0x2ef   :  { %5631 = vmatpush1.bf16.msra.mxu0 %v7402_v58  ;;  %v4854_v58 = vld [vmem:[#allocation7 + $0xe70] sm:$0xff] }
 0x2f0   :  { %5632 = vmatprep.subr.bf16.mxu0 %v7411_v1  ;;  %v2947_v1 = vld [vmem:[#allocation7 + $0x698] sm:$0xff]  ;;  %v7459_v61 = vcombine.high %v4850_v6, %v4854_v58  ;;  %v7458_v7 = vcombine.low %v4850_v6, %v4854_v58 }
 0x2f1   :  { %3762 = vmatpush1.bf16.msra.mxu1 %v7156_v8  ;;  %v2951_v8 = vld [vmem:[#allocation7 + $0x6b8] sm:$0xff] }
 0x2f2   :  { %3763 = vmatprep.subr.bf16.mxu1 %v7165_v63  ;;  %v4858_v63 = vld [vmem:[#allocation7 + $0xe90] sm:$0xff]  ;;  %v7213_v4 = vcombine.high %v2947_v1, %v2951_v8  ;;  %v7212_v41 = vcombine.low %v2947_v1, %v2951_v8 }
 0x2f3   :  { %5633 = vmatpush1.bf16.msra.mxu0 %v7410_v14  ;;  %v4862_v14 = vld [vmem:[#allocation7 + $0xeb0] sm:$0xff] }
 0x2f4   :  { %5634 = vmatprep.subr.bf16.mxu0 %v7419_v20  ;;  %v2955_v20 = vld [vmem:[#allocation7 + $0x6d8] sm:$0xff]  ;;  %v7467_v54 = vcombine.high %v4858_v63, %v4862_v14  ;;  %v7466_v10 = vcombine.low %v4858_v63, %v4862_v14 }
 0x2f5   :  { %3764 = vmatpush1.bf16.msra.mxu1 %v7164_v40  ;;  %v2959_v40 = vld [vmem:[#allocation7 + $0x6f8] sm:$0xff] }
 0x2f6   :  { %3765 = vmatprep.subr.bf16.mxu1 %v7173_v18  ;;  %v4866_v18 = vld [vmem:[#allocation7 + $0xed0] sm:$0xff]  ;;  %v7221_v15 = vcombine.high %v2955_v20, %v2959_v40  ;;  %v7220_v13 = vcombine.low %v2955_v20, %v2959_v40  ;;  %v3829_v20 = vld [vmem:[#allocation7 + $0x848] sm:$0xff] }
 0x2f7   :  { %5635 = vmatpush1.bf16.msra.mxu0 %v7418_v17  ;;  %v4870_v17 = vld [vmem:[#allocation7 + $0xef0] sm:$0xff]  ;;  %v3833_v40 = vld [vmem:[#allocation7 + $0x868] sm:$0xff] }
 0x2f8   :  { %5636 = vmatprep.subr.bf16.mxu0 %v7427_v55  ;;  %v2963_v55 = vld [vmem:[#allocation7 + $0x718] sm:$0xff]  ;;  %v7475_v37 = vcombine.high %v4866_v18, %v4870_v17  ;;  %v7474_v31 = vcombine.low %v4866_v18, %v4870_v17  ;;  %v7265_v18 = vcombine.high %v3829_v20, %v3833_v40  ;;  %v3837_v17 = vld [vmem:[#allocation7 + $0x888] sm:$0xff] }
 0x2f9   :  { %3766 = vmatpush1.bf16.msra.mxu1 %v7172_v12  ;;  %v2967_v12 = vld [vmem:[#allocation7 + $0x738] sm:$0xff] }
 0x2fa   :  { %3767 = vmatprep.subr.bf16.mxu1 %v7181_v21  ;;  %v4874_v21 = vld [vmem:[#allocation7 + $0xf10] sm:$0xff]  ;;  %v7229_v24 = vcombine.high %v2963_v55, %v2967_v12  ;;  %v7228_v25 = vcombine.low %v2963_v55, %v2967_v12  ;;  %v7264_v12 = vcombine.low %v3829_v20, %v3833_v40  ;;  %v3889_v20 = vld [vmem:[#allocation7 + $0xa28] sm:$0xff] }
 0x2fb   :  { %5637 = vmatpush1.bf16.msra.mxu0 %v7426_v47  ;;  %v4878_v47 = vld [vmem:[#allocation7 + $0xf30] sm:$0xff]  ;;  %v7817_v40 = vld [vmem:[#allocation8 + $0x60] ss:$8 sps:$4 sm:$0xff]  }
 0x2fc   :  { %5638 = vmatprep.subr.bf16.mxu0 %v7435_v32  ;;  %v2971_v32 = vld [vmem:[#allocation7 + $0x758] sm:$0xff]  ;;  %v7483_v28 = vcombine.high %v4874_v21, %v4878_v47  ;;  %v7482_v5 = vcombine.low %v4874_v21, %v4878_v47  ;;  %v3849_v21 = vld [vmem:[#allocation7 + $0x8e8] sm:$0xff] }
 0x2fd   :  { %3768 = vmatpush1.bf16.msra.mxu1 %v7180_v35  ;;  %v2975_v35 = vld [vmem:[#allocation7 + $0x778] sm:$0xff] }
 0x2fe   :  { %3769 = vmatprep.subr.bf16.mxu1 %v7189_v38  ;;  %v4882_v38 = vld [vmem:[#allocation7 + $0xf50] sm:$0xff]  ;;  %v7237_v36 = vcombine.high %v2971_v32, %v2975_v35  ;;  %v7236_v52 = vcombine.low %v2971_v32, %v2975_v35  ;;  %v3853_v32 = vld [vmem:[#allocation7 + $0x908] sm:$0xff] }
 0x2ff   :  { %5639 = vmatpush1.bf16.msra.mxu0 %v7434_v57  ;;  %v4886_v57 = vld [vmem:[#allocation7 + $0xf70] sm:$0xff]  ;;  %v3857_v35 = vld [vmem:[#allocation7 + $0x928] sm:$0xff] }
 0x300   :  { %5640 = vmatprep.subr.bf16.mxu0 %v7443_v39  ;;  %v2979_v39 = vld [vmem:[#allocation7 + $0x798] sm:$0xff]  ;;  %v7491_v34 = vcombine.high %v4882_v38, %v4886_v57  ;;  %v7490_v11 = vcombine.low %v4882_v38, %v4886_v57  ;;  %v7289_v57 = vcombine.high %v3853_v32, %v3857_v35 }
 0x301   :  { %3770 = vmatpush1.bf16.msra.mxu1 %v7188_v30  ;;  %v2983_v30 = vld [vmem:[#allocation7 + $0x7b8] sm:$0xff] }
 0x302   :  { %3771 = vmatprep.subr.bf16.mxu1 %v7197_v23  ;;  %v4890_v23 = vld [vmem:[#allocation7 + $0xf90] sm:$0xff]  ;;  %v7245_v27 = vcombine.high %v2979_v39, %v2983_v30  ;;  %v7244_v58 = vcombine.low %v2979_v39, %v2983_v30  ;;  %v403_v30 = vrot.slane %v8518_v60, %v8391_v0 }
 0x303   :  { %5641 = vmatpush1.bf16.msra.mxu0 %v7442_v53  ;;  %v4894_v53 = vld [vmem:[#allocation7 + $0xfb0] sm:$0xff] }
 0x304   :  { %5642 = vmatprep.subr.bf16.mxu0 %v7451_v42  ;;  %v2987_v42 = vld [vmem:[#allocation7 + $0x7d8] sm:$0xff]  ;;  %v7499_v6 = vcombine.high %v4890_v23, %v4894_v53  ;;  %v7498_v8 = vcombine.low %v4890_v23, %v4894_v53  ;;  %v407_v23 = vrot.slane %v8518_v60, %v8395_v50 }
 0x305   :  { %3772 = vmatpush1.bf16.msra.mxu1 %v7196_v56  ;;  %v2991_v56 = vld [vmem:[#allocation7 + $0x7f8] sm:$0xff] }
 0x306   :  { %3773 = vmatprep.subr.bf16.mxu1 %v7205_v9  ;;  %v4898_v9 = vld [vmem:[#allocation7 + $0xfd0] sm:$0xff]  ;;  %v7253_v1 = vcombine.high %v2987_v42, %v2991_v56  ;;  %v7252_v14 = vcombine.low %v2987_v42, %v2991_v56  ;;  %v7811_v42 = vld [vmem:[#allocation8 + $0x40] ss:$8 sps:$4 sm:$0xff]   ;;  %v1845_v56 = vadd.f32 %v8524_v3, %v403_v30  ;;  %v1847_v0 = vadd.f32 %v8528_v16, %v407_v23 }
 0x307   :  { %5643 = vmatpush1.bf16.msra.mxu0 %v7450_v2  ;;  %v4902_v2 = vld [vmem:[#allocation7 + $0xff0] sm:$0xff]  ;;  %v3925_v23 = vld [vmem:[#allocation7 + $0xb48] sm:$0xff] }
 0x308   :  { %5644 = vmatprep.subr.bf16.mxu0 %v7459_v61  ;;  %v3821_v61 = vld [vmem:[#allocation7 + $0x808] sm:$0xff]  ;;  %v7507_v63 = vcombine.high %v4898_v9, %v4902_v2  ;;  %v7804_v55 = vld [vmem:[#allocation8 + $0x14] ss:$8 sps:$4 sm:$0xff]   ;;  %v7802_v47 = vld [vmem:[#allocation8 + $0x10] ss:$8 sps:$4 sm:$0xff]  }
 0x309   :  { %3774 = vmatpush1.bf16.msra.mxu1 %v7204_v22  ;;  %v3825_v22 = vld [vmem:[#allocation7 + $0x828] sm:$0xff]  ;;  %v7808_v39 = vld [vmem:[#allocation8 + $0x30] ss:$8 sps:$4 sm:$0xff]   ;;  %v7834_v30 = vld [vmem:[#allocation8 + $0xb4] ss:$8 sps:$4 sm:$0xff]  }
 0x30a   :  { %3775 = vmatprep.subr.bf16.mxu1 %v7213_v4  ;;  %v7257_v4 = vcombine.high %v3821_v61, %v3825_v22  ;;  %v7814_v50 = vld [vmem:[#allocation8 + $0x50] ss:$8 sps:$4 sm:$0xff]  }
 0x30b   :  { %5645 = vmatpush1.bf16.msra.mxu0 %v7458_v7  ;;  %v7506_v7 = vcombine.low %v4898_v9, %v4902_v2 }
 0x30c   :  { %5646 = vmatprep.subr.bf16.mxu0 %v7467_v54  ;;  %v7801_v54 = vld [vmem:[#allocation8 + $0x4] ss:$8 sps:$4 sm:$0xff]  }
 0x30d   :  { %3776 = vmatpush1.bf16.msra.mxu1 %v7212_v41  ;;  %v7256_v41 = vcombine.low %v3821_v61, %v3825_v22  ;;  %v7819_v22 = vld [vmem:[#allocation8 + $0x64] ss:$8 sps:$4 sm:$0xff]  }
 0x30e   :  { %3777 = vmatprep.subr.bf16.mxu1 %v7221_v15  ;;  %v3841_v15 = vld [vmem:[#allocation7 + $0x8a8] sm:$0xff] }
 0x30f   :  { %5647 = vmatpush1.bf16.msra.mxu0 %v7466_v10  ;;  %v7799_v10 = vld [vmem:[#allocation8] ss:$8 sps:$4 sm:$0xff]  }
 0x310   :  { %5648 = vmatprep.subr.bf16.mxu0 %v7475_v37  ;;  %v7273_v37 = vcombine.high %v3837_v17, %v3841_v15 }
 0x311   :  { %3778 = vmatpush1.bf16.msra.mxu1 %v7220_v13  ;;  %v3845_v13 = vld [vmem:[#allocation7 + $0x8c8] sm:$0xff] }
 0x312   :  { %3779 = vmatprep.subr.bf16.mxu1 %v7229_v24  ;;  %v7807_v24 = vld [vmem:[#allocation8 + $0x24] ss:$8 sps:$4 sm:$0xff]   ;;  %v7280_v38 = vcombine.low %v3845_v13, %v3849_v21 }
 0x313   :  { %5649 = vmatpush1.bf16.msra.mxu0 %v7474_v31  ;;  %v7272_v31 = vcombine.low %v3837_v17, %v3841_v15  ;;  %v3893_v17 = vld [vmem:[#allocation7 + $0xa48] sm:$0xff] }
 0x314   :  { %5650 = vmatprep.subr.bf16.mxu0 %v7483_v28  ;;  %v7805_v28 = vld [vmem:[#allocation8 + $0x20] ss:$8 sps:$4 sm:$0xff]  }
 0x315   :  { %3780 = vmatpush1.bf16.msra.mxu1 %v7228_v25  ;;  %v7810_v25 = vld [vmem:[#allocation8 + $0x34] ss:$8 sps:$4 sm:$0xff]   ;;  %v3897_v15 = vld [vmem:[#allocation7 + $0xa68] sm:$0xff] }
 0x316   :  { %3781 = vmatprep.subr.bf16.mxu1 %v7237_v36  ;;  %v3861_v36 = vld [vmem:[#allocation7 + $0x948] sm:$0xff] }
 0x317   :  { %5651 = vmatpush1.bf16.msra.mxu0 %v7482_v5  ;;  %v3865_v5 = vld [vmem:[#allocation7 + $0x968] sm:$0xff] }
 0x318   :  { %5652 = vmatprep.subr.bf16.mxu0 %v7491_v34  ;;  %v7813_v34 = vld [vmem:[#allocation8 + $0x44] ss:$8 sps:$4 sm:$0xff]   ;;  %v7297_v53 = vcombine.high %v3861_v36, %v3865_v5 }
 0x319   :  { %3782 = vmatpush1.bf16.msra.mxu1 %v7236_v52  ;;  %v7288_v52 = vcombine.low %v3853_v32, %v3857_v35  ;;  %v3909_v32 = vld [vmem:[#allocation7 + $0xac8] sm:$0xff] }
 0x31a   :  { %3783 = vmatprep.subr.bf16.mxu1 %v7245_v27  ;;  %v3869_v27 = vld [vmem:[#allocation7 + $0x988] sm:$0xff] }
 0x31b   :  { %5653 = vmatpush1.bf16.msra.mxu0 %v7490_v11  ;;  %v3873_v11 = vld [vmem:[#allocation7 + $0x9a8] sm:$0xff] }
 0x31c   :  { %5654 = vmatprep.subr.bf16.mxu0 %v7499_v6  ;;  %v7816_v6 = vld [vmem:[#allocation8 + $0x54] ss:$8 sps:$4 sm:$0xff]   ;;  %v7305_v9 = vcombine.high %v3869_v27, %v3873_v11  ;;  %v3913_v35 = vld [vmem:[#allocation7 + $0xae8] sm:$0xff] }
 0x31d   :  { %3784 = vmatpush1.bf16.msra.mxu1 %v7244_v58  ;;  %v7296_v58 = vcombine.low %v3861_v36, %v3865_v5  ;;  %v3917_v36 = vld [vmem:[#allocation7 + $0xb08] sm:$0xff] }
 0x31e   :  { %3785 = vmatprep.subr.bf16.mxu1 %v7253_v1  ;;  %v3877_v1 = vld [vmem:[#allocation7 + $0x9c8] sm:$0xff] }
 0x31f   :  { %5655 = vmatpush1.bf16.msra.mxu0 %v7498_v8  ;;  %v3881_v8 = vld [vmem:[#allocation7 + $0x9e8] sm:$0xff] }
 0x320   :  { %5656 = vmatprep.subr.bf16.mxu0 %v7507_v63  ;;  %v7313_v16 = vcombine.high %v3877_v1, %v3881_v8  ;;  %v3921_v5 = vld [vmem:[#allocation7 + $0xb28] sm:$0xff] }
 0x321   :  { %3786 = vmatpush1.bf16.msra.mxu1 %v7252_v14  ;;  %v7304_v14 = vcombine.low %v3869_v27, %v3873_v11  ;;  %v7832_v27 = vld [vmem:[#allocation8 + $0xb0] ss:$8 sps:$4 sm:$0xff]   ;;  %v7837_v11 = vld [vmem:[#allocation8 + $0xc4] ss:$8 sps:$4 sm:$0xff]  }
 0x322   :  { %4629 = vmatprep.subr.bf16.mxu1 %v7257_v4 }
 0x323   :  { %5657 = vmatpush1.bf16.msra.mxu0 %v7506_v7  ;;  %v3885_v7 = vld [vmem:[#allocation7 + $0xa08] sm:$0xff] }
 0x324   :  { %3788 = vmatmul.mubr.bf16.vlgmr.msra.gmra.mrb[20].mxu1 %v8467_v19  ;;  %6512 = vmatprep.subr.bf16.mxu0 %v7801_v54  ;;  %v7281_v19 = vcombine.high %v3845_v13, %v3849_v21  ;;  %v7822_v54 = vld [vmem:[#allocation8 + $0x74] ss:$8 sps:$4 sm:$0xff]   ;;  %v3901_v13 = vld [vmem:[#allocation7 + $0xa88] sm:$0xff] }
 0x325   :  { %4630 = vmatpush1.bf16.msra.mxu1 %v7256_v41  ;;  %4661 = vmatprep.mubr.bf16.mxu1 %v8494_v62  ;;  %v7312_v41 = vcombine.low %v3877_v1, %v3881_v8  ;;  %v3905_v21 = vld [vmem:[#allocation7 + $0xaa8] sm:$0xff] }
 0x326   :  { %5659 = vmatmul.mubr.bf16.vlgmr.msra.gmra.mrb[28].mxu0 %v8537_v33  ;;  %4631 = vmatprep.subr.bf16.mxu1 %v7265_v18  ;;  %v7321_v18 = vcombine.high %v3885_v7, %v3889_v20  ;;  %v3941_v8 = vld [vmem:[#allocation7 + $0xbc8] sm:$0xff] }
 0x327   :  { %6513 = vmatpush1.bf16.msra.mxu0 %v7799_v10  ;;  %v7820_v10 = vld [vmem:[#allocation8 + $0x70] ss:$8 sps:$4 sm:$0xff]  }
 0x328   :  { %6514 = vmatprep.subr.bf16.mxu0 %v7804_v55  ;;  %v7825_v55 = vld [vmem:[#allocation8 + $0x84] ss:$8 sps:$4 sm:$0xff]  }
 0x329   :  { %4632 = vmatpush1.bf16.msra.mxu1 %v7264_v12  ;;  %v7320_v12 = vcombine.low %v3885_v7, %v3889_v20  ;;  %v7841_v7 = vld [vmem:[#allocation8 + $0xe0] ss:$8 sps:$4 sm:$0xff]   ;;  %v7846_v20 = vld [vmem:[#allocation8 + $0xf4] ss:$8 sps:$4 sm:$0xff]  }
 0x32a   :  { %4633 = vmatprep.subr.bf16.mxu1 %v7273_v37  ;;  %v7329_v37 = vcombine.high %v3893_v17, %v3897_v15 }
 0x32b   :  { %6515 = vmatpush1.bf16.msra.mxu0 %v7802_v47  ;;  %v7823_v47 = vld [vmem:[#allocation8 + $0x80] ss:$8 sps:$4 sm:$0xff]  }
 0x32c   :  { %6516 = vmatprep.subr.bf16.mxu0 %v7807_v24  ;;  %v7828_v24 = vld [vmem:[#allocation8 + $0x94] ss:$8 sps:$4 sm:$0xff]  }
 0x32d   :  { %4634 = vmatpush1.bf16.msra.mxu1 %v7272_v31  ;;  %v7328_v31 = vcombine.low %v3893_v17, %v3897_v15  ;;  %v7844_v17 = vld [vmem:[#allocation8 + $0xf0] ss:$8 sps:$4 sm:$0xff]  }
 0x32e   :  { %4635 = vmatprep.subr.bf16.mxu1 %v7281_v19  ;;  %v7337_v19 = vcombine.high %v3901_v13, %v3905_v21 }
 0x32f   :  { %6517 = vmatpush1.bf16.msra.mxu0 %v7805_v28  ;;  %v7826_v28 = vld [vmem:[#allocation8 + $0x90] ss:$8 sps:$4 sm:$0xff]  }
 0x330   :  { %6518 = vmatprep.subr.bf16.mxu0 %v7810_v25  ;;  %v7831_v25 = vld [vmem:[#allocation8 + $0xa4] ss:$8 sps:$4 sm:$0xff]  }
 0x331   :  { %4636 = vmatpush1.bf16.msra.mxu1 %v7280_v38  ;;  %v7336_v38 = vcombine.low %v3901_v13, %v3905_v21  ;;  %v3847_v21 = vld [vmem:[#allocation7 + $0x8d8] sm:$0xff] }
 0x332   :  { %4637 = vmatprep.subr.bf16.mxu1 %v7289_v57  ;;  %v7345_v57 = vcombine.high %v3909_v32, %v3913_v35 }
 0x333   :  { %6519 = vmatpush1.bf16.msra.mxu0 %v7808_v39  ;;  %v7829_v39 = vld [vmem:[#allocation8 + $0xa0] ss:$8 sps:$4 sm:$0xff]  }
 0x334   :  { %6520 = vmatprep.subr.bf16.mxu0 %v7813_v34  ;;  %v7344_v34 = vcombine.low %v3909_v32, %v3913_v35  ;;  %v3859_v32 = vld [vmem:[#allocation7 + $0x938] sm:$0xff] }
 0x335   :  { %4638 = vmatpush1.bf16.msra.mxu1 %v7288_v52  ;;  %v7353_v52 = vcombine.high %v3917_v36, %v3921_v5 }
 0x336   :  { %4639 = vmatprep.subr.bf16.mxu1 %v7297_v53  ;;  %v3929_v53 = vld [vmem:[#allocation7 + $0xb68] sm:$0xff] }
 0x337   :  { %v2792_v2 = vpop.f32.mrb[28].mxu1  ;;  %6521 = vmatpush1.bf16.msra.mxu0 %v7811_v42  ;;  %v7352_v42 = vcombine.low %v3917_v36, %v3921_v5  ;;  %v3871_v36 = vld [vmem:[#allocation7 + $0x998] sm:$0xff] }
 0x338   :  { %v8551_v60 = vadd.f32 %v2792_v2, %v1845_v56  ;;  %v2794_v61 = vpop.f32.mrb[29].mxu1  ;;  %6522 = vmatprep.subr.bf16.mxu0 %v7816_v6  ;;  %v7361_v56 = vcombine.high %v3925_v23, %v3929_v53  ;;  %v3933_v6 = vld [vmem:[#allocation7 + $0xb88] sm:$0xff]  ;;  %v7360_v2 = vcombine.low %v3925_v23, %v3929_v53  ;;  %v3875_v5 = vld [vmem:[#allocation7 + $0x9b8] sm:$0xff] }
 0x339   :  { %v8553_v63 = vadd.f32 %v2794_v61, %v1847_v0  ;;  %v2796_v3 = vpop.f32.mrb[30].mxu1  ;;  %4640 = vmatpush1.bf16.msra.mxu1 %v7296_v58  ;;  %v3937_v0 = vld [vmem:[#allocation7 + $0xba8] sm:$0xff]  ;;  %v7838_v61 = vld [vmem:[#allocation8 + $0xd0] ss:$8 sps:$4 sm:$0xff]   ;;  %v7308_v23 = vcombine.low %v3871_v36, %v3875_v5 }
 0x33a   :  { %v2797_v4 = vpop.f32.mrb[31].mxu1  ;;  %4641 = vmatprep.subr.bf16.mxu1 %v7305_v9  ;;  %v7835_v58 = vld [vmem:[#allocation8 + $0xc0] ss:$8 sps:$4 sm:$0xff]   ;;  %v7840_v9 = vld [vmem:[#allocation8 + $0xd4] ss:$8 sps:$4 sm:$0xff]   ;;  %v7369_v1 = vcombine.high %v3933_v6, %v3937_v0  ;;  %v7368_v3 = vcombine.low %v3933_v6, %v3937_v0 }
 0x33b   :  { %6523 = vmatpush1.bf16.msra.mxu0 %v7814_v50  ;;  %v3945_v50 = vld [vmem:[#allocation7 + $0xbe8] sm:$0xff]  ;;  %v3823_v4 = vld [vmem:[#allocation7 + $0x818] sm:$0xff] }
 0x33c   :  { %6524 = vmatprep.subr.bf16.mxu0 %v7819_v22  ;;  %v7843_v22 = vld [vmem:[#allocation8 + $0xe4] ss:$8 sps:$4 sm:$0xff]   ;;  %v3895_v6 = vld [vmem:[#allocation7 + $0xa58] sm:$0xff] }
 0x33d   :  { %4642 = vmatpush1.bf16.msra.mxu1 %v7304_v14  ;;  %v7377_v14 = vcombine.high %v3941_v8, %v3945_v50  ;;  %v3899_v0 = vld [vmem:[#allocation7 + $0xa78] sm:$0xff] }
 0x33e   :  { %4643 = vmatprep.subr.bf16.mxu1 %v7313_v16  ;;  %v3827_v16 = vld [vmem:[#allocation7 + $0x838] sm:$0xff] }
 0x33f   :  { %6525 = vmatpush1.bf16.msra.mxu0 %v7817_v40  ;;  %v7376_v40 = vcombine.low %v3941_v8, %v3945_v50  ;;  %v7260_v15 = vcombine.low %v3823_v4, %v3827_v16  ;;  %v7332_v8 = vcombine.low %v3895_v6, %v3899_v0 }
 0x340   :  { %6526 = vmatprep.subr.bf16.mxu0 %v7822_v54  ;;  %v7261_v54 = vcombine.high %v3823_v4, %v3827_v16  ;;  %v3919_v4 = vld [vmem:[#allocation7 + $0xb18] sm:$0xff] }
 0x341   :  { %4644 = vmatpush1.bf16.msra.mxu1 %v7312_v41  ;;  %v3831_v41 = vld [vmem:[#allocation7 + $0x858] sm:$0xff] }
 0x342   :  { %4645 = vmatprep.subr.bf16.mxu1 %v7321_v18  ;;  %v3835_v18 = vld [vmem:[#allocation7 + $0x878] sm:$0xff] }
 0x343   :  { %6527 = vmatpush1.bf16.msra.mxu0 %v7820_v10  ;;  %v7269_v10 = vcombine.high %v3831_v41, %v3835_v18  ;;  %v3923_v16 = vld [vmem:[#allocation7 + $0xb38] sm:$0xff] }
 0x344   :  { %6528 = vmatprep.subr.bf16.mxu0 %v7825_v55  ;;  %v3839_v55 = vld [vmem:[#allocation7 + $0x898] sm:$0xff] }
 0x345   :  { %4646 = vmatpush1.bf16.msra.mxu1 %v7320_v12  ;;  %v3843_v12 = vld [vmem:[#allocation7 + $0x8b8] sm:$0xff] }
 0x346   :  { %4647 = vmatprep.subr.bf16.mxu1 %v7329_v37  ;;  %v7268_v37 = vcombine.low %v3831_v41, %v3835_v18  ;;  %v7277_v13 = vcombine.high %v3839_v55, %v3843_v12  ;;  %v7356_v41 = vcombine.low %v3919_v4, %v3923_v16 }
 0x347   :  { %6529 = vmatpush1.bf16.msra.mxu0 %v7823_v47  ;;  %v3851_v47 = vld [vmem:[#allocation7 + $0x8f8] sm:$0xff] }
 0x348   :  { %6530 = vmatprep.subr.bf16.mxu0 %v7828_v24  ;;  %v7276_v24 = vcombine.low %v3839_v55, %v3843_v12  ;;  %v7284_v35 = vcombine.low %v3847_v21, %v3851_v47  ;;  %v3943_v12 = vld [vmem:[#allocation7 + $0xbd8] sm:$0xff] }
 0x349   :  { %4648 = vmatpush1.bf16.msra.mxu1 %v7328_v31  ;;  %v7285_v31 = vcombine.high %v3847_v21, %v3851_v47  ;;  %v4777_v47 = vld [vmem:[#allocation7 + $0xc08] sm:$0xff] }
 0x34a   :  { %4649 = vmatprep.subr.bf16.mxu1 %v7337_v19  ;;  %v3855_v19 = vld [vmem:[#allocation7 + $0x918] sm:$0xff] }
 0x34b   :  { %6531 = vmatpush1.bf16.msra.mxu0 %v7826_v28  ;;  %v7293_v28 = vcombine.high %v3855_v19, %v3859_v32 }
 0x34c   :  { %6532 = vmatprep.subr.bf16.mxu0 %v7831_v25  ;;  %v3863_v25 = vld [vmem:[#allocation7 + $0x958] sm:$0xff] }
 0x34d   :  { %4650 = vmatpush1.bf16.msra.mxu1 %v7336_v38  ;;  %v3867_v38 = vld [vmem:[#allocation7 + $0x978] sm:$0xff] }
 0x34e   :  { %4651 = vmatprep.subr.bf16.mxu1 %v7345_v57  ;;  %v7292_v57 = vcombine.low %v3855_v19, %v3859_v32  ;;  %v4785_v32 = vld [vmem:[#allocation7 + $0xc48] sm:$0xff] }
 0x34f   :  { %6533 = vmatpush1.bf16.msra.mxu0 %v7829_v39  ;;  %v7300_v39 = vcombine.low %v3863_v25, %v3867_v38 }
 0x350   :  { %6534 = vmatprep.subr.bf16.mxu0 %v7834_v30  ;;  %v7309_v30 = vcombine.high %v3871_v36, %v3875_v5 }
 0x351   :  { %4652 = vmatpush1.bf16.msra.mxu1 %v7344_v34  ;;  %v3879_v34 = vld [vmem:[#allocation7 + $0x9d8] sm:$0xff] }
 0x352   :  { %4653 = vmatprep.subr.bf16.mxu1 %v7353_v52  ;;  %v3883_v52 = vld [vmem:[#allocation7 + $0x9f8] sm:$0xff] }
 0x353   :  { %6535 = vmatpush1.bf16.msra.mxu0 %v7832_v27  ;;  %v7317_v53 = vcombine.high %v3879_v34, %v3883_v52  ;;  %v3887_v27 = vld [vmem:[#allocation7 + $0xa18] sm:$0xff] }
 0x354   :  { %6536 = vmatprep.subr.bf16.mxu0 %v7837_v11  ;;  %v3891_v11 = vld [vmem:[#allocation7 + $0xa38] sm:$0xff] }
 0x355   :  { %4654 = vmatpush1.bf16.msra.mxu1 %v7352_v42  ;;  %v7316_v42 = vcombine.low %v3879_v34, %v3883_v52 }
 0x356   :  { %4655 = vmatprep.subr.bf16.mxu1 %v7361_v56  ;;  %v7325_v56 = vcombine.high %v3887_v27, %v3891_v11 }
 0x357   :  { %6537 = vmatpush1.bf16.msra.mxu0 %v7835_v58  ;;  %v7324_v58 = vcombine.low %v3887_v27, %v3891_v11  ;;  %v4817_v11 = vld [vmem:[#allocation7 + $0xd48] sm:$0xff] }
 0x358   :  { %6538 = vmatprep.subr.bf16.mxu0 %v7840_v9  ;;  %v7333_v9 = vcombine.high %v3895_v6, %v3899_v0  ;;  %v4825_v0 = vld [vmem:[#allocation7 + $0xd88] sm:$0xff] }
 0x359   :  { %4656 = vmatpush1.bf16.msra.mxu1 %v7360_v2  ;;  %v3903_v2 = vld [vmem:[#allocation7 + $0xa98] sm:$0xff] }
 0x35a   :  { %4657 = vmatprep.subr.bf16.mxu1 %v7369_v1  ;;  %v3907_v1 = vld [vmem:[#allocation7 + $0xab8] sm:$0xff] }
 0x35b   :  { %6539 = vmatpush1.bf16.msra.mxu0 %v7838_v61  ;;  %v7341_v50 = vcombine.high %v3903_v2, %v3907_v1  ;;  %v3911_v61 = vld [vmem:[#allocation7 + $0xad8] sm:$0xff] }
 0x35c   :  { %6540 = vmatprep.subr.bf16.mxu0 %v7843_v22  ;;  %v3915_v22 = vld [vmem:[#allocation7 + $0xaf8] sm:$0xff] }
 0x35d   :  { %4658 = vmatpush1.bf16.msra.mxu1 %v7368_v3  ;;  %v7340_v3 = vcombine.low %v3903_v2, %v3907_v1  ;;  %v4833_v1 = vld [vmem:[#allocation7 + $0xdc8] sm:$0xff] }
 0x35e   :  { %4659 = vmatprep.subr.bf16.mxu1 %v7377_v14  ;;  %v7349_v14 = vcombine.high %v3911_v61, %v3915_v22 }
 0x35f   :  { %6541 = vmatpush1.bf16.msra.mxu0 %v7841_v7  ;;  %v7348_v7 = vcombine.low %v3911_v61, %v3915_v22 }
 0x360   :  { %6542 = vmatprep.subr.bf16.mxu0 %v7846_v20  ;;  %v7357_v20 = vcombine.high %v3919_v4, %v3923_v16 }
 0x361   :  { %4660 = vmatpush1.bf16.msra.mxu1 %v7376_v40  ;;  %v3927_v40 = vld [vmem:[#allocation7 + $0xb58] sm:$0xff] }
 0x362   :  { %4711 = vmatprep.subr.bf16.mxu1 %v7261_v54  ;;  %v3931_v54 = vld [vmem:[#allocation7 + $0xb78] sm:$0xff] }
 0x363   :  { %6543 = vmatpush1.bf16.msra.mxu0 %v7844_v17  ;;  %v7365_v18 = vcombine.high %v3927_v40, %v3931_v54  ;;  %v3935_v17 = vld [vmem:[#allocation7 + $0xb98] sm:$0xff] }
 0x364   :  { %4662 = vmatmul.mubr.bf16.vlgmr.msra.gmra.mrb[16].mxu1 %v8505_v43 }
 0x365   :  { %4712 = vmatpush1.bf16.msra.mxu1 %v7260_v15  ;;  %4743 = vmatprep.mubr.bf16.mxu1 %v8494_v62  ;;  %v7301_v62 = vcombine.high %v3863_v25, %v3867_v38  ;;  %v3939_v15 = vld [vmem:[#allocation7 + $0xbb8] sm:$0xff]  ;;  %v4793_v38 = vld [vmem:[#allocation7 + $0xc88] sm:$0xff] }
 0x366   :  { %4713 = vmatprep.subr.bf16.mxu1 %v7269_v10  ;;  %v7364_v10 = vcombine.low %v3927_v40, %v3931_v54  ;;  %v7373_v55 = vcombine.high %v3935_v17, %v3939_v15 }
 0x369   :  { %4714 = vmatpush1.bf16.msra.mxu1 %v7268_v37  ;;  %v3947_v37 = vld [vmem:[#allocation7 + $0xbf8] sm:$0xff] }
 0x36a   :  { %4715 = vmatprep.subr.bf16.mxu1 %v7277_v13  ;;  %v7372_v13 = vcombine.low %v3935_v17, %v3939_v15  ;;  %v7381_v21 = vcombine.high %v3943_v12, %v3947_v37 }
 0x36d   :  { %4716 = vmatpush1.bf16.msra.mxu1 %v7276_v24  ;;  %v4781_v24 = vld [vmem:[#allocation7 + $0xc28] sm:$0xff] }
 0x36e   :  { %4717 = vmatprep.subr.bf16.mxu1 %v7285_v31  ;;  %v7380_v31 = vcombine.low %v3943_v12, %v3947_v37  ;;  %v7385_v19 = vcombine.high %v4777_v47, %v4781_v24  ;;  %v7847_v12 = vld [vmem:[#allocation8 + $0x100] ss:$8 sps:$4 sm:$0xff]   ;;  %v7852_v37 = vld [vmem:[#allocation8 + $0x114] ss:$8 sps:$4 sm:$0xff]  }
 0x371   :  { %4718 = vmatpush1.bf16.msra.mxu1 %v7284_v35  ;;  %v4789_v35 = vld [vmem:[#allocation7 + $0xc68] sm:$0xff] }
 0x372   :  { %4719 = vmatprep.subr.bf16.mxu1 %v7293_v28  ;;  %v7384_v28 = vcombine.low %v4777_v47, %v4781_v24  ;;  %v7393_v25 = vcombine.high %v4785_v32, %v4789_v35  ;;  %v7392_v36 = vcombine.low %v4785_v32, %v4789_v35  ;;  %v4861_v47 = vld [vmem:[#allocation7 + $0xea8] sm:$0xff]  ;;  %v7850_v24 = vld [vmem:[#allocation8 + $0x110] ss:$8 sps:$4 sm:$0xff]  }
 0x373   :  { %v4865_v35 = vld [vmem:[#allocation7 + $0xec8] sm:$0xff] }
 0x375   :  { %4720 = vmatpush1.bf16.msra.mxu1 %v7292_v57  ;;  %v4797_v57 = vld [vmem:[#allocation7 + $0xca8] sm:$0xff] }
 0x376   :  { %4721 = vmatprep.subr.bf16.mxu1 %v7301_v62  ;;  %v7849_v62 = vld [vmem:[#allocation8 + $0x104] ss:$8 sps:$4 sm:$0xff]   ;;  %v7401_v5 = vcombine.high %v4793_v38, %v4797_v57  ;;  %v7400_v34 = vcombine.low %v4793_v38, %v4797_v57  ;;  %v7858_v38 = vld [vmem:[#allocation8 + $0x134] ss:$8 sps:$4 sm:$0xff]  }
 0x377   :  { %6553 = vmatprep.subr.bf16.mxu0 %v7849_v62 }
 0x379   :  { %4722 = vmatpush1.bf16.msra.mxu1 %v7300_v39  ;;  %v4801_v39 = vld [vmem:[#allocation7 + $0xcc8] sm:$0xff] }
 0x37a   :  { %4723 = vmatprep.subr.bf16.mxu1 %v7309_v30  ;;  %v4805_v30 = vld [vmem:[#allocation7 + $0xce8] sm:$0xff] }
 0x37b   :  { %v7409_v52 = vcombine.high %v4801_v39, %v4805_v30  ;;  %v7408_v27 = vcombine.low %v4801_v39, %v4805_v30  ;;  %v7856_v39 = vld [vmem:[#allocation8 + $0x130] ss:$8 sps:$4 sm:$0xff]   ;;  %v7861_v30 = vld [vmem:[#allocation8 + $0x144] ss:$8 sps:$4 sm:$0xff]  }
 0x37d   :  { %4724 = vmatpush1.bf16.msra.mxu1 %v7308_v23  ;;  %v4809_v23 = vld [vmem:[#allocation7 + $0xd08] sm:$0xff] }
 0x37e   :  { %4725 = vmatprep.subr.bf16.mxu1 %v7317_v53  ;;  %v4813_v53 = vld [vmem:[#allocation7 + $0xd28] sm:$0xff] }
 0x381   :  { %4726 = vmatpush1.bf16.msra.mxu1 %v7316_v42  ;;  %v4821_v42 = vld [vmem:[#allocation7 + $0xd68] sm:$0xff] }
 0x382   :  { %4727 = vmatprep.subr.bf16.mxu1 %v7325_v56  ;;  %v7416_v56 = vcombine.low %v4809_v23, %v4813_v53  ;;  %v7425_v6 = vcombine.high %v4817_v11, %v4821_v42 }
 0x385   :  { %4728 = vmatpush1.bf16.msra.mxu1 %v7324_v58  ;;  %v4829_v58 = vld [vmem:[#allocation7 + $0xda8] sm:$0xff] }
 0x386   :  { %4729 = vmatprep.subr.bf16.mxu1 %v7333_v9  ;;  %v7424_v9 = vcombine.low %v4817_v11, %v4821_v42  ;;  %v7433_v2 = vcombine.high %v4825_v0, %v4829_v58  ;;  %v7432_v61 = vcombine.low %v4825_v0, %v4829_v58  ;;  %v7862_v0 = vld [vmem:[#allocation8 + $0x150] ss:$8 sps:$4 sm:$0xff]   ;;  %v7867_v58 = vld [vmem:[#allocation8 + $0x164] ss:$8 sps:$4 sm:$0xff]  }
 0x389   :  { %4730 = vmatpush1.bf16.msra.mxu1 %v7332_v8  ;;  %v4837_v8 = vld [vmem:[#allocation7 + $0xde8] sm:$0xff] }
 0x38a   :  { %4731 = vmatprep.subr.bf16.mxu1 %v7341_v50 }
 0x38d   :  { %4732 = vmatpush1.bf16.msra.mxu1 %v7340_v3 }
 0x38e   :  { %4733 = vmatprep.subr.bf16.mxu1 %v7349_v14  ;;  %v7441_v14 = vcombine.high %v4833_v1, %v4837_v8 }
 0x391   :  { %4734 = vmatpush1.bf16.msra.mxu1 %v7348_v7  ;;  %v4841_v7 = vld [vmem:[#allocation7 + $0xe08] sm:$0xff] }
 0x392   :  { %4735 = vmatprep.subr.bf16.mxu1 %v7357_v20  ;;  %v4845_v20 = vld [vmem:[#allocation7 + $0xe28] sm:$0xff] }
 0x393   :  { %v7449_v17 = vcombine.high %v4841_v7, %v4845_v20 }
 0x395   :  { %4736 = vmatpush1.bf16.msra.mxu1 %v7356_v41 }
 0x396   :  { %4737 = vmatprep.subr.bf16.mxu1 %v7365_v18  ;;  %v7440_v18 = vcombine.low %v4833_v1, %v4837_v8  ;;  %v4897_v1 = vld [vmem:[#allocation7 + $0xfc8] sm:$0xff] }
 0x397   :  { %v4901_v8 = vld [vmem:[#allocation7 + $0xfe8] sm:$0xff] }
 0x399   :  { %4738 = vmatpush1.bf16.msra.mxu1 %v7364_v10  ;;  %v4849_v10 = vld [vmem:[#allocation7 + $0xe48] sm:$0xff] }
 0x39a   :  { %4739 = vmatprep.subr.bf16.mxu1 %v7373_v55  ;;  %v4853_v55 = vld [vmem:[#allocation7 + $0xe68] sm:$0xff] }
 0x39d   :  { %4740 = vmatpush1.bf16.msra.mxu1 %v7372_v13  ;;  %v7448_v13 = vcombine.low %v4841_v7, %v4845_v20  ;;  %v7873_v7 = vld [vmem:[#allocation8 + $0x184] ss:$8 sps:$4 sm:$0xff]   ;;  %v7504_v20 = vcombine.low %v4897_v1, %v4901_v8 }
 0x39e   :  { %4741 = vmatprep.subr.bf16.mxu1 %v7381_v21  ;;  %v4857_v21 = vld [vmem:[#allocation7 + $0xe88] sm:$0xff] }
 0x39f   :  { %v7465_v32 = vcombine.high %v4857_v21, %v4861_v47  ;;  %v7464_v57 = vcombine.low %v4857_v21, %v4861_v47  ;;  %v4803_v21 = vld [vmem:[#allocation7 + $0xcd8] sm:$0xff] }
 0x3a0   :  { %v4807_v47 = vld [vmem:[#allocation7 + $0xcf8] sm:$0xff] }
 0x3a1   :  { %4742 = vmatpush1.bf16.msra.mxu1 %v7380_v31  ;;  %v7855_v31 = vld [vmem:[#allocation8 + $0x124] ss:$8 sps:$4 sm:$0xff]  }
 0x3a2   :  { %5585 = vmatprep.subr.bf16.mxu1 %v7385_v19  ;;  %v7456_v19 = vcombine.low %v4849_v10, %v4853_v55 }
 0x3a4   :  { %4744 = vmatmul.mubr.bf16.vlgmr.msra.gmra.mrb[20].mxu1 %v8505_v43  ;;  %v7417_v43 = vcombine.high %v4809_v23, %v4813_v53  ;;  %v4881_v23 = vld [vmem:[#allocation7 + $0xf48] sm:$0xff] }
 0x3a5   :  { %5586 = vmatpush1.bf16.msra.mxu1 %v7384_v28  ;;  %5617 = vmatprep.mubr.bf16.mxu1 %v8514_v26  ;;  %v4869_v28 = vld [vmem:[#allocation7 + $0xee8] sm:$0xff] }
 0x3a6   :  { %5587 = vmatprep.subr.bf16.mxu1 %v7393_v25  ;;  %v7853_v25 = vld [vmem:[#allocation8 + $0x120] ss:$8 sps:$4 sm:$0xff]   ;;  %v7473_v62 = vcombine.high %v4865_v35, %v4869_v28 }
 0x3a7   :  { %v4885_v53 = vld [vmem:[#allocation7 + $0xf68] sm:$0xff] }
 0x3a8   :  { %v7489_v42 = vcombine.high %v4881_v23, %v4885_v53 }
 0x3a9   :  { %5588 = vmatpush1.bf16.msra.mxu1 %v7392_v36  ;;  %v4873_v36 = vld [vmem:[#allocation7 + $0xf08] sm:$0xff] }
 0x3aa   :  { %5589 = vmatprep.subr.bf16.mxu1 %v7401_v5  ;;  %v4877_v5 = vld [vmem:[#allocation7 + $0xf28] sm:$0xff] }
 0x3ab   :  { %v7480_v11 = vcombine.low %v4873_v36, %v4877_v5 }
 0x3ad   :  { %5590 = vmatpush1.bf16.msra.mxu1 %v7400_v34  ;;  %v7472_v34 = vcombine.low %v4865_v35, %v4869_v28  ;;  %v4811_v35 = vld [vmem:[#allocation7 + $0xd18] sm:$0xff] }
 0x3ae   :  { %5591 = vmatprep.subr.bf16.mxu1 %v7409_v52  ;;  %v7481_v52 = vcombine.high %v4873_v36, %v4877_v5  ;;  %v4815_v28 = vld [vmem:[#allocation7 + $0xd38] sm:$0xff]  ;;  %v7883_v5 = vld [vmem:[#allocation8 + $0x1c0] ss:$8 sps:$4 sm:$0xff]  }
 0x3af   :  { %v4823_v36 = vld [vmem:[#allocation7 + $0xd78] sm:$0xff] }
 0x3b1   :  { %5592 = vmatpush1.bf16.msra.mxu1 %v7408_v27  ;;  %v7859_v27 = vld [vmem:[#allocation8 + $0x140] ss:$8 sps:$4 sm:$0xff]  }
 0x3b2   :  { %5593 = vmatprep.subr.bf16.mxu1 %v7417_v43  ;;  %v7864_v43 = vld [vmem:[#allocation8 + $0x154] ss:$8 sps:$4 sm:$0xff]  }
 0x3b5   :  { %5594 = vmatpush1.bf16.msra.mxu1 %v7416_v56  ;;  %v4889_v56 = vld [vmem:[#allocation7 + $0xf88] sm:$0xff] }
 0x3b6   :  { %5595 = vmatprep.subr.bf16.mxu1 %v7425_v6  ;;  %v4893_v6 = vld [vmem:[#allocation7 + $0xfa8] sm:$0xff] }
 0x3b9   :  { %v5578_v50 = vpop.f32.mrb[24].mxu0  ;;  %5596 = vmatpush1.bf16.msra.mxu1 %v7424_v9  ;;  %v7488_v9 = vcombine.low %v4881_v23, %v4885_v53  ;;  %v4831_v23 = vld [vmem:[#allocation7 + $0xdb8] sm:$0xff] }
 0x3ba   :  { %v7708_v22 = vadd.f32 %v5578_v50, %v8530_v29  ;;  %v5580_v3 = vpop.f32.mrb[25].mxu0  ;;  %5597 = vmatprep.subr.bf16.mxu1 %v7433_v2  ;;  %v7497_v2 = vcombine.high %v4889_v56, %v4893_v6  ;;  %v7865_v50 = vld [vmem:[#allocation8 + $0x160] ss:$8 sps:$4 sm:$0xff]   ;;  %v7886_v53 = vld [vmem:[#allocation8 + $0x1d0] ss:$8 sps:$4 sm:$0xff]  }
 0x3bb   :  { %v7711_v4 = vadd.f32 %v5580_v3, %v8532_v59  ;;  %v5582_v16 = vpop.f32.mrb[26].mxu0  ;;  %v7457_v59 = vcombine.high %v4849_v10, %v4853_v55  ;;  %v7505_v3 = vcombine.high %v4897_v1, %v4901_v8  ;;  %v4795_v55 = vld [vmem:[#allocation7 + $0xc98] sm:$0xff] }
 0x3bc   :  { %v5716_v40 = vmax.f32 %v7708_v22, 0.0  ;;  %v5583_v54 = vpop.f32.mrb[27].mxu0  ;;  %v7496_v22 = vcombine.low %v4889_v56, %v4893_v6  ;;  %v7868_v16 = vld [vmem:[#allocation8 + $0x170] ss:$8 sps:$4 sm:$0xff]  }
 0x3bd   :  { %v5717_v41 = vmax.f32 %v7711_v4, 0.0  ;;  %5598 = vmatpush1.bf16.msra.mxu1 %v7432_v61  ;;  %v7870_v61 = vld [vmem:[#allocation8 + $0x174] ss:$8 sps:$4 sm:$0xff]  }
 0x3be   :  { %5599 = vmatprep.subr.bf16.mxu1 %v7441_v14  ;;  %v5724_v29 = vpack.c.bf16 %v5716_v40, %v5716_v40  ;;  %v4779_v14 = vld [vmem:[#allocation7 + $0xc18] sm:$0xff] }
 0x3bf   :  { %v5725_v15 = vpack.c.bf16 %v5717_v41, %v5717_v41  ;;  %v4783_v4 = vld [vmem:[#allocation7 + $0xc38] sm:$0xff] }
 0x3c0   :  { %v7389_v40 = vcombine.high %v4779_v14, %v4783_v4  ;;  %v4787_v54 = vld [vmem:[#allocation7 + $0xc58] sm:$0xff] }
 0x3c1   :  { %6544 = vmatprep.mubr.bf16.mxu0 %v5725_v15  ;;  %5600 = vmatpush1.bf16.msra.mxu1 %v7440_v18  ;;  %v4791_v41 = vld [vmem:[#allocation7 + $0xc78] sm:$0xff]  ;;  %v7871_v18 = vld [vmem:[#allocation8 + $0x180] ss:$8 sps:$4 sm:$0xff]   ;;  %v7388_v15 = vcombine.low %v4779_v14, %v4783_v4 }
 0x3c2   :  { %6545 = vmatmul.mubr.bf16.vlgmr.msra.gmra.mrb[32].mxu0 %v5724_v29  ;;  %5601 = vmatprep.subr.bf16.mxu1 %v7449_v17  ;;  %v7876_v17 = vld [vmem:[#allocation8 + $0x194] ss:$8 sps:$4 sm:$0xff]   ;;  %v7397_v10 = vcombine.high %v4787_v54, %v4791_v41  ;;  %v7874_v29 = vld [vmem:[#allocation8 + $0x190] ss:$8 sps:$4 sm:$0xff]  }
 0x3c3   :  { %6554 = vmatpush1.bf16.msra.mxu0 %v7847_v12  ;;  %v4799_v12 = vld [vmem:[#allocation7 + $0xcb8] sm:$0xff] }
 0x3c4   :  { %6555 = vmatprep.subr.bf16.mxu0 %v7852_v37  ;;  %v7879_v37 = vld [vmem:[#allocation8 + $0x1a4] ss:$8 sps:$4 sm:$0xff]   ;;  %v4843_v8 = vld [vmem:[#allocation7 + $0xe18] sm:$0xff] }
 0x3c5   :  { %5602 = vmatpush1.bf16.msra.mxu1 %v7448_v13  ;;  %v7396_v13 = vcombine.low %v4787_v54, %v4791_v41  ;;  %v4851_v14 = vld [vmem:[#allocation7 + $0xe58] sm:$0xff] }
 0x3c6   :  { %5603 = vmatprep.subr.bf16.mxu1 %v7457_v59  ;;  %v7405_v59 = vcombine.high %v4795_v55, %v4799_v12  ;;  %v4855_v4 = vld [vmem:[#allocation7 + $0xe78] sm:$0xff] }
 0x3c7   :  { %6556 = vmatpush1.bf16.msra.mxu0 %v7850_v24  ;;  %v7877_v24 = vld [vmem:[#allocation8 + $0x1a0] ss:$8 sps:$4 sm:$0xff]   ;;  %v4867_v54 = vld [vmem:[#allocation7 + $0xed8] sm:$0xff] }
 0x3c8   :  { %6557 = vmatprep.subr.bf16.mxu0 %v7855_v31  ;;  %v7882_v31 = vld [vmem:[#allocation8 + $0x1b4] ss:$8 sps:$4 sm:$0xff]  }
 0x3c9   :  { %5604 = vmatpush1.bf16.msra.mxu1 %v7456_v19  ;;  %v7404_v19 = vcombine.low %v4795_v55, %v4799_v12  ;;  %v4871_v41 = vld [vmem:[#allocation7 + $0xef8] sm:$0xff] }
 0x3ca   :  { %5605 = vmatprep.subr.bf16.mxu1 %v7465_v32  ;;  %v7413_v32 = vcombine.high %v4803_v21, %v4807_v47  ;;  %v7476_v55 = vcombine.low %v4867_v54, %v4871_v41 }
 0x3cb   :  { %6558 = vmatpush1.bf16.msra.mxu0 %v7853_v25  ;;  %v7880_v25 = vld [vmem:[#allocation8 + $0x1b0] ss:$8 sps:$4 sm:$0xff]  }
 0x3cc   :  { %6559 = vmatprep.subr.bf16.mxu0 %v7858_v38  ;;  %v7885_v38 = vld [vmem:[#allocation8 + $0x1c4] ss:$8 sps:$4 sm:$0xff]  }
 0x3cd   :  { %5606 = vmatpush1.bf16.msra.mxu1 %v7464_v57  ;;  %v7421_v57 = vcombine.high %v4811_v35, %v4815_v28 }
 0x3ce   :  { %5607 = vmatprep.subr.bf16.mxu1 %v7473_v62  ;;  %v4819_v62 = vld [vmem:[#allocation7 + $0xd58] sm:$0xff] }
 0x3cf   :  { %6560 = vmatpush1.bf16.msra.mxu0 %v7856_v39  ;;  %v7888_v39 = vld [vmem:[#allocation8 + $0x1d4] ss:$8 sps:$4 sm:$0xff]  }
 0x3d0   :  { %6561 = vmatprep.subr.bf16.mxu0 %v7861_v30  ;;  %v7420_v30 = vcombine.low %v4811_v35, %v4815_v28 }
 0x3d1   :  { %5608 = vmatpush1.bf16.msra.mxu1 %v7472_v34  ;;  %v7429_v34 = vcombine.high %v4819_v62, %v4823_v36 }
 0x3d2   :  { %5609 = vmatprep.subr.bf16.mxu1 %v7481_v52  ;;  %v4827_v52 = vld [vmem:[#allocation7 + $0xd98] sm:$0xff] }
 0x3d3   :  { %6562 = vmatpush1.bf16.msra.mxu0 %v7859_v27  ;;  %v7428_v27 = vcombine.low %v4819_v62, %v4823_v36  ;;  %v7436_v6 = vcombine.low %v4827_v52, %v4831_v23  ;;  %v7892_v62 = vld [vmem:[#allocation8 + $0x1f0] ss:$8 sps:$4 sm:$0xff]   ;;  %v7897_v36 = vld [vmem:[#allocation8 + $0x204] ss:$8 sps:$4 sm:$0xff]  }
 0x3d4   :  { %6563 = vmatprep.subr.bf16.mxu0 %v7864_v43  ;;  %v7437_v43 = vcombine.high %v4827_v52, %v4831_v23 }
 0x3d5   :  { %5610 = vmatpush1.bf16.msra.mxu1 %v7480_v11  ;;  %v4835_v11 = vld [vmem:[#allocation7 + $0xdd8] sm:$0xff] }
 0x3d6   :  { %5611 = vmatprep.subr.bf16.mxu1 %v7489_v42  ;;  %v4839_v42 = vld [vmem:[#allocation7 + $0xdf8] sm:$0xff] }
 0x3d7   :  { %6564 = vmatpush1.bf16.msra.mxu0 %v7862_v0 }
 0x3d8   :  { %6565 = vmatprep.subr.bf16.mxu0 %v7867_v58 }
 0x3d9   :  { %5612 = vmatpush1.bf16.msra.mxu1 %v7488_v9  ;;  %v7445_v9 = vcombine.high %v4835_v11, %v4839_v42 }
 0x3da   :  { %5613 = vmatprep.subr.bf16.mxu1 %v7497_v2 }
 0x3db   :  { %6566 = vmatpush1.bf16.msra.mxu0 %v7865_v50  ;;  %v4847_v50 = vld [vmem:[#allocation7 + $0xe38] sm:$0xff] }
 0x3dc   :  { %6567 = vmatprep.subr.bf16.mxu0 %v7870_v61 }
 0x3dd   :  { %5614 = vmatpush1.bf16.msra.mxu1 %v7496_v22  ;;  %v7444_v22 = vcombine.low %v4835_v11, %v4839_v42 }
 0x3de   :  { %5615 = vmatprep.subr.bf16.mxu1 %v7505_v3  ;;  %v7453_v3 = vcombine.high %v4843_v8, %v4847_v50 }
 0x3df   :  { %6568 = vmatpush1.bf16.msra.mxu0 %v7868_v16  ;;  %v7452_v16 = vcombine.low %v4843_v8, %v4847_v50  ;;  %v7903_v8 = vld [vmem:[#allocation8 + $0x224] ss:$8 sps:$4 sm:$0xff]  }
 0x3e0   :  { %6569 = vmatprep.subr.bf16.mxu0 %v7873_v7  ;;  %v4859_v7 = vld [vmem:[#allocation7 + $0xe98] sm:$0xff]  ;;  %v6695_v50 = vld [vmem:[#allocation11 + $0x88] sm:$0xff] }
 0x3e1   :  { %5616 = vmatpush1.bf16.msra.mxu1 %v7504_v20  ;;  %v4863_v20 = vld [vmem:[#allocation7 + $0xeb8] sm:$0xff] }
 0x3e2   :  { %5667 = vmatprep.subr.bf16.mxu1 %v7389_v40  ;;  %v7460_v40 = vcombine.low %v4851_v14, %v4855_v4 }
 0x3e3   :  { %6570 = vmatpush1.bf16.msra.mxu0 %v7871_v18  ;;  %v7468_v18 = vcombine.low %v4859_v7, %v4863_v20 }
 0x3e4   :  { %5618 = vmatmul.mubr.bf16.vlgmr.msra.gmra.mrb[16].mxu1 %v8537_v33  ;;  %6571 = vmatprep.subr.bf16.mxu0 %v7876_v17  ;;  %v7477_v17 = vcombine.high %v4867_v54, %v4871_v41  ;;  %v7901_v54 = vld [vmem:[#allocation8 + $0x220] ss:$8 sps:$4 sm:$0xff]  }
 0x3e5   :  { %5668 = vmatpush1.bf16.msra.mxu1 %v7388_v15  ;;  %5699 = vmatprep.mubr.bf16.mxu1 %v8514_v26  ;;  %v7412_v26 = vcombine.low %v4803_v21, %v4807_v47  ;;  %v4875_v15 = vld [vmem:[#allocation7 + $0xf18] sm:$0xff] }
 0x3e6   :  { %5669 = vmatprep.subr.bf16.mxu1 %v7397_v10  ;;  %v4879_v10 = vld [vmem:[#allocation7 + $0xf38] sm:$0xff] }
 0x3e7   :  { %6572 = vmatpush1.bf16.msra.mxu0 %v7874_v29  ;;  %v7485_v12 = vcombine.high %v4875_v15, %v4879_v10  ;;  %v4883_v29 = vld [vmem:[#allocation7 + $0xf58] sm:$0xff] }
 0x3e8   :  { %6573 = vmatprep.subr.bf16.mxu0 %v7879_v37  ;;  %v4887_v37 = vld [vmem:[#allocation7 + $0xf78] sm:$0xff] }
 0x3e9   :  { %5670 = vmatpush1.bf16.msra.mxu1 %v7396_v13  ;;  %v7484_v13 = vcombine.low %v4875_v15, %v4879_v10  ;;  %v4891_v21 = vld [vmem:[#allocation7 + $0xf98] sm:$0xff] }
 0x3ea   :  { %5671 = vmatprep.subr.bf16.mxu1 %v7405_v59  ;;  %v7493_v59 = vcombine.high %v4883_v29, %v4887_v37  ;;  %v4895_v47 = vld [vmem:[#allocation7 + $0xfb8] sm:$0xff] }
 0x3eb   :  { %6574 = vmatpush1.bf16.msra.mxu0 %v7877_v24  ;;  %v7492_v24 = vcombine.low %v4883_v29, %v4887_v37  ;;  %v7500_v35 = vcombine.low %v4891_v21, %v4895_v47  ;;  %v7906_v15 = vld [vmem:[#allocation8 + $0x234] ss:$8 sps:$4 sm:$0xff]   ;;  %v7904_v29 = vld [vmem:[#allocation8 + $0x230] ss:$8 sps:$4 sm:$0xff]  }
 0x3ec   :  { %6575 = vmatprep.subr.bf16.mxu0 %v7882_v31  ;;  %v7501_v31 = vcombine.high %v4891_v21, %v4895_v47  ;;  %v6700_v10 = vld [vmem:[#allocation11 + $0xb0] sm:$0xff]  ;;  %v7909_v21 = vld [vmem:[#allocation8 + $0x244] ss:$8 sps:$4 sm:$0xff]  }
 0x3ed   :  { %5672 = vmatpush1.bf16.msra.mxu1 %v7404_v19  ;;  %v4899_v19 = vld [vmem:[#allocation7 + $0xfd8] sm:$0xff]  ;;  %v6702_v47 = vld [vmem:[#allocation11 + $0xc0] sm:$0xff] }
 0x3ee   :  { %5673 = vmatprep.subr.bf16.mxu1 %v7413_v32  ;;  %v4903_v32 = vld [vmem:[#allocation7 + $0xff8] sm:$0xff] }
 0x3ef   :  { %6576 = vmatpush1.bf16.msra.mxu0 %v7880_v25  ;;  %v7509_v28 = vcombine.high %v4899_v19, %v4903_v32  ;;  %v7508_v25 = vcombine.low %v4899_v19, %v4903_v32  ;;  %v7907_v19 = vld [vmem:[#allocation8 + $0x240] ss:$8 sps:$4 sm:$0xff]  }
 0x3f0   :  { %6577 = vmatprep.subr.bf16.mxu0 %v7885_v38  ;;  %v7891_v38 = vld [vmem:[#allocation8 + $0x1e4] ss:$8 sps:$4 sm:$0xff]  }
 0x3f1   :  { %5674 = vmatpush1.bf16.msra.mxu1 %v7412_v26  ;;  %v7889_v26 = vld [vmem:[#allocation8 + $0x1e0] ss:$8 sps:$4 sm:$0xff]  }
 0x3f2   :  { %5675 = vmatprep.subr.bf16.mxu1 %v7421_v57  ;;  %v7894_v57 = vld [vmem:[#allocation8 + $0x1f4] ss:$8 sps:$4 sm:$0xff]  }
 0x3f3   :  { %6578 = vmatpush1.bf16.msra.mxu0 %v7883_v5  ;;  %v8570_v5 = vld [vmem:[#allocation5 + $0x10] sm:$0xff] }
 0x3f4   :  { %6579 = vmatprep.subr.bf16.mxu0 %v7888_v39  ;;  %v395_v39 = vrot.slane %v8570_v5, %v8385_v45  ;;  %v7898_v45 = vld [vmem:[#allocation8 + $0x210] ss:$8 sps:$4 sm:$0xff]  }
 0x3f5   :  { %5676 = vmatpush1.bf16.msra.mxu1 %v7420_v30  ;;  %v399_v30 = vrot.slane %v8570_v5, %v8389_v48  ;;  %v6694_v48 = vld [vmem:[#allocation11 + $0x80] sm:$0xff] }
 0x3f6   :  { %5677 = vmatprep.subr.bf16.mxu1 %v7429_v34 }
 0x3f7   :  { %6580 = vmatpush1.bf16.msra.mxu0 %v7886_v53 }
 0x3f8   :  { %6581 = vmatprep.subr.bf16.mxu0 %v7891_v38  ;;  %v6704_v38 = vld [vmem:[#allocation11 + $0xd0] sm:$0xff] }
 0x3f9   :  { %v5660_v56 = vpop.f32.mrb[28].mxu0  ;;  %5678 = vmatpush1.bf16.msra.mxu1 %v7428_v27 }
 0x3fa   :  { %v8564_v0 = vadd.f32 %v5660_v56, %v8551_v60  ;;  %v5662_v58 = vpop.f32.mrb[29].mxu0  ;;  %5679 = vmatprep.subr.bf16.mxu1 %v7437_v43  ;;  %v7461_v60 = vcombine.high %v4851_v14, %v4855_v4  ;;  %v6696_v14 = vld [vmem:[#allocation11 + $0x90] sm:$0xff]  ;;  %v6697_v4 = vld [vmem:[#allocation11 + $0x98] sm:$0xff] }
 0x3fb   :  { %v8567_v2 = vadd.f32 %v5662_v58, %v8553_v63  ;;  %v5664_v1 = vpop.f32.mrb[30].mxu0  ;;  %v7469_v63 = vcombine.high %v4859_v7, %v4863_v20  ;;  %6582 = vmatpush1.bf16.msra.mxu0 %v7889_v26  ;;  %v6681_v7 = vld [vmem:[#allocation11 + $0x18] sm:$0xff]  ;;  %v6698_v20 = vld [vmem:[#allocation11 + $0xa0] sm:$0xff] }
 0x3fc   :  { %v5665_v61 = vpop.f32.mrb[31].mxu0  ;;  %6583 = vmatprep.subr.bf16.mxu0 %v7894_v57  ;;  %v6705_v26 = vld [vmem:[#allocation11 + $0xd8] sm:$0xff] }
 0x3fd   :  { %5680 = vmatpush1.bf16.msra.mxu1 %v7436_v6  ;;  %v5721_v11 = vmax.f32 %v8567_v2, 0.0  ;;  %v7895_v6 = vld [vmem:[#allocation8 + $0x200] ss:$8 sps:$4 sm:$0xff]  }
 0x3fe   :  { %5681 = vmatprep.subr.bf16.mxu1 %v7445_v9  ;;  %v7900_v9 = vld [vmem:[#allocation8 + $0x214] ss:$8 sps:$4 sm:$0xff]   ;;  %v6678_v61 = vld [vmem:[#allocation11] sm:$0xff] }
 0x3ff   :  { %6584 = vmatpush1.bf16.msra.mxu0 %v7892_v62  ;;  %v5729_v1 = vpack.c.bf16 %v5721_v11, %v5721_v11  ;;  %v7910_v62 = vld [vmem:[#allocation8 + $0x250] ss:$8 sps:$4 sm:$0xff]  }
 0x400   :  { %6594 = vmatprep.subr.bf16.mxu0 %v7897_v36  ;;  %v7694_v36 = vpack.c.bf16 %v6705_v26, %v6704_v38  ;;  %v7916_v11 = vld [vmem:[#allocation8 + $0x270] ss:$8 sps:$4 sm:$0xff]   ;;  %v7975_v26 = vld [vmem:[#allocation8 + $0x3a4] ss:$8 sps:$4 sm:$0xff]  }
 0x401   :  { %5682 = vmatpush1.bf16.msra.mxu1 %v7444_v22  ;;  %v7674_v22 = vpack.c.bf16 %v6695_v50, %v6694_v48  ;;  %v7933_v48 = vld [vmem:[#allocation8 + $0x2c4] ss:$8 sps:$4 sm:$0xff]   ;;  %v7931_v50 = vld [vmem:[#allocation8 + $0x2c0] ss:$8 sps:$4 sm:$0xff]   ;;  %v7970_v38 = vld [vmem:[#allocation8 + $0x390] ss:$8 sps:$4 sm:$0xff]  }
 0x402   :  { %5683 = vmatprep.subr.bf16.mxu1 %v7453_v3  ;;  %v6679_v3 = vld [vmem:[#allocation11 + $0x8] sm:$0xff] }
 0x403   :  { %v7676_v2 = vpack.c.bf16 %v6679_v3, %v6678_v61  ;;  %v7936_v61 = vld [vmem:[#allocation8 + $0x2d4] ss:$8 sps:$4 sm:$0xff]   ;;  %v7939_v3 = vld [vmem:[#allocation8 + $0x2e4] ss:$8 sps:$4 sm:$0xff]  }
 0x405   :  { %5684 = vmatpush1.bf16.msra.mxu1 %v7452_v16  ;;  %v7678_v16 = vpack.c.bf16 %v6697_v4, %v6696_v14  ;;  %v7937_v14 = vld [vmem:[#allocation8 + $0x2e0] ss:$8 sps:$4 sm:$0xff]   ;;  %v415_v4 = vrot.slane %v8570_v5, %v8397_v51  ;;  %v7948_v51 = vld [vmem:[#allocation8 + $0x314] ss:$8 sps:$4 sm:$0xff]  }
 0x406   :  { %5685 = vmatprep.subr.bf16.mxu1 %v7461_v60  ;;  %v6680_v60 = vld [vmem:[#allocation11 + $0x10] sm:$0xff] }
 0x409   :  { %5686 = vmatpush1.bf16.msra.mxu1 %v7460_v40  ;;  %v6699_v40 = vld [vmem:[#allocation11 + $0xa8] sm:$0xff] }
 0x40a   :  { %5687 = vmatprep.subr.bf16.mxu1 %v7469_v63  ;;  %v7680_v63 = vpack.c.bf16 %v6681_v7, %v6680_v60  ;;  %v7682_v41 = vpack.c.bf16 %v6699_v40, %v6698_v20  ;;  %v7940_v40 = vld [vmem:[#allocation8 + $0x2f0] ss:$8 sps:$4 sm:$0xff]  }
 0x40d   :  { %5688 = vmatpush1.bf16.msra.mxu1 %v7468_v18  ;;  %v6682_v18 = vld [vmem:[#allocation11 + $0x20] sm:$0xff] }
 0x40e   :  { %5689 = vmatprep.subr.bf16.mxu1 %v7477_v17  ;;  %v6683_v17 = vld [vmem:[#allocation11 + $0x28] sm:$0xff] }
 0x411   :  { %5690 = vmatpush1.bf16.msra.mxu1 %v7476_v55  ;;  %v6701_v55 = vld [vmem:[#allocation11 + $0xb8] sm:$0xff] }
 0x412   :  { %5691 = vmatprep.subr.bf16.mxu1 %v7485_v12  ;;  %v7684_v12 = vpack.c.bf16 %v6683_v17, %v6682_v18  ;;  %v7686_v37 = vpack.c.bf16 %v6701_v55, %v6700_v10  ;;  %v7946_v55 = vld [vmem:[#allocation8 + $0x310] ss:$8 sps:$4 sm:$0xff]  }
 0x415   :  { %5692 = vmatpush1.bf16.msra.mxu1 %v7484_v13  ;;  %v6684_v13 = vld [vmem:[#allocation11 + $0x30] sm:$0xff] }
 0x416   :  { %5693 = vmatprep.subr.bf16.mxu1 %v7493_v59  ;;  %v6685_v59 = vld [vmem:[#allocation11 + $0x38] sm:$0xff] }
 0x419   :  { %5694 = vmatpush1.bf16.msra.mxu1 %v7492_v24  ;;  %v6703_v24 = vld [vmem:[#allocation11 + $0xc8] sm:$0xff] }
 0x41a   :  { %5695 = vmatprep.subr.bf16.mxu1 %v7501_v31  ;;  %v7688_v31 = vpack.c.bf16 %v6685_v59, %v6684_v13  ;;  %v7690_v32 = vpack.c.bf16 %v6703_v24, %v6702_v47  ;;  %v7957_v13 = vld [vmem:[#allocation8 + $0x344] ss:$8 sps:$4 sm:$0xff]   ;;  %v7955_v59 = vld [vmem:[#allocation8 + $0x340] ss:$8 sps:$4 sm:$0xff]   ;;  %v7958_v47 = vld [vmem:[#allocation8 + $0x350] ss:$8 sps:$4 sm:$0xff]  }
 0x41b   :  { %v7963_v24 = vld [vmem:[#allocation8 + $0x364] ss:$8 sps:$4 sm:$0xff]  }
 0x41d   :  { %5696 = vmatpush1.bf16.msra.mxu1 %v7500_v35  ;;  %v6686_v35 = vld [vmem:[#allocation11 + $0x40] sm:$0xff] }
 0x41e   :  { %5697 = vmatprep.subr.bf16.mxu1 %v7509_v28  ;;  %v6687_v28 = vld [vmem:[#allocation11 + $0x48] sm:$0xff] }
 0x41f   :  { %v7692_v57 = vpack.c.bf16 %v6687_v28, %v6686_v35  ;;  %v7969_v35 = vld [vmem:[#allocation8 + $0x384] ss:$8 sps:$4 sm:$0xff]   ;;  %v7967_v28 = vld [vmem:[#allocation8 + $0x380] ss:$8 sps:$4 sm:$0xff]  }
 0x421   :  { %5698 = vmatpush1.bf16.msra.mxu1 %v7508_v25  ;;  %v7912_v25 = vld [vmem:[#allocation8 + $0x254] ss:$8 sps:$4 sm:$0xff]  }
 0x422   :  { %7675 = vmatprep.subr.bf16.mxu1 %v7674_v22  ;;  %v7934_v22 = vld [vmem:[#allocation8 + $0x2d0] ss:$8 sps:$4 sm:$0xff]  }
 0x424   :  { %5700 = vmatmul.mubr.bf16.vlgmr.msra.gmra.mrb[20].mxu1 %v8537_v33 }
 0x425   :  { %7677 = vmatpush3.bf16.msra.mxu1 %v7676_v2  ;;  %v7942_v2 = vld [vmem:[#allocation8 + $0x2f4] ss:$8 sps:$4 sm:$0xff]  }
 0x426   :  { %7679 = vmatprep.subr.bf16.mxu1 %v7678_v16 }
 0x429   :  { %7681 = vmatpush3.bf16.msra.mxu1 %v7680_v63  ;;  %v5720_v63 = vmax.f32 %v8564_v0, 0.0  ;;  %v7954_v0 = vld [vmem:[#allocation8 + $0x334] ss:$8 sps:$4 sm:$0xff]  }
 0x42a   :  { %7683 = vmatprep.subr.bf16.mxu1 %v7682_v41  ;;  %v7945_v41 = vld [vmem:[#allocation8 + $0x304] ss:$8 sps:$4 sm:$0xff]  }
 0x42b   :  { %v5728_v10 = vpack.c.bf16 %v5720_v63, %v5720_v63  ;;  %v7638_v63 = vld [vmem:[#allocation13] ss:$0 sm:$0xff] }
 0x42d   :  { %7685 = vmatpush3.bf16.msra.mxu1 %v7684_v12  ;;  %v7951_v12 = vld [vmem:[#allocation8 + $0x324] ss:$8 sps:$4 sm:$0xff]  }
 0x42e   :  { %7687 = vmatprep.subr.bf16.mxu1 %v7686_v37  ;;  %v7952_v37 = vld [vmem:[#allocation8 + $0x330] ss:$8 sps:$4 sm:$0xff]  }
 0x431   :  { %7689 = vmatpush3.bf16.msra.mxu1 %v7688_v31  ;;  %v7961_v31 = vld [vmem:[#allocation8 + $0x360] ss:$8 sps:$4 sm:$0xff]  }
 0x432   :  { %7691 = vmatprep.subr.bf16.mxu1 %v7690_v32  ;;  %v7964_v32 = vld [vmem:[#allocation8 + $0x370] ss:$8 sps:$4 sm:$0xff]  }
 0x435   :  { %7693 = vmatpush3.bf16.msra.mxu1 %v7692_v57  ;;  %v7973_v57 = vld [vmem:[#allocation8 + $0x3a0] ss:$8 sps:$4 sm:$0xff]  }
 0x436   :  { %7695 = vmatprep.subr.bf16.mxu1 %v7694_v36  ;;  %v7976_v36 = vld [vmem:[#allocation8 + $0x3b0] ss:$8 sps:$4 sm:$0xff]  }
 0x4b7   :  { %v5619_v34 = vpop.f32.mrb[16].mxu1 }
 0x4b8   :  { %v7712_v33 = vadd.f32 %v5619_v34, %v395_v39  ;;  %v5621_v52 = vpop.f32.mrb[17].mxu1  ;;  %v6688_v39 = vld [vmem:[#allocation11 + $0x50] sm:$0xff]  ;;  %v7915_v34 = vld [vmem:[#allocation8 + $0x264] ss:$8 sps:$4 sm:$0xff]  }
 0x4b9   :  { %v7713_v23 = vadd.f32 %v5621_v52, %v399_v30  ;;  %v5623_v53 = vpop.f32.mrb[18].mxu1  ;;  %v6689_v30 = vld [vmem:[#allocation11 + $0x58] sm:$0xff]  ;;  %v6707_v52 = vld [vmem:[#allocation11 + $0xe8] sm:$0xff] }
 0x4ba   :  { %v5718_v27 = vmax.f32 %v7712_v33, 0.0  ;;  %v5624_v43 = vpop.f32.mrb[19].mxu1  ;;  %v6706_v33 = vld [vmem:[#allocation11 + $0xe0] sm:$0xff] }
 0x4bb   :  { %v5719_v42 = vmax.f32 %v7713_v23, 0.0  ;;  %v7696_v23 = vpack.c.bf16 %v6689_v30, %v6688_v39  ;;  %v7913_v53 = vld [vmem:[#allocation8 + $0x260] ss:$8 sps:$4 sm:$0xff]   ;;  %v7918_v43 = vld [vmem:[#allocation8 + $0x274] ss:$8 sps:$4 sm:$0xff]  }
 0x4bc   :  { %v5726_v58 = vpack.c.bf16 %v5718_v27, %v5718_v27  ;;  %v7698_v27 = vpack.c.bf16 %v6707_v52, %v6706_v33  ;;  %v7981_v39 = vld [vmem:[#allocation8 + $0x3c4] ss:$8 sps:$4 sm:$0xff]   ;;  %v7979_v30 = vld [vmem:[#allocation8 + $0x3c0] ss:$8 sps:$4 sm:$0xff]   ;;  %v7982_v33 = vld [vmem:[#allocation8 + $0x3d0] ss:$8 sps:$4 sm:$0xff]   ;;  %v411_v52 = vrot.slane %v8570_v5, %v8393_v49 }
 0x4bd   :  { %v5727_v56 = vpack.c.bf16 %v5719_v42, %v5719_v42  ;;  %7697 = vmatpush3.bf16.msra.mxu1 %v7696_v23  ;;  %v7921_v42 = vld [vmem:[#allocation8 + $0x284] ss:$8 sps:$4 sm:$0xff]   ;;  %v6709_v49 = vld [vmem:[#allocation11 + $0xf8] sm:$0xff]  ;;  %v6692_v5 = vld [vmem:[#allocation11 + $0x70] sm:$0xff] }
 0x4be   :  { %7699 = vmatprep.subr.bf16.mxu1 %v7698_v27  ;;  %v7987_v23 = vld [vmem:[#allocation8 + $0x3e4] ss:$8 sps:$4 sm:$0xff]  }
 0x4bf   :  { %6585 = vmatprep.mubr.bf16.mxu0 %v5727_v56  ;;  %v7919_v56 = vld [vmem:[#allocation8 + $0x280] ss:$8 sps:$4 sm:$0xff]  }
 0x4c0   :  { %6586 = vmatmul.mubr.bf16.vlgmr.msra.gmra.mrb[32].mxu0 %v5726_v58  ;;  %v7922_v58 = vld [vmem:[#allocation8 + $0x290] ss:$8 sps:$4 sm:$0xff]  }
 0x4c1   :  { %6595 = vmatpush1.bf16.msra.mxu0 %v7895_v6  ;;  %6626 = vmatprep.mubr.bf16.mxu0 %v5729_v1  ;;  %v7924_v6 = vld [vmem:[#allocation8 + $0x294] ss:$8 sps:$4 sm:$0xff]   ;;  %v7925_v1 = vld [vmem:[#allocation8 + $0x2a0] ss:$8 sps:$4 sm:$0xff]  }
 0x4c2   :  { %6596 = vmatprep.subr.bf16.mxu0 %v7900_v9  ;;  %v7927_v9 = vld [vmem:[#allocation8 + $0x2a4] ss:$8 sps:$4 sm:$0xff]  }
 0x4c5   :  { %6597 = vmatpush1.bf16.msra.mxu0 %v7898_v45  ;;  %v7930_v45 = vld [vmem:[#allocation8 + $0x2b4] ss:$8 sps:$4 sm:$0xff]  }
 0x4c6   :  { %6598 = vmatprep.subr.bf16.mxu0 %v7903_v8  ;;  %v7928_v8 = vld [vmem:[#allocation8 + $0x2b0] ss:$8 sps:$4 sm:$0xff]  }
 0x4c9   :  { %6599 = vmatpush1.bf16.msra.mxu0 %v7901_v54 }
 0x4ca   :  { %6600 = vmatprep.subr.bf16.mxu0 %v7906_v15  ;;  %v7943_v15 = vld [vmem:[#allocation8 + $0x300] ss:$8 sps:$4 sm:$0xff]  }
 0x4cd   :  { %6601 = vmatpush1.bf16.msra.mxu0 %v7904_v29  ;;  %v7949_v29 = vld [vmem:[#allocation8 + $0x320] ss:$8 sps:$4 sm:$0xff]  }
 0x4ce   :  { %6602 = vmatprep.subr.bf16.mxu0 %v7909_v21  ;;  %v7960_v21 = vld [vmem:[#allocation8 + $0x354] ss:$8 sps:$4 sm:$0xff]  }
 0x4d1   :  { %6603 = vmatpush1.bf16.msra.mxu0 %v7907_v19  ;;  %v7966_v19 = vld [vmem:[#allocation8 + $0x374] ss:$8 sps:$4 sm:$0xff]  }
 0x4d2   :  { %6604 = vmatprep.subr.bf16.mxu0 %v7912_v25  ;;  %v7972_v25 = vld [vmem:[#allocation8 + $0x394] ss:$8 sps:$4 sm:$0xff]  }
 0x4d5   :  { %6605 = vmatpush1.bf16.msra.mxu0 %v7910_v62  ;;  %v7978_v62 = vld [vmem:[#allocation8 + $0x3b4] ss:$8 sps:$4 sm:$0xff]  }
 0x4d6   :  { %6606 = vmatprep.subr.bf16.mxu0 %v7915_v34  ;;  %v7984_v34 = vld [vmem:[#allocation8 + $0x3d4] ss:$8 sps:$4 sm:$0xff]  }
 0x4d9   :  { %6607 = vmatpush1.bf16.msra.mxu0 %v7913_v53  ;;  %v7985_v53 = vld [vmem:[#allocation8 + $0x3e0] ss:$8 sps:$4 sm:$0xff]  }
 0x4da   :  { %6608 = vmatprep.subr.bf16.mxu0 %v7918_v43  ;;  %v7990_v43 = vld [vmem:[#allocation8 + $0x3f4] ss:$8 sps:$4 sm:$0xff]  }
 0x4dd   :  { %6609 = vmatpush1.bf16.msra.mxu0 %v7916_v11  ;;  %v7988_v11 = vld [vmem:[#allocation8 + $0x3f0] ss:$8 sps:$4 sm:$0xff]  }
 0x4de   :  { %6610 = vmatprep.subr.bf16.mxu0 %v7921_v42 }
 0x4e1   :  { %6611 = vmatpush1.bf16.msra.mxu0 %v7919_v56 }
 0x4e2   :  { %6612 = vmatprep.subr.bf16.mxu0 %v7924_v6  ;;  %v6690_v6 = vld [vmem:[#allocation11 + $0x60] sm:$0xff] }
 0x4e5   :  { %6613 = vmatpush1.bf16.msra.mxu0 %v7922_v58  ;;  %v6691_v58 = vld [vmem:[#allocation11 + $0x68] sm:$0xff] }
 0x4e6   :  { %6614 = vmatprep.subr.bf16.mxu0 %v7927_v9  ;;  %v7700_v9 = vpack.c.bf16 %v6691_v58, %v6690_v6 }
 0x4e8   :  { %7701 = vmatpush3.bf16.msra.mxu1 %v7700_v9 }
 0x4e9   :  { %6615 = vmatpush1.bf16.msra.mxu0 %v7925_v1  ;;  %v6708_v1 = vld [vmem:[#allocation11 + $0xf0] sm:$0xff] }
 0x4ea   :  { %6616 = vmatprep.subr.bf16.mxu0 %v7930_v45  ;;  %v7702_v45 = vpack.c.bf16 %v6709_v49, %v6708_v1 }
 0x4ec   :  { %7703 = vmatprep.subr.bf16.mxu1 %v7702_v45 }
 0x4ed   :  { %6617 = vmatpush1.bf16.msra.mxu0 %v7928_v8  ;;  %v6693_v8 = vld [vmem:[#allocation11 + $0x78] sm:$0xff] }
 0x4ee   :  { %6618 = vmatprep.subr.bf16.mxu0 %v7933_v48  ;;  %v7704_v48 = vpack.c.bf16 %v6693_v8, %v6692_v5 }
 0x4f0   :  { %7705 = vmatpush3.bf16.msra.mxu1 %v7704_v48 }
 0x4f1   :  { %6619 = vmatpush1.bf16.msra.mxu0 %v7931_v50  ;;  %v5860_v50 = vld [vmem:[#allocation10] sm:$0x3] }
 0x4f2   :  { %6620 = vmatprep.subr.bf16.mxu0 %v7936_v61  ;;  %v5865_v61 = vrot.slane %v5860_v50, %v8383_v44 }
 0x4f5   :  { %6621 = vmatpush1.bf16.msra.mxu0 %v7934_v22  ;;  %v5869_v22 = vrot.slane %v5860_v50, %v8387_v46 }
 0x4f6   :  { %6622 = vmatprep.subr.bf16.mxu0 %v7939_v3 }
 0x4f7   :  { %v8579_v16 = vpop.f32.mrb[20].mxu1 }
 0x4f8   :  { %v5703_v60 = vpop.f32.mrb[21].mxu1  ;;  %v7720_v27 = vadd.f32 %v8579_v16, %v411_v52 }
 0x4f9   :  { %v7721_v7 = vadd.f32 %v5703_v60, %v415_v4  ;;  %6623 = vmatpush1.bf16.msra.mxu0 %v7937_v14  ;;  %v5705_v20 = vpop.f32.mrb[22].mxu1 }
 0x4fa   :  { %v5706_v54 = vpop.f32.mrb[23].mxu1  ;;  %6624 = vmatprep.subr.bf16.mxu0 %v7942_v2  ;;  %v5722_v42 = vmax.f32 %v7720_v27, 0.0 }
 0x4fb   :  { %v5723_v18 = vmax.f32 %v7721_v7, 0.0 }
 0x4fc   :  { %v5730_v56 = vpack.c.bf16 %v5722_v42, %v5722_v42 }
 0x4fd   :  { %v5731_v17 = vpack.c.bf16 %v5723_v18, %v5723_v18  ;;  %6625 = vmatpush1.bf16.msra.mxu0 %v7940_v40 }
 0x4fe   :  { %6635 = vmatprep.subr.bf16.mxu0 %v7945_v41 }
 0x500   :  { %6627 = vmatmul.mubr.bf16.vlgmr.msra.gmra.mrb[32].mxu0 %v5728_v10 }
 0x501   :  { %6636 = vmatpush1.bf16.msra.mxu0 %v7943_v15  ;;  %6667 = vmatprep.mubr.bf16.mxu0 %v5731_v17 }
 0x502   :  { %6637 = vmatprep.subr.bf16.mxu0 %v7948_v51 }
 0x505   :  { %6638 = vmatpush1.bf16.msra.mxu0 %v7946_v55 }
 0x506   :  { %6639 = vmatprep.subr.bf16.mxu0 %v7951_v12 }
 0x509   :  { %6640 = vmatpush1.bf16.msra.mxu0 %v7949_v29 }
 0x50a   :  { %6641 = vmatprep.subr.bf16.mxu0 %v7954_v0 }
 0x50d   :  { %6642 = vmatpush1.bf16.msra.mxu0 %v7952_v37 }
 0x50e   :  { %6643 = vmatprep.subr.bf16.mxu0 %v7957_v13 }
 0x511   :  { %6644 = vmatpush1.bf16.msra.mxu0 %v7955_v59 }
 0x512   :  { %6645 = vmatprep.subr.bf16.mxu0 %v7960_v21 }
 0x515   :  { %6646 = vmatpush1.bf16.msra.mxu0 %v7958_v47 }
 0x516   :  { %6647 = vmatprep.subr.bf16.mxu0 %v7963_v24 }
 0x519   :  { %6648 = vmatpush1.bf16.msra.mxu0 %v7961_v31 }
 0x51a   :  { %6649 = vmatprep.subr.bf16.mxu0 %v7966_v19 }
 0x51d   :  { %6650 = vmatpush1.bf16.msra.mxu0 %v7964_v32 }
 0x51e   :  { %6651 = vmatprep.subr.bf16.mxu0 %v7969_v35 }
 0x521   :  { %6652 = vmatpush1.bf16.msra.mxu0 %v7967_v28 }
 0x522   :  { %6653 = vmatprep.subr.bf16.mxu0 %v7972_v25 }
 0x525   :  { %6654 = vmatpush1.bf16.msra.mxu0 %v7970_v38 }
 0x526   :  { %6655 = vmatprep.subr.bf16.mxu0 %v7975_v26 }
 0x529   :  { %6656 = vmatpush1.bf16.msra.mxu0 %v7973_v57 }
 0x52a   :  { %6657 = vmatprep.subr.bf16.mxu0 %v7978_v62 }
 0x52d   :  { %6658 = vmatpush1.bf16.msra.mxu0 %v7976_v36 }
 0x52e   :  { %6659 = vmatprep.subr.bf16.mxu0 %v7981_v39 }
 0x531   :  { %6660 = vmatpush1.bf16.msra.mxu0 %v7979_v30 }
 0x532   :  { %6661 = vmatprep.subr.bf16.mxu0 %v7984_v34 }
 0x535   :  { %6662 = vmatpush1.bf16.msra.mxu0 %v7982_v33 }
 0x536   :  { %6663 = vmatprep.subr.bf16.mxu0 %v7987_v23 }
 0x539   :  { %6664 = vmatpush1.bf16.msra.mxu0 %v7985_v53 }
 0x53a   :  { %6665 = vmatprep.subr.bf16.mxu0 %v7990_v43 }
 0x53d   :  { %6666 = vmatpush1.bf16.msra.mxu0 %v7988_v11 }
 0x540   :  { %6668 = vmatmul.mubr.bf16.vlgmr.msra.gmra.mrb[32].mxu0 %v5730_v56 }
 0x613   :  { %v6669_v3 = vpop.f32.mrb[32].mxu0 }
 0x614   :  { %v7722_v14 = vadd.f32 %v6669_v3, %v5865_v61  ;;  %v6671_v4 = vpop.f32.mrb[33].mxu0 }
 0x615   :  { %v7723_v2 = vadd.f32 %v6671_v4, %v5869_v22  ;;  %v6673_v16 = vpop.f32.mrb[34].mxu0 }
 0x616   :  { %v6674_v60 = vpop.f32.mrb[35].mxu0  ;;  %v6676_v20 = vmax.f32 %v7722_v14, 0.0 }
 0x617   :  { %v6677_v7 = vmax.f32 %v7723_v2, 0.0 }
 0x619   :  { %6781 = vmatprep.mubr.f32.mxu1 %v6677_v7 }
 0x61a   :  { %6782 = vmatmul.mubr.f32.vlgmr.msra.gmra.mrb[32].mxu1 %v6676_v20 }
 0x6ed   :  { %v7671_v40 = vpop.f32.mrb[32].mxu1 }
 0x6ee   :  { %v7672_v54 = vpop.f32.mrb[33].mxu1 }
 0x6ef   :  { %v7673_v41 = vadd.f32 %v7672_v54, %v7671_v40 }
 0x6f1   :  { %v6784_v18 = vadd.f32 %v7673_v41, %v7638_v63 }
 0x6f3   :  { %6787 = vst [vmem:[#allocation14] sm:$0xff] %v6784_v18 }
 0x6f4   :  { %8157 = shalt.err (!%p8154_p4)
}
 0x6f5   :  { %s8158_s23 = scalar_lea.hbm %s8607_s8, 128 }
 0x6f6   :  { %p8159_p5 = scmp.ne.s32.totalorder %s8607_s8, %s8158_s23  ;;  %p8162_p6 = scmp.lt.u32.totalorder %s8158_s23, %s8607_s8 }
 0x6f8   :  { %p8164_p7 = pnand %p8162_p6, %p8159_p5 }
 0x6fa   :  { %8167 = shalt.err (!%p8164_p7)
}
 0x6fb   :  { %6797 = dma.vmem_to_hbm [thread:$0]  %s6795_s30, 128, %s8607_s8, [#allocation4]  }
 0x6fc   :  { %8176 = dma.done.wait [#allocation4], 128  }
 0x6fd   :  { %8177 = vsyncadd [#allocation4], 4294967168 }
 0x6fe   :  { %6801 = vsyncpa [#allocation3], 1 }
 0x6ff   :  { %6802 = vsyncpa [#allocation6], 1 }
 0x700   :  { %6803 = vsyncpa [#allocation9], 1 }
 0x701   :  { %6804 = vsyncpa [#allocation12], 1 }
 0x702   :  { %6805 = vsyncpa [#allocation4], 1 }

</bundles_post_ra>
